<compile_context>
chip_gen: v6e
topology: v6e:2x2x1
jax: 0.10.0
libtpu: 0.0.40
codegen_flags: <defaults>
</compile_context>

<pallas_src>
import functools

import jax
import jax.numpy as jnp
from jax import lax
from jax.experimental import pallas as pl
from jax.experimental.pallas import tpu as pltpu

LANE = 128
SUBLANE = 8


def _round_up(v, m):
    return (v + m - 1) // m * m


# ----------------------------- fused Pallas kernel ---------------------------

def fused_gcn_kernel(x_ref, adj_ref, iw_ref, ib_ref, wsn_ref, wg_ref, cb_ref,
                     *rest,
                     num_mlp, mlp_kinds, n_valid, n_pad, hidden, tile_m,
                     inv_n, out_valid, use_softmax, fuse_wk):
    """Whole BiScaleGCN forward.  Grid = (num_layers+1, num_row_tiles).

    step (0, m)   : x = relu(x_in @ Wi + bi)                       (init Linear)
    step (k>0, m) : agg = A[tile] @ x_prev                        (neighbour mean)
                    g   = (colsum(x_prev)/n) @ Wg + b             (global "star")
                    h   = [x_prev | agg] @ [Ws ; Wn] + g          (MXU)
                    x   = leaky_relu(h, 0.1)
    last step additionally runs the final MLP (+ masked log_softmax) per tile.
    Activations ping-pong between the two halves of a bf16 VMEM scratch.
    """
    mlp_refs = rest[:2 * num_mlp]
    o_ref = rest[2 * num_mlp]
    xbuf_ref = rest[2 * num_mlp + 1]       # bf16 (2*n_pad, C or 2C) ping-pong
    colsum_ref = rest[2 * num_mlp + 2]     # f32 (1, C) column-sum of activations
    g_ref = rest[2 * num_mlp + 3]          # f32 (1, C) per-layer star bias

    k = pl.program_id(0)                   # 0 = init, 1..L = conv layer k-1
    m = pl.program_id(1)                   # node-row tile
    last = pl.num_programs(0) - 1

    r0 = m * tile_m                                       # first row of tile
    woff = pl.multiple_of((k % 2) * n_pad + r0, SUBLANE)  # write rows (ping-pong)
    rows = r0 + lax.broadcasted_iota(jnp.int32, (tile_m, hidden), 0)
    row_ok = rows < n_valid                               # padded node rows -> 0

    @pl.when((k == 0) & (m == 0))
    def _zero_colsum():
        colsum_ref[...] = jnp.zeros_like(colsum_ref)

    # ---- step 0: init Linear + ReLU (dropout is eval-mode identity)
    @pl.when(k == 0)
    def _init_step():
        h0 = jnp.dot(x_ref[...].astype(jnp.bfloat16), iw_ref[...],
                     preferred_element_type=jnp.float32) + ib_ref[...]
        a = jnp.where(row_ok, jnp.maximum(h0, 0.0), 0.0)
        xbuf_ref[pl.ds(woff, tile_m), 0:hidden] = a.astype(jnp.bfloat16)
        colsum_ref[...] += jnp.sum(a, axis=0, keepdims=True)

    # ---- steps 1..L: BiScaleStarGConv layer k-1, fused leaky_relu(0.1)
    @pl.when(k > 0)
    def _conv_step():
        roff = pl.multiple_of(((k - 1) % 2) * n_pad, SUBLANE)
        roff_t = pl.multiple_of(roff + r0, SUBLANE)

        # global "star" scale folded into a [1, C] bias, built once per layer
        # from the f32 column-sum (padded rows already excluded).
        @pl.when(m == 0)
        def _star():
            mean = colsum_ref[...] * inv_n
            g_ref[...] = jnp.dot(mean.astype(jnp.bfloat16), wg_ref[0],
                                 preferred_element_type=jnp.float32) + cb_ref[0]
            colsum_ref[...] = jnp.zeros_like(colsum_ref)

        # local scale: mean over in-neighbours (row-normalized adjacency slab)
        x_prev = xbuf_ref[pl.ds(roff, n_pad), 0:hidden]            # bf16 [NP, C]
        agg = jnp.dot(adj_ref[...], x_prev,
                      preferred_element_type=jnp.float32)          # f32 [tm, C]

        if fuse_wk:
            # v6e/v7x: stage agg next to x_prev inside the READ slot so the
            # weight matmul runs as one K=2C MXU pass with no materialized
            # concatenate (x half is already in place).
            xbuf_ref[pl.ds(roff_t, tile_m), hidden:2 * hidden] = (
                agg.astype(jnp.bfloat16))
            xa = xbuf_ref[pl.ds(roff_t, tile_m), :]                # bf16 [tm, 2C]
            h = jnp.dot(xa, wsn_ref[0], preferred_element_type=jnp.float32)
        else:
            # v5e: 128-deep MXU is already full at K=C; two accumulated passes
            # avoid any staging copy.
            x_t = xbuf_ref[pl.ds(roff_t, tile_m), 0:hidden]
            h = jnp.dot(x_t, wsn_ref[0, 0:hidden, :],
                        preferred_element_type=jnp.float32)
            h = h + jnp.dot(agg.astype(jnp.bfloat16),
                            wsn_ref[0, hidden:2 * hidden, :],
                            preferred_element_type=jnp.float32)

        h = h + g_ref[...]
        a = jnp.where(h > 0, h, 0.1 * h)                           # leaky_relu
        a = jnp.where(row_ok, a, 0.0)
        xbuf_ref[pl.ds(woff, tile_m), 0:hidden] = a.astype(jnp.bfloat16)
        colsum_ref[...] += jnp.sum(a, axis=0, keepdims=True)

    # ---- last step: final MLP (res_connect) + optional masked log_softmax
    @pl.when(k == last)
    def _final_step():
        y = xbuf_ref[pl.ds(woff, tile_m), 0:hidden].astype(jnp.float32)
        for i, kind in enumerate(mlp_kinds):
            w_ref = mlp_refs[2 * i]
            b_ref = mlp_refs[2 * i + 1]
            hh = jnp.dot(y.astype(jnp.bfloat16), w_ref[...],
                         preferred_element_type=jnp.float32) + b_ref[...]
            if kind == "hidden":
                y = jnp.maximum(hh, 0.0) + y                       # res_connect
            else:
                y = hh
        if use_softmax:
            lane = lax.broadcasted_iota(jnp.int32, y.shape, 1)
            valid = lane < out_valid                   # mask padded class lanes
            ym = jnp.where(valid, y, -jnp.inf)
            mx = jnp.max(ym, axis=-1, keepdims=True)
            s = ym - mx
            lse = jnp.log(jnp.sum(jnp.where(valid, jnp.exp(s), 0.0),
                                  axis=-1, keepdims=True))
            y = jnp.where(valid, s - lse, 0.0)         # keep padded lanes finite
        o_ref[...] = y.astype(o_ref.dtype)


# ----------------------------- wrapper helpers --------------------------------

def dense_mean_adj(edge_index, num_nodes, num_pad=None, dtype=jnp.float32):
    """Row-normalized dense adjacency A[dst, src] = 1/deg_in(dst), built once
    directly at the padded shape (single dense scatter, normalize + cast fused).
    Zero in-degree is clipped to 1 (mean over no neighbours -> 0)."""
    del num_nodes
    if num_pad is None:
        num_pad = int(jnp.max(edge_index)) + 1  # unused path; callers pass num_pad
    src, dst = edge_index[0], edge_index[1]
    deg = jnp.zeros((num_pad,), jnp.float32).at[dst].add(1.0)
    deg = jnp.clip(deg, 1.0, None)
    vals = (1.0 / deg)[dst]
    a = jnp.zeros((num_pad, num_pad), jnp.float32).at[dst, src].add(vals)
    return a.astype(dtype)


def _default_fuse_wk():
    # K=2C fills the 256-deep MXU on v6e/v7x; on v5e (128-deep) two accumulated
    # K=C passes are equally fast and need no staging columns.
    try:
        return "v5" not in jax.devices()[0].device_kind.lower()
    except Exception:
        return True


def _default_tile_m(n):
    n8 = _round_up(n, SUBLANE)
    # Small graphs: one resident row tile (adjacency fetched once, stays in
    # VMEM).  Large graphs: stream 512-row adjacency slabs from HBM so VMEM is
    # no longer the cap on N (x buffers are O(N*C), not O(N^2)).
    return n8 if n8 <= 2048 else 512


def _vmem_limit_bytes(n_pad, tile_m, cin, hidden, out_pad, num_tiles,
                      mlp_shapes, fuse_wk, single_buffer):
    adj_bufs = 1 if (num_tiles == 1 and single_buffer) else 2
    const_bufs = 1 if single_buffer else 2
    xcols = 2 * hidden if fuse_wk else hidden
    b = adj_bufs * tile_m * n_pad * 2                        # adjacency blocks
    b += 2 * tile_m * cin * 4                                # input-x blocks
    b += const_bufs * (cin * hidden * 2 + hidden * 4)        # init W / b
    b += 2 * (3 * hidden * hidden * 2 + hidden * 4)          # conv Wsn+Wg+b
    for (wsz, bsz) in mlp_shapes:
        b += const_bufs * (wsz * 2 + bsz * 4)                # MLP W / b
    b += 2 * tile_m * out_pad * 4                            # output blocks
    b += 2 * n_pad * xcols * 2 + 2 * hidden * 4              # scratch buffers
    b = int(b * 1.35) + (2 << 20)                            # Mosaic headroom
    try:
        cap = pltpu.get_tpu_info().vmem_capacity_bytes
    except Exception:
        cap = 64 << 20                                       # v7x-safe fallback
    return max(min(b, cap - (8 << 20)), 32 << 20)


# ----------------------------- forward ----------------------------------------

def biscale_gcn_forward(params, x, edge_index, use_softmax=True,
                        tile_m=None, fuse_wk=None):
    n, cin = x.shape
    hidden = params["init_w"].shape[1]
    num_layers = len(params["convs"])
    out_ch = params["mlp"][-1]["w"].shape[1]

    # TODO(synk): generalize to hidden % 128 != 0 via lane padding.  Note that
    # hidden=128 only half-fills the 256-wide MXU on v6e/v7x; prefer a multiple
    # of 256 there if the model allows.
    assert hidden % LANE == 0, "hidden_channels must be a multiple of 128"

    if fuse_wk is None:
        fuse_wk = _default_fuse_wk()
    if tile_m is None:
        tile_m = _default_tile_m(n)
    tile_m = _round_up(max(int(tile_m), SUBLANE), SUBLANE)
    n_pad = _round_up(n, tile_m)
    num_tiles = n_pad // tile_m
    out_pad = _round_up(out_ch, LANE)
    num_steps = num_layers + 1        # step 0 = init Linear, 1..L = conv layers
    last_k = num_steps - 1

    # dense mean-aggregation adjacency built once at padded shape (bf16 MXU)
    # TODO(synk): block-sparse / CSR-tile streaming via PrefetchScalarGridSpec
    # for very large or very sparse graphs; fp8 adjacency operand on v7x.
    adj = dense_mean_adj(edge_index, n, n_pad, jnp.bfloat16)
    x_pad = jnp.pad(x.astype(jnp.float32), ((0, n_pad - n), (0, 0)))

    iw = params["init_w"].astype(jnp.bfloat16)
    ib = params["init_b"].astype(jnp.float32)

    # per-layer conv weights, stacked & streamed one layer per outer grid step
    convs = params["convs"]
    if num_layers == 0:               # dummy block (conv path never executes)
        convs = [dict(ws=jnp.zeros((hidden, hidden), jnp.float32),
                      wn=jnp.zeros((hidden, hidden), jnp.float32),
                      wg=jnp.zeros((hidden, hidden), jnp.float32),
                      b=jnp.zeros((1, hidden), jnp.float32))]
    wsn = jnp.stack([jnp.concatenate([c["ws"], c["wn"]], axis=0)
                     for c in convs]).astype(jnp.bfloat16)          # [L,2C,C]
    wg = jnp.stack([c["wg"] for c in convs]).astype(jnp.bfloat16)   # [L,C,C]
    cb = jnp.stack([c["b"] for c in convs]).astype(jnp.float32)     # [L,1,C]

    mlp_inputs, mlp_kinds, mlp_shapes = [], [], []
    for layer in params["mlp"]:
        w, b = layer["w"], layer["b"]
        if layer["kind"] == "last":                 # pad classes to 128 lanes
            w = jnp.pad(w, ((0, 0), (0, out_pad - out_ch)))
            b = jnp.pad(b, ((0, 0), (0, out_pad - out_ch)))
        mlp_inputs += [w.astype(jnp.bfloat16), b.astype(jnp.float32)]
        mlp_kinds.append(layer["kind"])
        mlp_shapes.append((w.size, b.size))
    mlp_kinds = tuple(mlp_kinds)

    kernel = functools.partial(
        fused_gcn_kernel,
        num_mlp=len(mlp_kinds), mlp_kinds=mlp_kinds,
        n_valid=n, n_pad=n_pad, hidden=hidden, tile_m=tile_m,
        inv_n=1.0 / float(n), out_valid=out_ch,
        use_softmax=use_softmax, fuse_wk=fuse_wk)

    xcols = 2 * hidden if fuse_wk else hidden
    per_layer = lambda shape: pl.BlockSpec(
        shape, lambda k, m: (jnp.maximum(k - 1, 0), 0, 0))

    def run(single_buffer):
        def const2d(shape):
            # constant-index blocks: a second pipeline buffer only wastes VMEM
            if single_buffer:
                return pl.BlockSpec(shape, lambda k, m: (0, 0),
                                    pipeline_mode=pl.Buffered(1))
            return pl.BlockSpec(shape, lambda k, m: (0, 0))

        resident = single_buffer and num_tiles == 1
        adj_spec = pl.BlockSpec(
            (tile_m, n_pad), lambda k, m: (jnp.where(k == 0, 0, m), 0),
            **(dict(pipeline_mode=pl.Buffered(1)) if resident else {}))
        x_spec = pl.BlockSpec((tile_m, cin),
                              lambda k, m: (jnp.where(k == 0, m, 0), 0))
        out_spec = pl.BlockSpec(
            (tile_m, out_pad), lambda k, m: (jnp.where(k == last_k, m, 0), 0),
            **(dict(pipeline_mode=pl.Buffered(1)) if resident else {}))

        in_specs = [
            x_spec,                                  # node features
            adj_spec,                                # adjacency row slab (bf16)
            const2d((cin, hidden)),                  # init W
            const2d((1, hidden)),                    # init b
            per_layer((1, 2 * hidden, hidden)),      # [Ws ; Wn] per layer
            per_layer((1, hidden, hidden)),          # Wg per layer
            per_layer((1, 1, hidden)),               # conv bias per layer
        ]
        for a in mlp_inputs:
            in_specs.append(const2d(a.shape))

        vmem_limit = _vmem_limit_bytes(n_pad, tile_m, cin, hidden, out_pad,
                                       num_tiles, mlp_shapes, fuse_wk,
                                       single_buffer)

        return pl.pallas_call(
            kernel,
            out_shape=jax.ShapeDtypeStruct((n_pad, out_pad), jnp.float32),
            grid_spec=pltpu.PrefetchScalarGridSpec(
                num_scalar_prefetch=0,
                grid=(num_steps, num_tiles),
                in_specs=in_specs,
                out_specs=out_spec,
                scratch_shapes=[
                    pltpu.VMEM((2 * n_pad, xcols), jnp.bfloat16),  # x ping-pong
                    pltpu.VMEM((1, hidden), jnp.float32),          # column sum
                    pltpu.VMEM((1, hidden), jnp.float32),          # star bias g
                ]),
            compiler_params=pltpu.CompilerParams(
                dimension_semantics=("arbitrary", "arbitrary"),
                vmem_limit_bytes=vmem_limit),
        )(x_pad, adj, iw, ib, wsn, wg, cb, *mlp_inputs)

    # TODO(synk): on v7x, shard the row-tile axis across both TensorCores
    # (core_map + per-layer x exchange through VMEM_SHARED).
    try:
        out = run(single_buffer=True)
    except Exception:
        # pl.Buffered(1) unsupported on this jax version -> default buffering
        out = run(single_buffer=False)
    return out[:n, :out_ch]


# ----------------------------- params ------------------------------------------

def _uniform_init(key, shape, fan_in):
    bound = 1.0 / jnp.sqrt(jnp.asarray(float(fan_in)))
    return jax.random.uniform(key, shape, jnp.float32, -bound, bound)


def init_params(key, in_channels, hidden, out_channels, num_layers, num_final_update):
    n_keys = 2 + 4 * num_layers + 2 * max(num_final_update, 1)
    keys = iter(jax.random.split(key, n_keys))
    params = {}
    params["init_w"] = _uniform_init(next(keys), (in_channels, hidden), in_channels)
    params["init_b"] = _uniform_init(next(keys), (1, hidden), in_channels)
    convs = []
    for _ in range(num_layers):
        convs.append(dict(
            ws=_uniform_init(next(keys), (hidden, hidden), hidden),
            wn=_uniform_init(next(keys), (hidden, hidden), hidden),
            wg=_uniform_init(next(keys), (hidden, hidden), hidden),
            b=_uniform_init(next(keys), (1, hidden), hidden),
        ))
    params["convs"] = convs
    # TODO(synk): exact MLP source unavailable; standard Linear(+ReLU+res) stack.
    mlp = []
    if num_final_update <= 1:
        mlp.append(dict(w=_uniform_init(next(keys), (hidden, out_channels), hidden),
                        b=_uniform_init(next(keys), (1, out_channels), hidden),
                        kind="last"))
    else:
        for _ in range(num_final_update - 1):
            mlp.append(dict(w=_uniform_init(next(keys), (hidden, hidden), hidden),
                            b=_uniform_init(next(keys), (1, hidden), hidden),
                            kind="hidden"))
        mlp.append(dict(w=_uniform_init(next(keys), (hidden, out_channels), hidden),
                        b=_uniform_init(next(keys), (1, out_channels), hidden),
                        kind="last"))
    params["mlp"] = mlp
    return params


# ----------------------------- reference (mirrors kernel numerics) -------------

def reference_forward(params, x, edge_index, use_softmax=True):
    """Pure-JAX reference: bf16 MXU operands with f32 accumulation, activations
    stored between layers in bf16 (as in the kernel's VMEM scratch), the global
    mean / residual paths kept in f32."""
    n = x.shape[0]
    adj = dense_mean_adj(edge_index, n, n, jnp.float32)

    def bdot(a, b):
        return jnp.dot(a.astype(jnp.bfloat16), b.astype(jnp.bfloat16),
                       preferred_element_type=jnp.float32)

    x = jnp.maximum(bdot(x, params["init_w"]) + params["init_b"], 0.0)
    for c in params["convs"]:
        xq = x.astype(jnp.bfloat16).astype(jnp.float32)    # bf16 VMEM storage
        agg = bdot(adj, xq)
        mean = jnp.mean(x, axis=0, keepdims=True)          # f32 column-sum path
        g = bdot(mean, c["wg"]) + c["b"]
        wsn = jnp.concatenate([c["ws"], c["wn"]], axis=0)
        h = bdot(jnp.concatenate([xq, agg], axis=-1), wsn) + g
        x = jnp.where(h > 0, h, 0.1 * h)
    y = x.astype(jnp.bfloat16).astype(jnp.float32)          # bf16 VMEM storage
    for layer in params["mlp"]:
        hh = bdot(y, layer["w"]) + layer["b"]
        y = jnp.maximum(hh, 0.0) + y if layer["kind"] == "hidden" else hh
    if use_softmax:
        y = jax.nn.log_softmax(y, axis=1)
    return y


# ----------------------------- demo ---------------------------------------------

if __name__ == "__main__":
    key = jax.random.PRNGKey(0)
    k_x, k_e, k_p = jax.random.split(key, 3)

    # small deterministic problem (N not a multiple of 8 -> exercises padding)
    num_nodes = 37
    in_channels = 16
    hidden_channels = 128    # lane-dense hidden dim (multiple of 128)
    out_channels = 8         # padded to 128 lanes in-kernel, sliced outside
    num_layers = 2
    num_final_update = 2
    num_edges = 96

    x = jax.random.normal(k_x, (num_nodes, in_channels), jnp.float32)
    edge_index = jax.random.randint(k_e, (2, num_edges), 0, num_nodes, jnp.int32)

    params = init_params(k_p, in_channels, hidden_channels, out_channels,
                         num_layers, num_final_update)
    ref = reference_forward(params, x, edge_index, use_softmax=True)

    # (a) single resident row tile (small-graph fast path)
    out = jax.block_until_ready(
        biscale_gcn_forward(params, x, edge_index, use_softmax=True))
    assert out.shape == (num_nodes, out_channels)
    err = float(jnp.max(jnp.abs(out - ref)))
    assert jnp.allclose(out, ref, atol=2e-3, rtol=2e-3), (
        f"single-tile mismatch vs reference, max abs err={err}")

    # (b) multi-tile path: streamed adjacency row slabs + ping-pong x buffers
    out_t = jax.block_until_ready(
        biscale_gcn_forward(params, x, edge_index, use_softmax=True, tile_m=16))
    err_t = float(jnp.max(jnp.abs(out_t - ref)))
    assert jnp.allclose(out_t, ref, atol=2e-3, rtol=2e-3), (
        f"multi-tile mismatch vs reference, max abs err={err_t}")

    # (c) num_layers == 0 edge case (init Linear -> MLP only)
    params0 = init_params(k_p, in_channels, hidden_channels, out_channels,
                          0, num_final_update)
    out0 = jax.block_until_ready(
        biscale_gcn_forward(params0, x, edge_index, use_softmax=True))
    ref0 = reference_forward(params0, x, edge_index, use_softmax=True)
    assert jnp.allclose(out0, ref0, atol=2e-3, rtol=2e-3), "num_layers=0 mismatch"

    print("KERNEL_OK")
</pallas_src>

<mosaic_0001>
module attributes {stable_mosaic.version = 11 : i64} {
  func.func @fused_gcn_kernel(%arg0: i32, %arg1: i32, %arg2: memref<40x16xf32, #tpu.memory_space<vmem>>, %arg3: memref<40x40xbf16, #tpu.memory_space<vmem>>, %arg4: memref<16x128xbf16, #tpu.memory_space<vmem>>, %arg5: memref<1x128xf32, #tpu.memory_space<vmem>>, %arg6: memref<1x256x128xbf16, #tpu.memory_space<vmem>>, %arg7: memref<1x128x128xbf16, #tpu.memory_space<vmem>>, %arg8: memref<1x1x128xf32, #tpu.memory_space<vmem>>, %arg9: memref<128x128xbf16, #tpu.memory_space<vmem>>, %arg10: memref<1x128xf32, #tpu.memory_space<vmem>>, %arg11: memref<128x128xbf16, #tpu.memory_space<vmem>>, %arg12: memref<1x128xf32, #tpu.memory_space<vmem>>, %arg13: memref<40x128xf32, #tpu.memory_space<vmem>>, %arg14: memref<80x256xbf16, #tpu.memory_space<vmem>>, %arg15: memref<1x128xf32, #tpu.memory_space<vmem>>, %arg16: memref<1x128xf32, #tpu.memory_space<vmem>>) attributes {dimension_semantics = [#tpu.dimension_semantics<arbitrary>, #tpu.dimension_semantics<arbitrary>], iteration_bounds = array<i64: 3, 1>, scalar_prefetch = 0 : i64, scratch_operands = 3 : i64, tpu.core_type = #tpu.core_type<tc>, window_params = [{transform_indices = @transform_0, window_bounds = array<i64: 40, 16>}, {pipeline_mode = #tpu.pipeline_mode<synchronous>, transform_indices = @transform_1, window_bounds = array<i64: 40, 40>}, {pipeline_mode = #tpu.pipeline_mode<synchronous>, transform_indices = @transform_2, window_bounds = array<i64: 16, 128>}, {pipeline_mode = #tpu.pipeline_mode<synchronous>, transform_indices = @transform_3, window_bounds = array<i64: 1, 128>}, {transform_indices = @transform_4, window_bounds = array<i64: 1, 256, 128>}, {transform_indices = @transform_5, window_bounds = array<i64: 1, 128, 128>}, {transform_indices = @transform_6, window_bounds = array<i64: 1, 1, 128>}, {pipeline_mode = #tpu.pipeline_mode<synchronous>, transform_indices = @transform_7, window_bounds = array<i64: 128, 128>}, {pipeline_mode = #tpu.pipeline_mode<synchronous>, transform_indices = @transform_8, window_bounds = array<i64: 1, 128>}, {pipeline_mode = #tpu.pipeline_mode<synchronous>, transform_indices = @transform_9, window_bounds = array<i64: 128, 128>}, {pipeline_mode = #tpu.pipeline_mode<synchronous>, transform_indices = @transform_10, window_bounds = array<i64: 1, 128>}, {pipeline_mode = #tpu.pipeline_mode<synchronous>, transform_indices = @transform_11, window_bounds = array<i64: 40, 128>}]} {
    %c40_i32 = arith.constant 40 : i32
    %0 = arith.muli %arg1, %c40_i32 : i32
    %c2_i32 = arith.constant 2 : i32
    %c0_i32 = arith.constant 0 : i32
    %1 = arith.cmpi eq, %c2_i32, %c0_i32 : i32
    %c1_i32 = arith.constant 1 : i32
    %2 = arith.select %1, %c1_i32, %c2_i32 : i32
    %3 = arith.remsi %arg0, %2 : i32
    %c0_i32_0 = arith.constant 0 : i32
    %4 = arith.cmpi ne, %3, %c0_i32_0 : i32
    %c0_i32_1 = arith.constant 0 : i32
    %5 = arith.cmpi slt, %3, %c0_i32_1 : i32
    %c0_i32_2 = arith.constant 0 : i32
    %6 = arith.cmpi slt, %2, %c0_i32_2 : i32
    %7 = arith.xori %5, %6 : i1
    %8 = arith.andi %7, %4 : i1
    %9 = arith.addi %3, %2 : i32
    %10 = arith.select %8, %9, %3 : i32
    %c40_i32_3 = arith.constant 40 : i32
    %11 = arith.muli %10, %c40_i32_3 : i32
    %12 = arith.addi %11, %0 : i32
    %13 = tpu.assume_multiple %12, 8 : i32
    %14 = tpu.iota {dimensions = array<i32: 0>} : vector<40x128xi32>
    %15 = vector.broadcast %0 : i32 to vector<40x128xi32>
    %16 = arith.addi %15, %14 : vector<40x128xi32>
    %c37_i32 = arith.constant 37 : i32
    %17 = vector.broadcast %c37_i32 : i32 to vector<40x128xi32>
    %18 = arith.cmpi slt, %16, %17 : vector<40x128xi32>
    %c0_i32_4 = arith.constant 0 : i32
    %19 = arith.cmpi eq, %arg0, %c0_i32_4 : i32
    %c0_i32_5 = arith.constant 0 : i32
    %20 = arith.cmpi eq, %arg1, %c0_i32_5 : i32
    %21 = arith.andi %19, %20 : i1
    %22 = arith.extui %21 : i1 to i32
    %c0_i32_6 = arith.constant 0 : i32
    %23 = arith.cmpi ne, %22, %c0_i32_6 : i32
    scf.if %23 {
      %cst = arith.constant 0.000000e+00 : f32
      %33 = vector.broadcast %cst : f32 to vector<1x128xf32>
      %c0 = arith.constant 0 : index
      %c0_13 = arith.constant 0 : index
      %34 = vector.load %arg15[%c0, %c0_13] : memref<1x128xf32, #tpu.memory_space<vmem>>, vector<1x128xf32>
      tpu.vector_store %arg15[%c0, %c0_13], %33 {strides = array<i32>} : memref<1x128xf32, #tpu.memory_space<vmem>>, vector<1x128xf32>,
    } else {
    }
    %c0_i32_7 = arith.constant 0 : i32
    %24 = arith.cmpi eq, %arg0, %c0_i32_7 : i32
    %25 = arith.extui %24 : i1 to i32
    %c0_i32_8 = arith.constant 0 : i32
    %26 = arith.cmpi ne, %25, %c0_i32_8 : i32
    scf.if %26 {
      %c0 = arith.constant 0 : index
      %c0_13 = arith.constant 0 : index
      %33 = vector.load %arg2[%c0, %c0_13] : memref<40x16xf32, #tpu.memory_space<vmem>>, vector<40x16xf32>
      %34 = arith.truncf %33 : vector<40x16xf32> to vector<40x16xbf16>
      %c0_14 = arith.constant 0 : index
      %c0_15 = arith.constant 0 : index
      %35 = vector.load %arg4[%c0_14, %c0_15] : memref<16x128xbf16, #tpu.memory_space<vmem>>, vector<16x128xbf16>
      %cst = arith.constant dense<0.000000e+00> : vector<40x128xf32>
      %36 = tpu.matmul %34, %35, %cst {dimension_numbers = #tpu.dot_dimension_numbers<[1], [0], [0], [1], [0, 0, 1, 1], [], []>} : vector<40x16xbf16>, vector<16x128xbf16>, vector<40x128xf32> -> vector<40x128xf32>
      %c0_16 = arith.constant 0 : index
      %c0_17 = arith.constant 0 : index
      %37 = vector.load %arg5[%c0_16, %c0_17] : memref<1x128xf32, #tpu.memory_space<vmem>>, vector<1x128xf32>
      %38 = vector.broadcast %37 : vector<1x128xf32> to vector<40x128xf32>
      %39 = arith.addf %36, %38 : vector<40x128xf32>
      %cst_18 = arith.constant 0.000000e+00 : f32
      %40 = vector.broadcast %cst_18 : f32 to vector<40x128xf32>
      %41 = arith.maximumf %39, %40 : vector<40x128xf32>
      %cst_19 = arith.constant 0.000000e+00 : f32
      %42 = vector.broadcast %cst_19 : f32 to vector<40x128xf32>
      %43 = arith.select %18, %41, %42 : vector<40x128xi1>, vector<40x128xf32>
      %44 = arith.truncf %43 : vector<40x128xf32> to vector<40x128xbf16>
      %45 = arith.index_cast %13 : i32 to index
      %c0_20 = arith.constant 0 : index
      %46 = vector.load %arg14[%45, %c0_20] : memref<80x256xbf16, #tpu.memory_space<vmem>>, vector<40x128xbf16>
      tpu.vector_store %arg14[%45, %c0_20], %44 {strides = array<i32>} : memref<80x256xbf16, #tpu.memory_space<vmem>>, vector<40x128xbf16>,
      %c0_21 = arith.constant 0 : index
      %c0_22 = arith.constant 0 : index
      %47 = vector.load %arg15[%c0_21, %c0_22] : memref<1x128xf32, #tpu.memory_space<vmem>>, vector<1x128xf32>
      %cst_23 = arith.constant dense<0.000000e+00> : vector<128xf32>
      %48 = vector.multi_reduction <add>, %43, %cst_23 [0] : vector<40x128xf32> to vector<128xf32>
      %49 = vector.shape_cast %48 : vector<128xf32> to vector<1x128xf32>
      %50 = arith.addf %47, %49 : vector<1x128xf32>
      %c0_24 = arith.constant 0 : index
      %c0_25 = arith.constant 0 : index
      %51 = vector.load %arg15[%c0_24, %c0_25] : memref<1x128xf32, #tpu.memory_space<vmem>>, vector<1x128xf32>
      tpu.vector_store %arg15[%c0_24, %c0_25], %50 {strides = array<i32>} : memref<1x128xf32, #tpu.memory_space<vmem>>, vector<1x128xf32>,
    } else {
    }
    %c0_i32_9 = arith.constant 0 : i32
    %27 = arith.cmpi sgt, %arg0, %c0_i32_9 : i32
    %28 = arith.extui %27 : i1 to i32
    %c0_i32_10 = arith.constant 0 : i32
    %29 = arith.cmpi ne, %28, %c0_i32_10 : i32
    scf.if %29 {
      %c1_i32_13 = arith.constant 1 : i32
      %33 = arith.subi %arg0, %c1_i32_13 : i32
      %c2_i32_14 = arith.constant 2 : i32
      %c0_i32_15 = arith.constant 0 : i32
      %34 = arith.cmpi eq, %c2_i32_14, %c0_i32_15 : i32
      %c1_i32_16 = arith.constant 1 : i32
      %35 = arith.select %34, %c1_i32_16, %c2_i32_14 : i32
      %36 = arith.remsi %33, %35 : i32
      %c0_i32_17 = arith.constant 0 : i32
      %37 = arith.cmpi ne, %36, %c0_i32_17 : i32
      %c0_i32_18 = arith.constant 0 : i32
      %38 = arith.cmpi slt, %36, %c0_i32_18 : i32
      %c0_i32_19 = arith.constant 0 : i32
      %39 = arith.cmpi slt, %35, %c0_i32_19 : i32
      %40 = arith.xori %38, %39 : i1
      %41 = arith.andi %40, %37 : i1
      %42 = arith.addi %36, %35 : i32
      %43 = arith.select %41, %42, %36 : i32
      %c40_i32_20 = arith.constant 40 : i32
      %44 = arith.muli %43, %c40_i32_20 : i32
      %45 = tpu.assume_multiple %44, 8 : i32
      %46 = arith.addi %45, %0 : i32
      %47 = tpu.assume_multiple %46, 8 : i32
      %c0_i32_21 = arith.constant 0 : i32
      %48 = arith.cmpi eq, %arg1, %c0_i32_21 : i32
      %49 = arith.extui %48 : i1 to i32
      %c0_i32_22 = arith.constant 0 : i32
      %50 = arith.cmpi ne, %49, %c0_i32_22 : i32
      scf.if %50 {
        %c0_41 = arith.constant 0 : index
        %c0_42 = arith.constant 0 : index
        %81 = vector.load %arg15[%c0_41, %c0_42] : memref<1x128xf32, #tpu.memory_space<vmem>>, vector<1x128xf32>
        %cst_43 = arith.constant 0.0270270277 : f32
        %82 = vector.broadcast %cst_43 : f32 to vector<1x128xf32>
        %83 = arith.mulf %81, %82 : vector<1x128xf32>
        %84 = arith.truncf %83 : vector<1x128xf32> to vector<1x128xbf16>
        %c0_44 = arith.constant 0 : index
        %c0_45 = arith.constant 0 : index
        %c0_46 = arith.constant 0 : index
        %85 = vector.load %arg7[%c0_44, %c0_45, %c0_46] : memref<1x128x128xbf16, #tpu.memory_space<vmem>>, vector<1x128x128xbf16>
        %86 = vector.shape_cast %85 : vector<1x128x128xbf16> to vector<128x128xbf16>
        %cst_47 = arith.constant dense<0.000000e+00> : vector<1x128xf32>
        %87 = tpu.matmul %84, %86, %cst_47 {dimension_numbers = #tpu.dot_dimension_numbers<[1], [0], [0], [1], [0, 0, 1, 1], [], []>} : vector<1x128xbf16>, vector<128x128xbf16>, vector<1x128xf32> -> vector<1x128xf32>
        %c0_48 = arith.constant 0 : index
        %c0_49 = arith.constant 0 : index
        %c0_50 = arith.constant 0 : index
        %88 = vector.load %arg8[%c0_48, %c0_49, %c0_50] : memref<1x1x128xf32, #tpu.memory_space<vmem>>, vector<1x1x128xf32>
        %89 = vector.shape_cast %88 : vector<1x1x128xf32> to vector<1x128xf32>
        %90 = arith.addf %87, %89 : vector<1x128xf32>
        %c0_51 = arith.constant 0 : index
        %c0_52 = arith.constant 0 : index
        %91 = vector.load %arg16[%c0_51, %c0_52] : memref<1x128xf32, #tpu.memory_space<vmem>>, vector<1x128xf32>
        tpu.vector_store %arg16[%c0_51, %c0_52], %90 {strides = array<i32>} : memref<1x128xf32, #tpu.memory_space<vmem>>, vector<1x128xf32>,
        %cst_53 = arith.constant 0.000000e+00 : f32
        %92 = vector.broadcast %cst_53 : f32 to vector<1x128xf32>
        %c0_54 = arith.constant 0 : index
        %c0_55 = arith.constant 0 : index
        %93 = vector.load %arg15[%c0_54, %c0_55] : memref<1x128xf32, #tpu.memory_space<vmem>>, vector<1x128xf32>
        tpu.vector_store %arg15[%c0_54, %c0_55], %92 {strides = array<i32>} : memref<1x128xf32, #tpu.memory_space<vmem>>, vector<1x128xf32>,
      } else {
      }
      %51 = arith.index_cast %45 : i32 to index
      %c0 = arith.constant 0 : index
      %52 = vector.load %arg14[%51, %c0] : memref<80x256xbf16, #tpu.memory_space<vmem>>, vector<40x128xbf16>
      %c0_23 = arith.constant 0 : index
      %c0_24 = arith.constant 0 : index
      %53 = vector.load %arg3[%c0_23, %c0_24] : memref<40x40xbf16, #tpu.memory_space<vmem>>, vector<40x40xbf16>
      %cst = arith.constant dense<0.000000e+00> : vector<40x128xf32>
      %54 = tpu.matmul %53, %52, %cst {dimension_numbers = #tpu.dot_dimension_numbers<[1], [0], [0], [1], [0, 0, 1, 1], [], []>} : vector<40x40xbf16>, vector<40x128xbf16>, vector<40x128xf32> -> vector<40x128xf32>
      %55 = arith.truncf %54 : vector<40x128xf32> to vector<40x128xbf16>
      %56 = arith.index_cast %47 : i32 to index
      %c128 = arith.constant 128 : index
      %57 = vector.load %arg14[%56, %c128] : memref<80x256xbf16, #tpu.memory_space<vmem>>, vector<40x128xbf16>
      tpu.vector_store %arg14[%56, %c128], %55 {strides = array<i32>} : memref<80x256xbf16, #tpu.memory_space<vmem>>, vector<40x128xbf16>,
      %58 = arith.index_cast %47 : i32 to index
      %c0_25 = arith.constant 0 : index
      %59 = vector.load %arg14[%58, %c0_25] : memref<80x256xbf16, #tpu.memory_space<vmem>>, vector<40x256xbf16>
      %c0_26 = arith.constant 0 : index
      %c0_27 = arith.constant 0 : index
      %c0_28 = arith.constant 0 : index
      %60 = vector.load %arg6[%c0_26, %c0_27, %c0_28] : memref<1x256x128xbf16, #tpu.memory_space<vmem>>, vector<1x256x128xbf16>
      %61 = vector.shape_cast %60 : vector<1x256x128xbf16> to vector<256x128xbf16>
      %cst_29 = arith.constant dense<0.000000e+00> : vector<40x128xf32>
      %62 = tpu.matmul %59, %61, %cst_29 {dimension_numbers = #tpu.dot_dimension_numbers<[1], [0], [0], [1], [0, 0, 1, 1], [], []>} : vector<40x256xbf16>, vector<256x128xbf16>, vector<40x128xf32> -> vector<40x128xf32>
      %c0_30 = arith.constant 0 : index
      %c0_31 = arith.constant 0 : index
      %63 = vector.load %arg16[%c0_30, %c0_31] : memref<1x128xf32, #tpu.memory_space<vmem>>, vector<1x128xf32>
      %64 = vector.broadcast %63 : vector<1x128xf32> to vector<40x128xf32>
      %65 = arith.addf %62, %64 : vector<40x128xf32>
      %cst_32 = arith.constant 0.000000e+00 : f32
      %66 = vector.broadcast %cst_32 : f32 to vector<40x128xf32>
      %67 = arith.cmpf ogt, %65, %66 : vector<40x128xf32>
      %cst_33 = arith.constant 1.000000e-01 : f32
      %68 = vector.broadcast %cst_33 : f32 to vector<40x128xf32>
      %69 = arith.mulf %68, %65 : vector<40x128xf32>
      %70 = arith.select %67, %65, %69 : vector<40x128xi1>, vector<40x128xf32>
      %cst_34 = arith.constant 0.000000e+00 : f32
      %71 = vector.broadcast %cst_34 : f32 to vector<40x128xf32>
      %72 = arith.select %18, %70, %71 : vector<40x128xi1>, vector<40x128xf32>
      %73 = arith.truncf %72 : vector<40x128xf32> to vector<40x128xbf16>
      %74 = arith.index_cast %13 : i32 to index
      %c0_35 = arith.constant 0 : index
      %75 = vector.load %arg14[%74, %c0_35] : memref<80x256xbf16, #tpu.memory_space<vmem>>, vector<40x128xbf16>
      tpu.vector_store %arg14[%74, %c0_35], %73 {strides = array<i32>} : memref<80x256xbf16, #tpu.memory_space<vmem>>, vector<40x128xbf16>,
      %c0_36 = arith.constant 0 : index
      %c0_37 = arith.constant 0 : index
      %76 = vector.load %arg15[%c0_36, %c0_37] : memref<1x128xf32, #tpu.memory_space<vmem>>, vector<1x128xf32>
      %cst_38 = arith.constant dense<0.000000e+00> : vector<128xf32>
      %77 = vector.multi_reduction <add>, %72, %cst_38 [0] : vector<40x128xf32> to vector<128xf32>
      %78 = vector.shape_cast %77 : vector<128xf32> to vector<1x128xf32>
      %79 = arith.addf %76, %78 : vector<1x128xf32>
      %c0_39 = arith.constant 0 : index
      %c0_40 = arith.constant 0 : index
      %80 = vector.load %arg15[%c0_39, %c0_40] : memref<1x128xf32, #tpu.memory_space<vmem>>, vector<1x128xf32>
      tpu.vector_store %arg15[%c0_39, %c0_40], %79 {strides = array<i32>} : memref<1x128xf32, #tpu.memory_space<vmem>>, vector<1x128xf32>,
    } else {
    }
    %c2_i32_11 = arith.constant 2 : i32
    %30 = arith.cmpi eq, %arg0, %c2_i32_11 : i32
    %31 = arith.extui %30 : i1 to i32
    %c0_i32_12 = arith.constant 0 : i32
    %32 = arith.cmpi ne, %31, %c0_i32_12 : i32
    scf.if %32 {
      %33 = arith.index_cast %13 : i32 to index
      %c0 = arith.constant 0 : index
      %34 = vector.load %arg14[%33, %c0] : memref<80x256xbf16, #tpu.memory_space<vmem>>, vector<40x128xbf16>
      %35 = arith.extf %34 : vector<40x128xbf16> to vector<40x128xf32>
      %36 = arith.truncf %35 : vector<40x128xf32> to vector<40x128xbf16>
      %c0_13 = arith.constant 0 : index
      %c0_14 = arith.constant 0 : index
      %37 = vector.load %arg9[%c0_13, %c0_14] : memref<128x128xbf16, #tpu.memory_space<vmem>>, vector<128x128xbf16>
      %cst = arith.constant dense<0.000000e+00> : vector<40x128xf32>
      %38 = tpu.matmul %36, %37, %cst {dimension_numbers = #tpu.dot_dimension_numbers<[1], [0], [0], [1], [0, 0, 1, 1], [], []>} : vector<40x128xbf16>, vector<128x128xbf16>, vector<40x128xf32> -> vector<40x128xf32>
      %c0_15 = arith.constant 0 : index
      %c0_16 = arith.constant 0 : index
      %39 = vector.load %arg10[%c0_15, %c0_16] : memref<1x128xf32, #tpu.memory_space<vmem>>, vector<1x128xf32>
      %40 = vector.broadcast %39 : vector<1x128xf32> to vector<40x128xf32>
      %41 = arith.addf %38, %40 : vector<40x128xf32>
      %cst_17 = arith.constant 0.000000e+00 : f32
      %42 = vector.broadcast %cst_17 : f32 to vector<40x128xf32>
      %43 = arith.maximumf %41, %42 : vector<40x128xf32>
      %44 = arith.addf %43, %35 : vector<40x128xf32>
      %45 = arith.truncf %44 : vector<40x128xf32> to vector<40x128xbf16>
      %c0_18 = arith.constant 0 : index
      %c0_19 = arith.constant 0 : index
      %46 = vector.load %arg11[%c0_18, %c0_19] : memref<128x128xbf16, #tpu.memory_space<vmem>>, vector<128x128xbf16>
      %cst_20 = arith.constant dense<0.000000e+00> : vector<40x128xf32>
      %47 = tpu.matmul %45, %46, %cst_20 {dimension_numbers = #tpu.dot_dimension_numbers<[1], [0], [0], [1], [0, 0, 1, 1], [], []>} : vector<40x128xbf16>, vector<128x128xbf16>, vector<40x128xf32> -> vector<40x128xf32>
      %c0_21 = arith.constant 0 : index
      %c0_22 = arith.constant 0 : index
      %48 = vector.load %arg12[%c0_21, %c0_22] : memref<1x128xf32, #tpu.memory_space<vmem>>, vector<1x128xf32>
      %49 = vector.broadcast %48 : vector<1x128xf32> to vector<40x128xf32>
      %50 = arith.addf %47, %49 : vector<40x128xf32>
      %51 = tpu.iota {dimensions = array<i32: 1>} : vector<40x128xi32>
      %c8_i32 = arith.constant 8 : i32
      %52 = vector.broadcast %c8_i32 : i32 to vector<40x128xi32>
      %53 = arith.cmpi slt, %51, %52 : vector<40x128xi32>
      %cst_23 = arith.constant 0xFF800000 : f32
      %54 = vector.broadcast %cst_23 : f32 to vector<40x128xf32>
      %55 = arith.select %53, %50, %54 : vector<40x128xi1>, vector<40x128xf32>
      %cst_24 = arith.constant dense<0xFF800000> : vector<40xf32>
      %56 = vector.multi_reduction <maximumf>, %55, %cst_24 [1] : vector<40x128xf32> to vector<40xf32>
      %57 = vector.shape_cast %56 : vector<40xf32> to vector<40x1xf32>
      %58 = vector.broadcast %57 : vector<40x1xf32> to vector<40x128xf32>
      %59 = arith.subf %55, %58 : vector<40x128xf32>
      %60 = math.exp %59 : vector<40x128xf32>
      %cst_25 = arith.constant 0.000000e+00 : f32
      %61 = vector.broadcast %cst_25 : f32 to vector<40x128xf32>
      %62 = arith.select %53, %60, %61 : vector<40x128xi1>, vector<40x128xf32>
      %cst_26 = arith.constant dense<0.000000e+00> : vector<40xf32>
      %63 = vector.multi_reduction <add>, %62, %cst_26 [1] : vector<40x128xf32> to vector<40xf32>
      %64 = vector.shape_cast %63 : vector<40xf32> to vector<40x1xf32>
      %65 = math.log %64 : vector<40x1xf32>
      %66 = vector.broadcast %65 : vector<40x1xf32> to vector<40x128xf32>
      %67 = arith.subf %59, %66 : vector<40x128xf32>
      %cst_27 = arith.constant 0.000000e+00 : f32
      %68 = vector.broadcast %cst_27 : f32 to vector<40x128xf32>
      %69 = arith.select %53, %67, %68 : vector<40x128xi1>, vector<40x128xf32>
      %c0_28 = arith.constant 0 : index
      %c0_29 = arith.constant 0 : index
      %70 = vector.load %arg13[%c0_28, %c0_29] : memref<40x128xf32, #tpu.memory_space<vmem>>, vector<40x128xf32>
      tpu.vector_store %arg13[%c0_28, %c0_29], %69 {strides = array<i32>} : memref<40x128xf32, #tpu.memory_space<vmem>>, vector<40x128xf32>,
    } else {
    }
    return
  }
  func.func @transform_0(%arg0: i32, %arg1: i32) -> (i32, i32) {
    %c0_i32 = arith.constant 0 : i32
    %0 = arith.cmpi eq, %arg0, %c0_i32 : i32
    %c0_i32_0 = arith.constant 0 : i32
    %1 = arith.select %0, %arg1, %c0_i32_0 : i32
    %c0_i32_1 = arith.constant 0 : i32
    %c0_i32_2 = arith.constant 0 : i32
    return %1, %c0_i32_1 : i32, i32
  }
  func.func @transform_1(%arg0: i32, %arg1: i32) -> (i32, i32) {
    %c0_i32 = arith.constant 0 : i32
    %0 = arith.cmpi eq, %arg0, %c0_i32 : i32
    %c0_i32_0 = arith.constant 0 : i32
    %1 = arith.select %0, %c0_i32_0, %arg1 : i32
    %c0_i32_1 = arith.constant 0 : i32
    %c0_i32_2 = arith.constant 0 : i32
    return %1, %c0_i32_1 : i32, i32
  }
  func.func @transform_2(%arg0: i32, %arg1: i32) -> (i32, i32) {
    %c0_i32 = arith.constant 0 : i32
    %c0_i32_0 = arith.constant 0 : i32
    %c0_i32_1 = arith.constant 0 : i32
    return %c0_i32, %c0_i32_0 : i32, i32
  }
  func.func @transform_3(%arg0: i32, %arg1: i32) -> (i32, i32) {
    %c0_i32 = arith.constant 0 : i32
    %c0_i32_0 = arith.constant 0 : i32
    %c0_i32_1 = arith.constant 0 : i32
    return %c0_i32, %c0_i32_0 : i32, i32
  }
  func.func @transform_4(%arg0: i32, %arg1: i32) -> (i32, i32, i32) {
    %c1_i32 = arith.constant 1 : i32
    %0 = arith.subi %arg0, %c1_i32 : i32
    %c0_i32 = arith.constant 0 : i32
    %1 = arith.maxsi %0, %c0_i32 : i32
    %c0_i32_0 = arith.constant 0 : i32
    %c0_i32_1 = arith.constant 0 : i32
    %c0_i32_2 = arith.constant 0 : i32
    return %1, %c0_i32_0, %c0_i32_1 : i32, i32, i32
  }
  func.func @transform_5(%arg0: i32, %arg1: i32) -> (i32, i32, i32) {
    %c1_i32 = arith.constant 1 : i32
    %0 = arith.subi %arg0, %c1_i32 : i32
    %c0_i32 = arith.constant 0 : i32
    %1 = arith.maxsi %0, %c0_i32 : i32
    %c0_i32_0 = arith.constant 0 : i32
    %c0_i32_1 = arith.constant 0 : i32
    %c0_i32_2 = arith.constant 0 : i32
    return %1, %c0_i32_0, %c0_i32_1 : i32, i32, i32
  }
  func.func @transform_6(%arg0: i32, %arg1: i32) -> (i32, i32, i32) {
    %c1_i32 = arith.constant 1 : i32
    %0 = arith.subi %arg0, %c1_i32 : i32
    %c0_i32 = arith.constant 0 : i32
    %1 = arith.maxsi %0, %c0_i32 : i32
    %c0_i32_0 = arith.constant 0 : i32
    %c0_i32_1 = arith.constant 0 : i32
    %c0_i32_2 = arith.constant 0 : i32
    return %1, %c0_i32_0, %c0_i32_1 : i32, i32, i32
  }
  func.func @transform_7(%arg0: i32, %arg1: i32) -> (i32, i32) {
    %c0_i32 = arith.constant 0 : i32
    %c0_i32_0 = arith.constant 0 : i32
    %c0_i32_1 = arith.constant 0 : i32
    return %c0_i32, %c0_i32_0 : i32, i32
  }
  func.func @transform_8(%arg0: i32, %arg1: i32) -> (i32, i32) {
    %c0_i32 = arith.constant 0 : i32
    %c0_i32_0 = arith.constant 0 : i32
    %c0_i32_1 = arith.constant 0 : i32
    return %c0_i32, %c0_i32_0 : i32, i32
  }
  func.func @transform_9(%arg0: i32, %arg1: i32) -> (i32, i32) {
    %c0_i32 = arith.constant 0 : i32
    %c0_i32_0 = arith.constant 0 : i32
    %c0_i32_1 = arith.constant 0 : i32
    return %c0_i32, %c0_i32_0 : i32, i32
  }
  func.func @transform_10(%arg0: i32, %arg1: i32) -> (i32, i32) {
    %c0_i32 = arith.constant 0 : i32
    %c0_i32_0 = arith.constant 0 : i32
    %c0_i32_1 = arith.constant 0 : i32
    return %c0_i32, %c0_i32_0 : i32, i32
  }
  func.func @transform_11(%arg0: i32, %arg1: i32) -> (i32, i32) {
    %c2_i32 = arith.constant 2 : i32
    %0 = arith.cmpi eq, %arg0, %c2_i32 : i32
    %c0_i32 = arith.constant 0 : i32
    %1 = arith.select %0, %arg1, %c0_i32 : i32
    %c0_i32_0 = arith.constant 0 : i32
    %c0_i32_1 = arith.constant 0 : i32
    return %1, %c0_i32_0 : i32, i32
  }
}

module attributes {stable_mosaic.version = 11 : i64} {
  func.func @fused_gcn_kernel(%arg0: i32, %arg1: i32, %arg2: memref<40x16xf32, #tpu.memory_space<vmem>>, %arg3: memref<40x40xbf16, #tpu.memory_space<vmem>>, %arg4: memref<16x128xbf16, #tpu.memory_space<vmem>>, %arg5: memref<1x128xf32, #tpu.memory_space<vmem>>, %arg6: memref<1x256x128xbf16, #tpu.memory_space<vmem>>, %arg7: memref<1x128x128xbf16, #tpu.memory_space<vmem>>, %arg8: memref<1x1x128xf32, #tpu.memory_space<vmem>>, %arg9: memref<128x128xbf16, #tpu.memory_space<vmem>>, %arg10: memref<1x128xf32, #tpu.memory_space<vmem>>, %arg11: memref<128x128xbf16, #tpu.memory_space<vmem>>, %arg12: memref<1x128xf32, #tpu.memory_space<vmem>>, %arg13: memref<40x128xf32, #tpu.memory_space<vmem>>, %arg14: memref<80x256xbf16, #tpu.memory_space<vmem>>, %arg15: memref<1x128xf32, #tpu.memory_space<vmem>>, %arg16: memref<1x128xf32, #tpu.memory_space<vmem>>) attributes {dimension_semantics = [#tpu.dimension_semantics<arbitrary>, #tpu.dimension_semantics<arbitrary>], iteration_bounds = array<i64: 3, 1>, scalar_prefetch = 0 : i64, scratch_operands = 3 : i64, tpu.core_type = #tpu.core_type<tc>, window_params = [{transform_indices = @transform_0, window_bounds = array<i64: 40, 16>}, {transform_indices = @transform_1, window_bounds = array<i64: 40, 40>}, {pipeline_mode = #tpu.pipeline_mode<synchronous>, transform_indices = @transform_2, window_bounds = array<i64: 16, 128>}, {pipeline_mode = #tpu.pipeline_mode<synchronous>, transform_indices = @transform_3, window_bounds = array<i64: 1, 128>}, {transform_indices = @transform_4, window_bounds = array<i64: 1, 256, 128>}, {transform_indices = @transform_5, window_bounds = array<i64: 1, 128, 128>}, {transform_indices = @transform_6, window_bounds = array<i64: 1, 1, 128>}, {pipeline_mode = #tpu.pipeline_mode<synchronous>, transform_indices = @transform_7, window_bounds = array<i64: 128, 128>}, {pipeline_mode = #tpu.pipeline_mode<synchronous>, transform_indices = @transform_8, window_bounds = array<i64: 1, 128>}, {pipeline_mode = #tpu.pipeline_mode<synchronous>, transform_indices = @transform_9, window_bounds = array<i64: 128, 128>}, {pipeline_mode = #tpu.pipeline_mode<synchronous>, transform_indices = @transform_10, window_bounds = array<i64: 1, 128>}, {transform_indices = @transform_11, window_bounds = array<i64: 40, 128>}]} {
    %c40_i32 = arith.constant 40 : i32
    %0 = arith.muli %arg1, %c40_i32 : i32
    %c2_i32 = arith.constant 2 : i32
    %c0_i32 = arith.constant 0 : i32
    %1 = arith.cmpi eq, %c2_i32, %c0_i32 : i32
    %c1_i32 = arith.constant 1 : i32
    %2 = arith.select %1, %c1_i32, %c2_i32 : i32
    %3 = arith.remsi %arg0, %2 : i32
    %c0_i32_0 = arith.constant 0 : i32
    %4 = arith.cmpi ne, %3, %c0_i32_0 : i32
    %c0_i32_1 = arith.constant 0 : i32
    %5 = arith.cmpi slt, %3, %c0_i32_1 : i32
    %c0_i32_2 = arith.constant 0 : i32
    %6 = arith.cmpi slt, %2, %c0_i32_2 : i32
    %7 = arith.xori %5, %6 : i1
    %8 = arith.andi %7, %4 : i1
    %9 = arith.addi %3, %2 : i32
    %10 = arith.select %8, %9, %3 : i32
    %c40_i32_3 = arith.constant 40 : i32
    %11 = arith.muli %10, %c40_i32_3 : i32
    %12 = arith.addi %11, %0 : i32
    %13 = tpu.assume_multiple %12, 8 : i32
    %14 = tpu.iota {dimensions = array<i32: 0>} : vector<40x128xi32>
    %15 = vector.broadcast %0 : i32 to vector<40x128xi32>
    %16 = arith.addi %15, %14 : vector<40x128xi32>
    %c37_i32 = arith.constant 37 : i32
    %17 = vector.broadcast %c37_i32 : i32 to vector<40x128xi32>
    %18 = arith.cmpi slt, %16, %17 : vector<40x128xi32>
    %c0_i32_4 = arith.constant 0 : i32
    %19 = arith.cmpi eq, %arg0, %c0_i32_4 : i32
    %c0_i32_5 = arith.constant 0 : i32
    %20 = arith.cmpi eq, %arg1, %c0_i32_5 : i32
    %21 = arith.andi %19, %20 : i1
    %22 = arith.extui %21 : i1 to i32
    %c0_i32_6 = arith.constant 0 : i32
    %23 = arith.cmpi ne, %22, %c0_i32_6 : i32
    scf.if %23 {
      %cst = arith.constant 0.000000e+00 : f32
      %33 = vector.broadcast %cst : f32 to vector<1x128xf32>
      %c0 = arith.constant 0 : index
      %c0_13 = arith.constant 0 : index
      %34 = vector.load %arg15[%c0, %c0_13] : memref<1x128xf32, #tpu.memory_space<vmem>>, vector<1x128xf32>
      tpu.vector_store %arg15[%c0, %c0_13], %33 {strides = array<i32>} : memref<1x128xf32, #tpu.memory_space<vmem>>, vector<1x128xf32>,
    } else {
    }
    %c0_i32_7 = arith.constant 0 : i32
    %24 = arith.cmpi eq, %arg0, %c0_i32_7 : i32
    %25 = arith.extui %24 : i1 to i32
    %c0_i32_8 = arith.constant 0 : i32
    %26 = arith.cmpi ne, %25, %c0_i32_8 : i32
    scf.if %26 {
      %c0 = arith.constant 0 : index
      %c0_13 = arith.constant 0 : index
      %33 = vector.load %arg2[%c0, %c0_13] : memref<40x16xf32, #tpu.memory_space<vmem>>, vector<40x16xf32>
      %34 = arith.truncf %33 : vector<40x16xf32> to vector<40x16xbf16>
      %c0_14 = arith.constant 0 : index
      %c0_15 = arith.constant 0 : index
      %35 = vector.load %arg4[%c0_14, %c0_15] : memref<16x128xbf16, #tpu.memory_space<vmem>>, vector<16x128xbf16>
      %cst = arith.constant dense<0.000000e+00> : vector<40x128xf32>
      %36 = tpu.matmul %34, %35, %cst {dimension_numbers = #tpu.dot_dimension_numbers<[1], [0], [0], [1], [0, 0, 1, 1], [], []>} : vector<40x16xbf16>, vector<16x128xbf16>, vector<40x128xf32> -> vector<40x128xf32>
      %c0_16 = arith.constant 0 : index
      %c0_17 = arith.constant 0 : index
      %37 = vector.load %arg5[%c0_16, %c0_17] : memref<1x128xf32, #tpu.memory_space<vmem>>, vector<1x128xf32>
      %38 = vector.broadcast %37 : vector<1x128xf32> to vector<40x128xf32>
      %39 = arith.addf %36, %38 : vector<40x128xf32>
      %cst_18 = arith.constant 0.000000e+00 : f32
      %40 = vector.broadcast %cst_18 : f32 to vector<40x128xf32>
      %41 = arith.maximumf %39, %40 : vector<40x128xf32>
      %cst_19 = arith.constant 0.000000e+00 : f32
      %42 = vector.broadcast %cst_19 : f32 to vector<40x128xf32>
      %43 = arith.select %18, %41, %42 : vector<40x128xi1>, vector<40x128xf32>
      %44 = arith.truncf %43 : vector<40x128xf32> to vector<40x128xbf16>
      %45 = arith.index_cast %13 : i32 to index
      %c0_20 = arith.constant 0 : index
      %46 = vector.load %arg14[%45, %c0_20] : memref<80x256xbf16, #tpu.memory_space<vmem>>, vector<40x128xbf16>
      tpu.vector_store %arg14[%45, %c0_20], %44 {strides = array<i32>} : memref<80x256xbf16, #tpu.memory_space<vmem>>, vector<40x128xbf16>,
      %c0_21 = arith.constant 0 : index
      %c0_22 = arith.constant 0 : index
      %47 = vector.load %arg15[%c0_21, %c0_22] : memref<1x128xf32, #tpu.memory_space<vmem>>, vector<1x128xf32>
      %cst_23 = arith.constant dense<0.000000e+00> : vector<128xf32>
      %48 = vector.multi_reduction <add>, %43, %cst_23 [0] : vector<40x128xf32> to vector<128xf32>
      %49 = vector.shape_cast %48 : vector<128xf32> to vector<1x128xf32>
      %50 = arith.addf %47, %49 : vector<1x128xf32>
      %c0_24 = arith.constant 0 : index
      %c0_25 = arith.constant 0 : index
      %51 = vector.load %arg15[%c0_24, %c0_25] : memref<1x128xf32, #tpu.memory_space<vmem>>, vector<1x128xf32>
      tpu.vector_store %arg15[%c0_24, %c0_25], %50 {strides = array<i32>} : memref<1x128xf32, #tpu.memory_space<vmem>>, vector<1x128xf32>,
    } else {
    }
    %c0_i32_9 = arith.constant 0 : i32
    %27 = arith.cmpi sgt, %arg0, %c0_i32_9 : i32
    %28 = arith.extui %27 : i1 to i32
    %c0_i32_10 = arith.constant 0 : i32
    %29 = arith.cmpi ne, %28, %c0_i32_10 : i32
    scf.if %29 {
      %c1_i32_13 = arith.constant 1 : i32
      %33 = arith.subi %arg0, %c1_i32_13 : i32
      %c2_i32_14 = arith.constant 2 : i32
      %c0_i32_15 = arith.constant 0 : i32
      %34 = arith.cmpi eq, %c2_i32_14, %c0_i32_15 : i32
      %c1_i32_16 = arith.constant 1 : i32
      %35 = arith.select %34, %c1_i32_16, %c2_i32_14 : i32
      %36 = arith.remsi %33, %35 : i32
      %c0_i32_17 = arith.constant 0 : i32
      %37 = arith.cmpi ne, %36, %c0_i32_17 : i32
      %c0_i32_18 = arith.constant 0 : i32
      %38 = arith.cmpi slt, %36, %c0_i32_18 : i32
      %c0_i32_19 = arith.constant 0 : i32
      %39 = arith.cmpi slt, %35, %c0_i32_19 : i32
      %40 = arith.xori %38, %39 : i1
      %41 = arith.andi %40, %37 : i1
      %42 = arith.addi %36, %35 : i32
      %43 = arith.select %41, %42, %36 : i32
      %c40_i32_20 = arith.constant 40 : i32
      %44 = arith.muli %43, %c40_i32_20 : i32
      %45 = tpu.assume_multiple %44, 8 : i32
      %46 = arith.addi %45, %0 : i32
      %47 = tpu.assume_multiple %46, 8 : i32
      %c0_i32_21 = arith.constant 0 : i32
      %48 = arith.cmpi eq, %arg1, %c0_i32_21 : i32
      %49 = arith.extui %48 : i1 to i32
      %c0_i32_22 = arith.constant 0 : i32
      %50 = arith.cmpi ne, %49, %c0_i32_22 : i32
      scf.if %50 {
        %c0_41 = arith.constant 0 : index
        %c0_42 = arith.constant 0 : index
        %81 = vector.load %arg15[%c0_41, %c0_42] : memref<1x128xf32, #tpu.memory_space<vmem>>, vector<1x128xf32>
        %cst_43 = arith.constant 0.0270270277 : f32
        %82 = vector.broadcast %cst_43 : f32 to vector<1x128xf32>
        %83 = arith.mulf %81, %82 : vector<1x128xf32>
        %84 = arith.truncf %83 : vector<1x128xf32> to vector<1x128xbf16>
        %c0_44 = arith.constant 0 : index
        %c0_45 = arith.constant 0 : index
        %c0_46 = arith.constant 0 : index
        %85 = vector.load %arg7[%c0_44, %c0_45, %c0_46] : memref<1x128x128xbf16, #tpu.memory_space<vmem>>, vector<1x128x128xbf16>
        %86 = vector.shape_cast %85 : vector<1x128x128xbf16> to vector<128x128xbf16>
        %cst_47 = arith.constant dense<0.000000e+00> : vector<1x128xf32>
        %87 = tpu.matmul %84, %86, %cst_47 {dimension_numbers = #tpu.dot_dimension_numbers<[1], [0], [0], [1], [0, 0, 1, 1], [], []>} : vector<1x128xbf16>, vector<128x128xbf16>, vector<1x128xf32> -> vector<1x128xf32>
        %c0_48 = arith.constant 0 : index
        %c0_49 = arith.constant 0 : index
        %c0_50 = arith.constant 0 : index
        %88 = vector.load %arg8[%c0_48, %c0_49, %c0_50] : memref<1x1x128xf32, #tpu.memory_space<vmem>>, vector<1x1x128xf32>
        %89 = vector.shape_cast %88 : vector<1x1x128xf32> to vector<1x128xf32>
        %90 = arith.addf %87, %89 : vector<1x128xf32>
        %c0_51 = arith.constant 0 : index
        %c0_52 = arith.constant 0 : index
        %91 = vector.load %arg16[%c0_51, %c0_52] : memref<1x128xf32, #tpu.memory_space<vmem>>, vector<1x128xf32>
        tpu.vector_store %arg16[%c0_51, %c0_52], %90 {strides = array<i32>} : memref<1x128xf32, #tpu.memory_space<vmem>>, vector<1x128xf32>,
        %cst_53 = arith.constant 0.000000e+00 : f32
        %92 = vector.broadcast %cst_53 : f32 to vector<1x128xf32>
        %c0_54 = arith.constant 0 : index
        %c0_55 = arith.constant 0 : index
        %93 = vector.load %arg15[%c0_54, %c0_55] : memref<1x128xf32, #tpu.memory_space<vmem>>, vector<1x128xf32>
        tpu.vector_store %arg15[%c0_54, %c0_55], %92 {strides = array<i32>} : memref<1x128xf32, #tpu.memory_space<vmem>>, vector<1x128xf32>,
      } else {
      }
      %51 = arith.index_cast %45 : i32 to index
      %c0 = arith.constant 0 : index
      %52 = vector.load %arg14[%51, %c0] : memref<80x256xbf16, #tpu.memory_space<vmem>>, vector<40x128xbf16>
      %c0_23 = arith.constant 0 : index
      %c0_24 = arith.constant 0 : index
      %53 = vector.load %arg3[%c0_23, %c0_24] : memref<40x40xbf16, #tpu.memory_space<vmem>>, vector<40x40xbf16>
      %cst = arith.constant dense<0.000000e+00> : vector<40x128xf32>
      %54 = tpu.matmul %53, %52, %cst {dimension_numbers = #tpu.dot_dimension_numbers<[1], [0], [0], [1], [0, 0, 1, 1], [], []>} : vector<40x40xbf16>, vector<40x128xbf16>, vector<40x128xf32> -> vector<40x128xf32>
      %55 = arith.truncf %54 : vector<40x128xf32> to vector<40x128xbf16>
      %56 = arith.index_cast %47 : i32 to index
      %c128 = arith.constant 128 : index
      %57 = vector.load %arg14[%56, %c128] : memref<80x256xbf16, #tpu.memory_space<vmem>>, vector<40x128xbf16>
      tpu.vector_store %arg14[%56, %c128], %55 {strides = array<i32>} : memref<80x256xbf16, #tpu.memory_space<vmem>>, vector<40x128xbf16>,
      %58 = arith.index_cast %47 : i32 to index
      %c0_25 = arith.constant 0 : index
      %59 = vector.load %arg14[%58, %c0_25] : memref<80x256xbf16, #tpu.memory_space<vmem>>, vector<40x256xbf16>
      %c0_26 = arith.constant 0 : index
      %c0_27 = arith.constant 0 : index
      %c0_28 = arith.constant 0 : index
      %60 = vector.load %arg6[%c0_26, %c0_27, %c0_28] : memref<1x256x128xbf16, #tpu.memory_space<vmem>>, vector<1x256x128xbf16>
      %61 = vector.shape_cast %60 : vector<1x256x128xbf16> to vector<256x128xbf16>
      %cst_29 = arith.constant dense<0.000000e+00> : vector<40x128xf32>
      %62 = tpu.matmul %59, %61, %cst_29 {dimension_numbers = #tpu.dot_dimension_numbers<[1], [0], [0], [1], [0, 0, 1, 1], [], []>} : vector<40x256xbf16>, vector<256x128xbf16>, vector<40x128xf32> -> vector<40x128xf32>
      %c0_30 = arith.constant 0 : index
      %c0_31 = arith.constant 0 : index
      %63 = vector.load %arg16[%c0_30, %c0_31] : memref<1x128xf32, #tpu.memory_space<vmem>>, vector<1x128xf32>
      %64 = vector.broadcast %63 : vector<1x128xf32> to vector<40x128xf32>
      %65 = arith.addf %62, %64 : vector<40x128xf32>
      %cst_32 = arith.constant 0.000000e+00 : f32
      %66 = vector.broadcast %cst_32 : f32 to vector<40x128xf32>
      %67 = arith.cmpf ogt, %65, %66 : vector<40x128xf32>
      %cst_33 = arith.constant 1.000000e-01 : f32
      %68 = vector.broadcast %cst_33 : f32 to vector<40x128xf32>
      %69 = arith.mulf %68, %65 : vector<40x128xf32>
      %70 = arith.select %67, %65, %69 : vector<40x128xi1>, vector<40x128xf32>
      %cst_34 = arith.constant 0.000000e+00 : f32
      %71 = vector.broadcast %cst_34 : f32 to vector<40x128xf32>
      %72 = arith.select %18, %70, %71 : vector<40x128xi1>, vector<40x128xf32>
      %73 = arith.truncf %72 : vector<40x128xf32> to vector<40x128xbf16>
      %74 = arith.index_cast %13 : i32 to index
      %c0_35 = arith.constant 0 : index
      %75 = vector.load %arg14[%74, %c0_35] : memref<80x256xbf16, #tpu.memory_space<vmem>>, vector<40x128xbf16>
      tpu.vector_store %arg14[%74, %c0_35], %73 {strides = array<i32>} : memref<80x256xbf16, #tpu.memory_space<vmem>>, vector<40x128xbf16>,
      %c0_36 = arith.constant 0 : index
      %c0_37 = arith.constant 0 : index
      %76 = vector.load %arg15[%c0_36, %c0_37] : memref<1x128xf32, #tpu.memory_space<vmem>>, vector<1x128xf32>
      %cst_38 = arith.constant dense<0.000000e+00> : vector<128xf32>
      %77 = vector.multi_reduction <add>, %72, %cst_38 [0] : vector<40x128xf32> to vector<128xf32>
      %78 = vector.shape_cast %77 : vector<128xf32> to vector<1x128xf32>
      %79 = arith.addf %76, %78 : vector<1x128xf32>
      %c0_39 = arith.constant 0 : index
      %c0_40 = arith.constant 0 : index
      %80 = vector.load %arg15[%c0_39, %c0_40] : memref<1x128xf32, #tpu.memory_space<vmem>>, vector<1x128xf32>
      tpu.vector_store %arg15[%c0_39, %c0_40], %79 {strides = array<i32>} : memref<1x128xf32, #tpu.memory_space<vmem>>, vector<1x128xf32>,
    } else {
    }
    %c2_i32_11 = arith.constant 2 : i32
    %30 = arith.cmpi eq, %arg0, %c2_i32_11 : i32
    %31 = arith.extui %30 : i1 to i32
    %c0_i32_12 = arith.constant 0 : i32
    %32 = arith.cmpi ne, %31, %c0_i32_12 : i32
    scf.if %32 {
      %33 = arith.index_cast %13 : i32 to index
      %c0 = arith.constant 0 : index
      %34 = vector.load %arg14[%33, %c0] : memref<80x256xbf16, #tpu.memory_space<vmem>>, vector<40x128xbf16>
      %35 = arith.extf %34 : vector<40x128xbf16> to vector<40x128xf32>
      %36 = arith.truncf %35 : vector<40x128xf32> to vector<40x128xbf16>
      %c0_13 = arith.constant 0 : index
      %c0_14 = arith.constant 0 : index
      %37 = vector.load %arg9[%c0_13, %c0_14] : memref<128x128xbf16, #tpu.memory_space<vmem>>, vector<128x128xbf16>
      %cst = arith.constant dense<0.000000e+00> : vector<40x128xf32>
      %38 = tpu.matmul %36, %37, %cst {dimension_numbers = #tpu.dot_dimension_numbers<[1], [0], [0], [1], [0, 0, 1, 1], [], []>} : vector<40x128xbf16>, vector<128x128xbf16>, vector<40x128xf32> -> vector<40x128xf32>
      %c0_15 = arith.constant 0 : index
      %c0_16 = arith.constant 0 : index
      %39 = vector.load %arg10[%c0_15, %c0_16] : memref<1x128xf32, #tpu.memory_space<vmem>>, vector<1x128xf32>
      %40 = vector.broadcast %39 : vector<1x128xf32> to vector<40x128xf32>
      %41 = arith.addf %38, %40 : vector<40x128xf32>
      %cst_17 = arith.constant 0.000000e+00 : f32
      %42 = vector.broadcast %cst_17 : f32 to vector<40x128xf32>
      %43 = arith.maximumf %41, %42 : vector<40x128xf32>
      %44 = arith.addf %43, %35 : vector<40x128xf32>
      %45 = arith.truncf %44 : vector<40x128xf32> to vector<40x128xbf16>
      %c0_18 = arith.constant 0 : index
      %c0_19 = arith.constant 0 : index
      %46 = vector.load %arg11[%c0_18, %c0_19] : memref<128x128xbf16, #tpu.memory_space<vmem>>, vector<128x128xbf16>
      %cst_20 = arith.constant dense<0.000000e+00> : vector<40x128xf32>
      %47 = tpu.matmul %45, %46, %cst_20 {dimension_numbers = #tpu.dot_dimension_numbers<[1], [0], [0], [1], [0, 0, 1, 1], [], []>} : vector<40x128xbf16>, vector<128x128xbf16>, vector<40x128xf32> -> vector<40x128xf32>
      %c0_21 = arith.constant 0 : index
      %c0_22 = arith.constant 0 : index
      %48 = vector.load %arg12[%c0_21, %c0_22] : memref<1x128xf32, #tpu.memory_space<vmem>>, vector<1x128xf32>
      %49 = vector.broadcast %48 : vector<1x128xf32> to vector<40x128xf32>
      %50 = arith.addf %47, %49 : vector<40x128xf32>
      %51 = tpu.iota {dimensions = array<i32: 1>} : vector<40x128xi32>
      %c8_i32 = arith.constant 8 : i32
      %52 = vector.broadcast %c8_i32 : i32 to vector<40x128xi32>
      %53 = arith.cmpi slt, %51, %52 : vector<40x128xi32>
      %cst_23 = arith.constant 0xFF800000 : f32
      %54 = vector.broadcast %cst_23 : f32 to vector<40x128xf32>
      %55 = arith.select %53, %50, %54 : vector<40x128xi1>, vector<40x128xf32>
      %cst_24 = arith.constant dense<0xFF800000> : vector<40xf32>
      %56 = vector.multi_reduction <maximumf>, %55, %cst_24 [1] : vector<40x128xf32> to vector<40xf32>
      %57 = vector.shape_cast %56 : vector<40xf32> to vector<40x1xf32>
      %58 = vector.broadcast %57 : vector<40x1xf32> to vector<40x128xf32>
      %59 = arith.subf %55, %58 : vector<40x128xf32>
      %60 = math.exp %59 : vector<40x128xf32>
      %cst_25 = arith.constant 0.000000e+00 : f32
      %61 = vector.broadcast %cst_25 : f32 to vector<40x128xf32>
      %62 = arith.select %53, %60, %61 : vector<40x128xi1>, vector<40x128xf32>
      %cst_26 = arith.constant dense<0.000000e+00> : vector<40xf32>
      %63 = vector.multi_reduction <add>, %62, %cst_26 [1] : vector<40x128xf32> to vector<40xf32>
      %64 = vector.shape_cast %63 : vector<40xf32> to vector<40x1xf32>
      %65 = math.log %64 : vector<40x1xf32>
      %66 = vector.broadcast %65 : vector<40x1xf32> to vector<40x128xf32>
      %67 = arith.subf %59, %66 : vector<40x128xf32>
      %cst_27 = arith.constant 0.000000e+00 : f32
      %68 = vector.broadcast %cst_27 : f32 to vector<40x128xf32>
      %69 = arith.select %53, %67, %68 : vector<40x128xi1>, vector<40x128xf32>
      %c0_28 = arith.constant 0 : index
      %c0_29 = arith.constant 0 : index
      %70 = vector.load %arg13[%c0_28, %c0_29] : memref<40x128xf32, #tpu.memory_space<vmem>>, vector<40x128xf32>
      tpu.vector_store %arg13[%c0_28, %c0_29], %69 {strides = array<i32>} : memref<40x128xf32, #tpu.memory_space<vmem>>, vector<40x128xf32>,
    } else {
    }
    return
  }
  func.func @transform_0(%arg0: i32, %arg1: i32) -> (i32, i32) {
    %c0_i32 = arith.constant 0 : i32
    %0 = arith.cmpi eq, %arg0, %c0_i32 : i32
    %c0_i32_0 = arith.constant 0 : i32
    %1 = arith.select %0, %arg1, %c0_i32_0 : i32
    %c0_i32_1 = arith.constant 0 : i32
    %c0_i32_2 = arith.constant 0 : i32
    return %1, %c0_i32_1 : i32, i32
  }
  func.func @transform_1(%arg0: i32, %arg1: i32) -> (i32, i32) {
    %c0_i32 = arith.constant 0 : i32
    %0 = arith.cmpi eq, %arg0, %c0_i32 : i32
    %c0_i32_0 = arith.constant 0 : i32
    %1 = arith.select %0, %c0_i32_0, %arg1 : i32
    %c0_i32_1 = arith.constant 0 : i32
    %c0_i32_2 = arith.constant 0 : i32
    return %1, %c0_i32_1 : i32, i32
  }
  func.func @transform_2(%arg0: i32, %arg1: i32) -> (i32, i32) {
    %c0_i32 = arith.constant 0 : i32
    %c0_i32_0 = arith.constant 0 : i32
    %c0_i32_1 = arith.constant 0 : i32
    return %c0_i32, %c0_i32_0 : i32, i32
  }
  func.func @transform_3(%arg0: i32, %arg1: i32) -> (i32, i32) {
    %c0_i32 = arith.constant 0 : i32
    %c0_i32_0 = arith.constant 0 : i32
    %c0_i32_1 = arith.constant 0 : i32
    return %c0_i32, %c0_i32_0 : i32, i32
  }
  func.func @transform_4(%arg0: i32, %arg1: i32) -> (i32, i32, i32) {
    %c1_i32 = arith.constant 1 : i32
    %0 = arith.subi %arg0, %c1_i32 : i32
    %c0_i32 = arith.constant 0 : i32
    %1 = arith.maxsi %0, %c0_i32 : i32
    %c0_i32_0 = arith.constant 0 : i32
    %c0_i32_1 = arith.constant 0 : i32
    %c0_i32_2 = arith.constant 0 : i32
    return %1, %c0_i32_0, %c0_i32_1 : i32, i32, i32
  }
  func.func @transform_5(%arg0: i32, %arg1: i32) -> (i32, i32, i32) {
    %c1_i32 = arith.constant 1 : i32
    %0 = arith.subi %arg0, %c1_i32 : i32
    %c0_i32 = arith.constant 0 : i32
    %1 = arith.maxsi %0, %c0_i32 : i32
    %c0_i32_0 = arith.constant 0 : i32
    %c0_i32_1 = arith.constant 0 : i32
    %c0_i32_2 = arith.constant 0 : i32
    return %1, %c0_i32_0, %c0_i32_1 : i32, i32, i32
  }
  func.func @transform_6(%arg0: i32, %arg1: i32) -> (i32, i32, i32) {
    %c1_i32 = arith.constant 1 : i32
    %0 = arith.subi %arg0, %c1_i32 : i32
    %c0_i32 = arith.constant 0 : i32
    %1 = arith.maxsi %0, %c0_i32 : i32
    %c0_i32_0 = arith.constant 0 : i32
    %c0_i32_1 = arith.constant 0 : i32
    %c0_i32_2 = arith.constant 0 : i32
    return %1, %c0_i32_0, %c0_i32_1 : i32, i32, i32
  }
  func.func @transform_7(%arg0: i32, %arg1: i32) -> (i32, i32) {
    %c0_i32 = arith.constant 0 : i32
    %c0_i32_0 = arith.constant 0 : i32
    %c0_i32_1 = arith.constant 0 : i32
    return %c0_i32, %c0_i32_0 : i32, i32
  }
  func.func @transform_8(%arg0: i32, %arg1: i32) -> (i32, i32) {
    %c0_i32 = arith.constant 0 : i32
    %c0_i32_0 = arith.constant 0 : i32
    %c0_i32_1 = arith.constant 0 : i32
    return %c0_i32, %c0_i32_0 : i32, i32
  }
  func.func @transform_9(%arg0: i32, %arg1: i32) -> (i32, i32) {
    %c0_i32 = arith.constant 0 : i32
    %c0_i32_0 = arith.constant 0 : i32
    %c0_i32_1 = arith.constant 0 : i32
    return %c0_i32, %c0_i32_0 : i32, i32
  }
  func.func @transform_10(%arg0: i32, %arg1: i32) -> (i32, i32) {
    %c0_i32 = arith.constant 0 : i32
    %c0_i32_0 = arith.constant 0 : i32
    %c0_i32_1 = arith.constant 0 : i32
    return %c0_i32, %c0_i32_0 : i32, i32
  }
  func.func @transform_11(%arg0: i32, %arg1: i32) -> (i32, i32) {
    %c2_i32 = arith.constant 2 : i32
    %0 = arith.cmpi eq, %arg0, %c2_i32 : i32
    %c0_i32 = arith.constant 0 : i32
    %1 = arith.select %0, %arg1, %c0_i32 : i32
    %c0_i32_0 = arith.constant 0 : i32
    %c0_i32_1 = arith.constant 0 : i32
    return %1, %c0_i32_0 : i32, i32
  }
}

</mosaic_0001>

<bundles_post_ra>
// kernel: tpu_custom_call.1
= control target key start
LH: loop header
LB: loop body
LE: loop exit
PB: predicated region body
PF: predicated region fallthrough
CT: control target
= control target key end

     0   :  { %s3153_s0 = inlined_call_operand.vmem [shape: f32[40,16], index: 0, kind: input, shape index: {}]   ;;  %s3154_s1 = inlined_call_operand.hbm [shape: bf16[40,40], index: 1, kind: input, shape index: {}]   ;;  %s3155_s2 = inlined_call_operand.hbm [shape: bf16[16,128], index: 2, kind: input, shape index: {}]   ;;  %s3156_s3 = inlined_call_operand.vmem [shape: f32[1,128], index: 3, kind: input, shape index: {}]   ;;  %s3157_s4 = inlined_call_operand.hbm [shape: bf16[2,256,128], index: 4, kind: input, shape index: {}]   ;;  %s3158_s5 = inlined_call_operand.hbm [shape: bf16[2,128,128], index: 5, kind: input, shape index: {}]   ;;  %s3159_s6 = inlined_call_operand.vmem [shape: f32[2,1,128], index: 6, kind: input, shape index: {}]   ;;  %s3160_s7 = inlined_call_operand.vmem [shape: bf16[128,128], index: 7, kind: input, shape index: {}]   ;;  %s3161_s8 = inlined_call_operand.vmem [shape: f32[1,128], index: 8, kind: input, shape index: {}]   ;;  %s3162_s9 = inlined_call_operand.hbm [shape: bf16[128,128], index: 9, kind: input, shape index: {}]   ;;  %s3163_s10 = inlined_call_operand.vmem [shape: f32[1,128], index: 10, kind: input, shape index: {}]   ;;  %s3164_s11 = inlined_call_operand.hbm [shape: f32[40,128], index: 11, kind: output, shape index: {}]  }
   0x1   :  { %3174 = sst [smem:[#allocation22_spill]] %s3154_s1 }
   0x2   :  { %3175 = sst [smem:[#allocation23_spill]] %s3155_s2 }
   0x3   :  { %3176 = sst [smem:[#allocation24_spill]] %s3157_s4 }
   0x4   :  { %3177 = sst [smem:[#allocation25_spill]] %s3161_s8 }
   0x5   :  { %3178 = sst [smem:[#allocation26_spill]] %s3163_s10 }
   0x6   :  { %3179 = sst [smem:[#allocation27_spill]] %s3164_s11 }
   0x7   :  { %16 = vsyncpa [#allocation6], 0 }
   0x8   :  { %17 = vsyncpa [#allocation9], 0 }
   0x9   :  { %18 = vsyncpa [#allocation7], 0  ;;  %s2726_s17 = smov 0   ;;  %s2728_s18 = smov 0  }
   0xa   :  { %s2730_s19 = smov 0   ;;  %s2732_s20 = smov 0  }
   0xb   :  { %s2734_s21 = smov 0   ;;  %s2736_s22 = smov 0  }
   0xc LB: > { %3180 = sst [smem:[#allocation19_spill]] %s2643_s21  ;;  %s2755_s23 = sadd.s32 4294967295, %s2647_s22   ;;  %s2647_s22 = sphi %s2736_s22, %s24_s22   ;;  %s2643_s21 = sphi %s2734_s21, %s3206_s21   ;;  %s2639_s20 = sphi %s2732_s20, %s3205_s20   ;;  %s2635_s19 = sphi %s2730_s19, %s3209_s19   ;;  %s2631_s18 = sphi %s2728_s18, %s3208_s18   ;;  %s2627_s17 = sphi %s2726_s17, %s3207_s17  }
   0xd   : > { %3181 = sst [smem:[#allocation20_spill]] %s2647_s22  ;;  %p158_p0 = scmp.ne.s32.totalorder %s2635_s19, %s2631_s18 }
   0xe   : > { %p159_p1 = scmp.eq.s32.totalorder %s2647_s22, 0  ;;  %p164_p2 = scmp.ne.s32.totalorder %s2631_s18, %s2627_s17 }
   0xf   : > { %p3165_p3 = scmp.eq.s32.totalorder %s2755_s23, 0  ;;  %p1894_p5 = scmp.ge.s32.totalorder %s2647_s22, 1 }
  0x10   : > { %p160_p4 = por %p159_p1, %p158_p0  ;;  %p353_p7 = scmp.lt.s32.totalorder %s2647_s22, 4 }
  0x11   : > { %p2766_p6 = por %p3165_p3, %p164_p2  ;;  %s2649_s27 = smov [#allocation5]  }
  0x12   : > { %p2771_p8 = pnand %p1894_p5, %p353_p7  ;;  %s370_s28 = sshll.u32 %s2649_s27, 4  ;;  %s371_s28 = int_to_ptr.vmem [resolvable:$true] %s370_s28 }
  0x13   : > { %p2276_p10 = scmp.lt.s32.totalorder %s2647_s22, 3  ;;  %s2650_s12 = smov [#allocation8]  }
  0x14   : > { %p2256_p9 = pneg %p2771_p8  ;;  %s383_s13 = sshll.u32 %s2650_s12, 4  ;;  %s384_s13 = int_to_ptr.vmem [resolvable:$true] %s383_s13 }
  0x15   : > { %p2784_p12 = pnand %p2276_p10, %p160_p4  ;;  %s2434_s14 = scalar_lea.vmem %s371_s28, 320 }
  0x16   : > { %p2780_p11 = pnand %p2256_p9, %p3165_p3  ;;  %p2435_p0 = scmp.ne.s32.totalorder %s371_s28, %s2434_s14 }
  0x17   : > { %p2442_p5 = scmp.lt.s32.totalorder %s371_s28, %s371_s28  ;;  %p2443_p7 = scmp.lt.s32.totalorder %s2434_s14, %s2434_s14 }
  0x18   : > { %p2425_p13 = pneg %p2780_p11 }
  0x19   : > { %p2444_p9 = por %p2443_p7, %p2442_p5 }
  0x1a   : > { %p2437_p1 = pnand %p2435_p0, %p2425_p13 }
  0x1c   : > { %p2438_p2 = pneg %p2437_p1 }
  0x1e   : > { %p2445_p3 = pnand %p2444_p9, %p2438_p2 }
  0x20   : > { %2448 = shalt.err (!%p2445_p3)
}
  0x21   : > { %s3166_s15 = smov 64   ;;  %s3168_s16 = smov 4  }
  0x22   : > { %s3186_s1 = sld [smem:[#allocation22_spill]]  ;;  %s2460_s12 = scalar_lea.vmem %s384_s13, 128 }
  0x23   : > { %p2461_p4 = scmp.ne.s32.totalorder %s384_s13, %s2460_s12  ;;  %p2468_p1 = scmp.lt.s32.totalorder %s384_s13, %s384_s13 }
  0x24   : > { %p2469_p3 = scmp.lt.s32.totalorder %s2460_s12, %s2460_s12 }
  0x25   : > { %p2463_p10 = pnand %p2461_p4, %p2425_p13 }
  0x26   : > { %p2470_p2 = por %p2469_p3, %p2468_p1 }
  0x27   : > { %p2464_p0 = pneg %p2463_p10 }
  0x28   : > { %2259 = dma.hbm_to_vmem [thread:$0]  (!%p2780_p11), %s3186_s1, 320, %s371_s28, [#allocation6], %s3166_s15, %s3166_s15, %s3168_s16  }
  0x29   : > { %p2471_p5 = pnand %p2470_p2, %p2464_p0 }
  0x2b   : > { %2474 = shalt.err (!%p2471_p5)
}
  0x2c   : > { %s3187_s2 = sld [smem:[#allocation23_spill]]  ;;  %s435_s28 = sand.u32 1, %s2647_s22  }
  0x2d   : > { %s36_s17 = sadd.s32 1, %s2643_s21  ;;  %s1888_s27 = sadd.s32 4294967295, %s2643_s21 }
  0x2e   : > { %p38_p7 = scmp.ge.s32.totalorder %s36_s17, 3  ;;  %p143_p9 = scmp.gt.s32.totalorder %s1888_s27, 0 }
  0x2f   : > { %s3173_s12 = sand.u32 1, %s2635_s19   ;;  %s3189_s4 = sld [smem:[#allocation24_spill]] }
  0x30   : > { %s3211_s17 = smov (%p38_p7, %s36_s17), 0  ;;  %s3213_s27 = smov (!%p143_p9, %s1888_s27), 0 }
  0x31   : > { %3188 = sst [smem:[#allocation21_spill]] %s3211_s17  ;;  %s1889_s24 = sadd.s32 4294967295, %s3211_s17 }
  0x32   : > { %2262 = dma.hbm_to_vmem [thread:$0]  (!%p2780_p11), %s3187_s2, 128, %s384_s13, [#allocation9], %s3166_s15, %s3166_s15, %s3168_s16  }
  0x33   : > { %s1900_s14 = sshll.u32 %s3173_s12, 7  ;;  %p146_p4 = scmp.gt.s32.totalorder %s1889_s24, 0 }
  0x34   : > { %s2026_s13 = sshll.u32 %s3213_s27, 11  ;;  %s439_s15 = scalar_lea.vmem [#allocation10], %s1900_s14 }
  0x35   : > { %s449_s16 = sshll.u32 %s439_s15, 4  ;;  %s3215_s24 = smov (!%p146_p4, %s1889_s24), 0  ;;  %s450_s16 = int_to_ptr.vmem [resolvable:$true] %s449_s16 }
  0x36   : > { %s448_s21 = scalar_lea.hbm %s3189_s4, %s2026_s13  ;;  %s148_s22 = ssub.s32 %s3213_s27, %s3215_s24 }
  0x37   : > { %p2828_p10 = scmp.eq.s32.totalorder %s148_s22, 0  ;;  %s2653_s10 = smov [#allocation12]  }
  0x38   : > { %s405_s17 = sshll.u32 %s2653_s10, 4  ;;  %s2832_s8 = scalar_lea.sflag [#allocation6], %s435_s28  ;;  %s406_s17 = int_to_ptr.vmem [resolvable:$true] %s405_s17 }
  0x39   : > { %p2477_p0 = pneg %p2784_p12  ;;  %s2488_s12 = scalar_lea.vmem %s450_s16, 2048 }
  0x3a   : > { %p2489_p1 = scmp.ne.s32.totalorder %s450_s16, %s2488_s12  ;;  %s2654_s1 = smov [#allocation10]  }
  0x3b   : > { %s2493_s2 = sshll.u32 %s2654_s1, 4  ;;  %s2494_s2 = int_to_ptr.vmem [resolvable:$false] %s2493_s2 }
  0x3c   : > { %p2491_p3 = pnand %p2489_p1, %p2477_p0  ;;  %s2495_s15 = scalar_lea.vmem %s2494_s2, 4096 }
  0x3d   : > { %p2496_p5 = scmp.lt.s32.totalorder %s450_s16, %s2494_s2  ;;  %p2497_p7 = scmp.lt.s32.totalorder %s2495_s15, %s2488_s12 }
  0x3e   : > { %p2492_p2 = pneg %p2491_p3 }
  0x3f   : > { %p2498_p9 = por %p2497_p7, %p2496_p5 }
  0x41   : > { %p2499_p4 = pnand %p2498_p9, %p2492_p2 }
  0x43   : > { %2502 = shalt.err (!%p2499_p4)
}
  0x44   : > { %s3191_s10 = smov 4   ;;  %s3192_s22 = smov 64  }
  0x45   : > { %2269 = dma.hbm_to_vmem [thread:$0]  (!%p2784_p12), %s448_s21, 2048, %s450_s16, %s2832_s8, %s3192_s22, %s3192_s22, %s3191_s10  }
  0x46   : > { %s3193_s28 = sadd.s32 1, %s2635_s19  ;;  %s3194_s12 = sand.u32 1, %s2635_s19  }
  0x47   : > { %s2850_s24 = scalar_select %p2828_p10, %s2635_s19, %s3193_s28  }
  0x48   : > { %s1904_s14 = sshll.u32 %s3194_s12, 6  ;;  %s2514_s13 = scalar_lea.vmem %s406_s17, 1024 }
  0x49   : > { %p2515_p1 = scmp.ne.s32.totalorder %s406_s17, %s2514_s13  ;;  %p2522_p5 = scmp.lt.s32.totalorder %s406_s17, %s406_s17 }
  0x4a   : > { %p2523_p7 = scmp.lt.s32.totalorder %s2514_s13, %s2514_s13 }
  0x4b   : > { %p2517_p3 = pnand %p2515_p1, %p2425_p13 }
  0x4c   : > { %p2524_p9 = por %p2523_p7, %p2522_p5 }
  0x4d   : > { %p2518_p2 = pneg %p2517_p3 }
  0x4f   : > { %p2525_p4 = pnand %p2524_p9, %p2518_p2 }
  0x51   : > { %2528 = shalt.err (!%p2525_p4)
}
  0x52   : > { %2265 = dma.hbm_to_vmem [thread:$0]  (!%p2780_p11), %s3162_s9, 1024, %s406_s17, [#allocation9], %s3192_s22, %s3192_s22, %s3191_s10  }
  0x53   : > { %s2027_s16 = sshll.u32 %s3213_s27, 10  ;;  %s463_s28 = scalar_lea.vmem [#allocation11], %s1904_s14 }
  0x54   : > { %s472_s15 = scalar_lea.hbm %s3158_s5, %s2027_s16  ;;  %s473_s12 = sshll.u32 %s463_s28, 4  ;;  %s474_s12 = int_to_ptr.vmem [resolvable:$true] %s473_s12 }
  0x55   : > { %s2542_s13 = scalar_lea.vmem %s474_s12, 1024  ;;  %s2655_s29 = smov [#allocation11]  }
  0x56   : > { %p2543_p13 = scmp.ne.s32.totalorder %s474_s12, %s2542_s13  ;;  %s2547_s4 = sshll.u32 %s2655_s29, 4  ;;  %s2548_s4 = int_to_ptr.vmem [resolvable:$false] %s2547_s4 }
  0x57   : > { %s2549_s11 = scalar_lea.vmem %s2548_s4, 2048  ;;  %p2550_p3 = scmp.lt.s32.totalorder %s474_s12, %s2548_s4 }
  0x58   : > { %p2545_p10 = pnand %p2543_p13, %p2477_p0  ;;  %p2551_p11 = scmp.lt.s32.totalorder %s2549_s11, %s2542_s13 }
  0x5a   : > { %p2546_p1 = pneg %p2545_p10  ;;  %p2552_p2 = por %p2551_p11, %p2550_p3 }
  0x5c   : > { %p2553_p5 = pnand %p2552_p2, %p2546_p1 }
  0x5e   : > { %2556 = shalt.err (!%p2553_p5)
}
  0x5f   : > { %2272 = dma.hbm_to_vmem [thread:$0]  (!%p2784_p12), %s472_s15, 1024, %s474_s12, %s2832_s8, %s3192_s22, %s3192_s22, %s3191_s10  }
  0x60   : > { %497 = sbr.rel (%p2771_p8) target bundleno = 1627 (0x65b), region = 64  ;;  %p3195_p0 = scmp.eq.s32.totalorder (!%p2771_p8), %s2755_s23, 0 }
  0x65   : > { %2606 = dma.done.wait (%p3195_p0), [#allocation6], 320   ;;  %p3196_p7 = pmov %p3195_p0 }
  0x66   : > { %p3197_p9 = pmov %p3195_p0 }
  0x67   : > { %2608 = vsyncadd (%p3196_p7), [#allocation6], 4294966976 }
  0x68   : > { %2610 = dma.done.wait (%p3197_p9), [#allocation9], 128   ;;  %p3198_p4 = pmov %p3195_p0 }
  0x69   : > { %s507_s4 = sand.u32 1, %s2755_s23   ;;  %s509_s8 = sand.u32 1, %s2631_s18  }
  0x6a   : > { %2612 = vsyncadd (%p3198_p4), [#allocation9], 4294967168  ;;  %s1911_s30 = sshll.u32 %s509_s8, 7  ;;  %s508_s26 = scalar_lea.sflag [#allocation6], %s507_s4 }
  0x6b   : > { %s2890_s17 = scalar_lea.vmem [#allocation10], %s1911_s30 }
  0x6c   : > { %2614 = dma.done.wait (%p2766_p6), %s508_s26, 3072  }
  0x6d   : > { %2616 = vsyncadd (%p2766_p6), %s508_s26, 4294964224  ;;  %s1912_s27 = sshll.u32 %s509_s8, 6  ;;  %p3199_p8 = pmov %p3195_p0 }
  0x6e   : > { %s2896_s10 = scalar_lea.vmem [#allocation11], %s1912_s27 }
  0x6f   : > { %2618 = dma.done.wait (%p3199_p8), [#allocation9], 1024   ;;  %p3200_p12 = pmov %p3195_p0 }
  0x70   : > { %s2903_s22 = sadd.s32 4294967295, %s2639_s20  ;;  %v623_v0 = vlaneseq  ;;  %s610_s25 = ssub.s32 0, %s2639_s20 }
  0x71   : > { %2620 = vsyncadd (%p3200_p12), [#allocation9], 4294966272  ;;  %p596_p6 = scmp.gt.s32.totalorder %s2903_s22, 0  ;;  %p1915_p13 = scmp.lt.s32.totalorder %s2903_s22, 1 }
  0x72   : > { %v624_v1 = vshrl.u32 %v623_v0, 7  ;;  %p640_p10 = scmp.eq.s32.totalorder %s2639_s20, 0  ;;  %p609_p1 = scmp.lt.s32.totalorder %s2639_s20, 0 }
  0x73   : > { %s597_s14 = scalar_select %p596_p6, %s2903_s22, 0  ;;  %v2656_v3 = vmov (%p640_p10), 0.0  }
  0x74   : > { %s1920_s21 = smin.u32 %s2639_s20, %s610_s25  ;;  %v2913_v2 = vadd.s32 32, %v624_v1  ;;  %646 = vst [vmem:[#allocation3] sm:$0x1] (%p640_p10), %v2656_v3 }
  0x75   : > { %s3217_s14 = smov (!%p1915_p13, %s597_s14), 1  ;;  %s612_s16 = sand.u32 1, %s1920_s21  }
  0x76   : > { %vm639_vm0 = vcmp.lt.s32.totalorder %v2913_v2, 37  ;;  %s600_s15 = scalar_lea.vmem %s3159_s6, %s3217_s14  ;;  %s613_s28 = ssub.s32 0, %s612_s16 }
  0x77   : > { %s3219_s28 = smov (!%p609_p1, %s613_s28), %s612_s16  ;;  %645 = sbr.rel (!%p640_p10) target bundleno = 124 (0x7c), region = 88 }
  0x78   : > { %p1922_p3 = scmp.lt.s32.totalorder %s3219_s28, 0  ;;  %s619_s12 = sadd.s32 2, %s3219_s28 }
  0x7a   : > { %s3221_s12 = smov (!%p1922_p3, %s619_s12), %s3219_s28 }
  0x7b   : > { %s2922_s13 = smul.u32 40, %s3221_s12 }
  0x7c PF: > { %p1924_p11 = scmp.ne.s32.totalorder %s2639_s20, 0 }
  0x7d   : > { %s770_s28 = sshra.s32 (!%p1924_p11), %s2922_s13, 3 }
  0x7e   : > { %649 = sbr.rel (%p1924_p11) target bundleno = 360 (0x168), region = 92  ;;  %s2036_s12 = sshll.u32 (!%p1924_p11), %s770_s28, 3 }
  0x7f   : > { %s774_s29 = scalar_lea.vmem (!%p1924_p11), [#allocation2], %s2036_s12 }
  0x83   : > { %v2345_v4 = vld [vmem:[#allocation8] sm:$0xff]   ;;  %v2657_v5 = vmov 0.0   ;;  %v652_v8 = vld [vmem:[%s3153_s0 + $0x10] sm:$0xff]  ;;  %vm673_vm1 = vcmask 130048   ;;  %v653_v10 = vld [vmem:[%s3153_s0 + $0x18] sm:$0xff]  ;;  %vm2658_vm2 = vmmov 0  }
  0x84   : > { %2126 = vmatprep.subr.bf16.mxu0 %v2657_v5  ;;  %2234 = vmatprep.subr.bf16.mxu1 %v2657_v5  ;;  %v650_v6 = vld [vmem:[%s3153_s0] sm:$0xff]  ;;  %v651_v7 = vld [vmem:[%s3153_s0 + $0x8] sm:$0xff]  ;;  %v656_v11 = vpack.c.bf16 %v653_v10, %v652_v8  ;;  %v780_v52 = vld [vmem:[#allocation3] sm:$0x1] }
  0x85   : > { %2127 = vmatpush3.bf16.msra.mxu0 %v2345_v4  ;;  %2235 = vmatpush3.bf16.msra.mxu1 %v2345_v4  ;;  %v655_v9 = vpack.c.bf16 %v651_v7, %v650_v6  ;;  %v654_v12 = vld [vmem:[%s3153_s0 + $0x20] sm:$0xff] }
  0x86   : > { %2128 = vmatprep.mubr.msk.bf16.mxu0 %vm2658_vm2, %v2657_v5  ;;  %2132 = vmatprep.mubr.msk.bf16.mxu1 %vm2658_vm2, %v2657_v5  ;;  %v657_v13 = vpack.c.bf16 %v654_v12, %v654_v12  ;;  %v1925_v14 = vld [vmem:[%s3156_s3] ss:$0 sm:$0xff] }
  0x88   : > { %2129 = vmatmul.mubr.msk.bf16.vlgmr.msra.gmra.mxu0 %vm673_vm1, %v655_v9  ;;  %2133 = vmatmul.mubr.msk.bf16.vlgmr.msra.gmra.mxu1 %vm673_vm1, %v656_v11 }
  0x89   : > { %2136 = vmatprep.mubr.msk.bf16.mxu1 %vm2658_vm2, %v2657_v5 }
  0x90   : > { %2137 = vmatmul.mubr.msk.bf16.gmra.mxu1 %vm673_vm1, %v657_v13 }
 0x148   : > { %v717_v15 = vpop.f32.mrf.mxu0  ;;  %v725_v16 = vpop.f32.mrf.mxu1 }
 0x149   : > { %v718_v17 = vadd.f32 %v1925_v14, %v717_v15  ;;  %v726_v18 = vadd.f32 %v1925_v14, %v725_v16 }
 0x14a   : > { %v2130_v19 = vpop.f32.mrf.mxu0  ;;  %v2134_v20 = vpop.f32.mrf.mxu1 }
 0x14b   : > { %v739_v21 = vmax.f32 %v718_v17, 0.0  ;;  %v741_v22 = vmax.f32 %v726_v18, 0.0 }
 0x14c   : > { %v720_v23 = vpop.f32.mrf.mxu0  ;;  %v728_v24 = vpop.f32.mrf.mxu1 }
 0x14d   : > { %v2031_v25 = vpack.c.bf16 %v739_v21, %v739_v21  ;;  %v2033_v26 = vpack.c.bf16 %v741_v22, %v741_v22  ;;  %v721_v27 = vadd.f32 %v1925_v14, %v720_v23  ;;  %v729_v28 = vadd.f32 %v1925_v14, %v728_v24 }
 0x14e   : > { %v2131_v29 = vpop.f32.mrf.mxu0  ;;  %v2135_v30 = vpop.f32.mrf.mxu1 }
 0x14f   : > { %775 = vst [vmem:[%s774_s29] sm:$0xf] %v2031_v25  ;;  %777 = vst [vmem:[%s774_s29 + $0x10] sm:$0xf] %v2033_v26  ;;  %v740_v31 = vmax.f32 %v721_v27, 0.0  ;;  %v742_v32 = vmax.f32 %v729_v28, 0.0 }
 0x150   : > { %v733_v33 = vpop.f32.mrf.mxu1 }
 0x151   : > { %v2032_v34 = vpack.c.bf16 %v740_v31, %v740_v31  ;;  %v781_v35 = vadd.f32 %v740_v31, %v739_v21  ;;  %v2034_v36 = vpack.c.bf16 %v742_v32, %v742_v32  ;;  %v734_v37 = vadd.f32 %v1925_v14, %v733_v33 }
 0x152   : > { %v2138_v38 = vpop.f32.mrf.mxu1 }
 0x153   : > { %776 = vst [vmem:[%s774_s29 + $0x8] sm:$0xf] %v2032_v34  ;;  %778 = vst [vmem:[%s774_s29 + $0x18] sm:$0xf] %v2034_v36  ;;  %v782_v39 = vadd.f32 %v781_v35, %v741_v22  ;;  %v743_v40 = vmax.f32 %v734_v37, 0.0 }
 0x154   : > { %v736_v41 = vpop.f32.mrf.mxu1 }
 0x155   : > { %v783_v42 = vadd.f32 %v782_v39, %v742_v32  ;;  %v748_v43 = vsel %vm639_vm0, %v743_v40, 0.0 }
 0x156   : > { %v2035_v44 = vpack.c.bf16 %v748_v43, %v748_v43  ;;  %v2139_v45 = vpop.f32.mrf.mxu1 }
 0x157   : > { %v784_v46 = vadd.f32 %v783_v42, %v748_v43 }
 0x158   : > { %779 = vst [vmem:[%s774_s29 + $0x20] sm:$0xf] %v2035_v44 }
 0x159   : > { %v785_v47 = vrot.slane %v784_v46, 4 }
 0x15b   : > { %v786_v48 = vadd.f32 %v785_v47, %v784_v46 }
 0x15d   : > { %v787_v49 = vrot.slane %v786_v48, 2 }
 0x15f   : > { %v788_v50 = vadd.f32 %v787_v49, %v786_v48 }
 0x161   : > { %v789_v51 = vrot.slane %v788_v50, 1 }
 0x163   : > { %v790_v53 = vadd.f32 %v789_v51, %v788_v50 }
 0x165   : > { %v791_v54 = vadd.f32 %v790_v53, %v780_v52 }
 0x167   : > { %792 = vst [vmem:[#allocation3] sm:$0x1] %v791_v54 }
 0x168 PF: > { %p1937_p2 = scmp.le.s32.totalorder %s2639_s20, 0 }
 0x169   : > { %p798_p5 = scmp.lt.s32.totalorder (!%p1937_p2), %s2903_s22, 0  ;;  %s799_s11 = ssub.s32 (!%p1937_p2), 0, %s2903_s22 }
 0x16a   : > { %796 = sbr.rel (%p1937_p2) target bundleno = 833 (0x341), region = 96  ;;  %s1939_s4 = smin.u32 (!%p1937_p2), %s2903_s22, %s799_s11 }
 0x16b   : > { %s801_s8 = sand.u32 (!%p1937_p2), 1, %s1939_s4   ;;  %s1333_s16 = sshra.s32 (!%p1937_p2), %s2922_s13, 3 }
 0x16c   : > { %s802_s30 = ssub.s32 (!%p1937_p2), 0, %s801_s8  ;;  %s2049_s1 = sshll.u32 (!%p1937_p2), %s1333_s16, 3 }
 0x16d   : > { %s3020_s14 = scalar_lea.vmem (!%p1937_p2), [#allocation2], %s2049_s1 }
 0x16f   : > { %v2659_v55 = vmov 0.0   ;;  %vm2660_vm3 = vmmov 0   ;;  %v2352_v56 = vld [vmem:[%s2896_s10 + $0x38] sm:$0xff]   ;;  %v2353_v57 = vld [vmem:[%s2896_s10 + $0x30] sm:$0xff]   ;;  %s3223_s30 = smov (!%p798_p5, %s802_s30), %s801_s8  ;;  %v2356_v58 = vld [vmem:[%s2896_s10 + $0x28] sm:$0xff]   ;;  %vm978_vm4 = vcmask 1043456  }
 0x170   : > { %2160 = vmatprep.subr.bf16.mxu1 %v2659_v55  ;;  %2166 = vmatprep.mubr.msk.bf16.mxu1 %vm2660_vm3, %v2659_v55  ;;  %p1941_p0 = scmp.lt.s32.totalorder %s3223_s30, 0  ;;  %s808_s22 = sadd.s32 2, %s3223_s30  ;;  %v2359_v59 = vld [vmem:[%s2896_s10 + $0x20] sm:$0xff]   ;;  %v2362_v61 = vld [vmem:[%s2896_s10 + $0x18] sm:$0xff]   ;;  %vm968_vm5 = vcmask 326656   ;;  %v2357_v6 = vld [vmem:[%s2890_s17 + $0x70] sm:$0xff]  }
 0x171   : > { %2140 = vmatprep.subr.bf16.mxu0 %v2659_v55  ;;  %2156 = vmatprep.mubr.msk.bf16.mxu0 %vm2660_vm3, %v2659_v55  ;;  %v2354_v3 = vld [vmem:[%s2890_s17 + $0x78] sm:$0xff]   ;;  %v2349_v4 = vld [vmem:[#allocation5] sm:$0xff]   ;;  %v2358_v7 = vld [vmem:[%s2890_s17 + $0x30] sm:$0xff]  }
 0x172   : > { %2141 = vmatpush3.bf16.msra.mxu0 %v2352_v56  ;;  %s3225_s22 = smov (!%p1941_p0, %s808_s22), %s3223_s30  ;;  %v2355_v5 = vld [vmem:[%s2890_s17 + $0x38] sm:$0xff]   ;;  %v2360_v8 = vld [vmem:[%s2890_s17 + $0x68] sm:$0xff]   ;;  %v2363_v11 = vld [vmem:[%s2890_s17 + $0x60] sm:$0xff]  }
 0x173   : > { %2142 = vmatprep.subr.bf16.mxu0 %v2659_v55  ;;  %s810_s26 = smul.u32 40, %s3225_s22  ;;  %v2350_v9 = vld [vmem:[#allocation5 + $0x8] sm:$0xff]   ;;  %v2364_v12 = vld [vmem:[%s2890_s17 + $0x20] sm:$0xff]   ;;  %v2351_v13 = vld [vmem:[#allocation5 + $0x10] ss:$0 sps:$4 sm:$0xff]  }
 0x174   : > { %v2361_v10 = vld [vmem:[%s2890_s17 + $0x28] sm:$0xff]   ;;  %v2365_v14 = vld [vmem:[%s2896_s10 + $0x10] sm:$0xff]   ;;  %v2366_v15 = vld [vmem:[%s2890_s17 + $0x58] sm:$0xff]  }
 0x175   : > { %s925_s27 = sshra.s32 %s810_s26, 3  ;;  %v2367_v16 = vld [vmem:[%s2890_s17 + $0x18] sm:$0xff]   ;;  %v2368_v17 = vld [vmem:[%s2896_s10 + $0x8] sm:$0xff]   ;;  %v2369_v18 = vld [vmem:[%s2890_s17 + $0x50] sm:$0xff]  }
 0x176   : > { %2143 = vmatpush3.bf16.msra.mxu0 %v2353_v57  ;;  %s2037_s25 = sshll.u32 %s925_s27, 3  ;;  %v2370_v19 = vld [vmem:[%s2890_s17 + $0x10] sm:$0xff]   ;;  %v2371_v20 = vld [vmem:[%s2896_s10] sm:$0xff]   ;;  %v2372_v22 = vld [vmem:[%s2890_s17 + $0x48] sm:$0xff]  }
 0x177   : > { %2144 = vmatprep.subr.bf16.mxu0 %v2659_v55  ;;  %s2965_s21 = scalar_lea.vmem [#allocation2], %s2037_s25  ;;  %v815_v21 = vld [vmem:[#allocation3] sm:$0x1]  ;;  %v2373_v24 = vld [vmem:[%s2890_s17 + $0x8] sm:$0xff]   ;;  %v834_v52 = vld [vmem:[%s600_s15] sm:$0x1] }
 0x178   : > { %v2346_v60 = vld [vmem:[%s2965_s21 + $0x20] ss:$0 sps:$4 sm:$0xff]   ;;  %v2347_v63 = vld [vmem:[%s2965_s21 + $0x10] ss:$8 sps:$4 sm:$0xff]   ;;  %v816_v23 = vmul.f32 0.027027028, %v815_v21 }
 0x179   : > { %v980_v62 = vsel %vm978_vm4, %v2346_v60, 0  ;;  %v2348_v1 = vld [vmem:[%s2965_s21] ss:$8 sps:$4 sm:$0xff]   ;;  %924 = vst [vmem:[#allocation3] sm:$0x1] %v2659_v55  ;;  %v2374_v26 = vld [vmem:[%s2890_s17 + $0x40] sm:$0xff]  }
 0x17a   : > { %2145 = vmatpush3.bf16.msra.mxu0 %v2356_v58  ;;  %2161 = vmatpush3.bf16.msra.mxu1 %v980_v62  ;;  %v817_v25 = vpack.c.bf16 %v816_v23, %v816_v23  ;;  %v2375_v27 = vld [vmem:[%s2890_s17] sm:$0xff]   ;;  %v2376_v40 = vld [vmem:[%s2965_s21] ss:$8 sps:$4 sm:$0xff]  }
 0x17b   : > { %2146 = vmatprep.subr.bf16.mxu0 %v2659_v55  ;;  %2162 = vmatprep.subr.bf16.mxu1 %v2659_v55  ;;  %v2381_v48 = vld [vmem:[%s2965_s21 + $0x10] ss:$8 sps:$4 sm:$0xff]  }
 0x17e   : > { %2147 = vmatpush3.bf16.msra.mxu0 %v2359_v59  ;;  %2163 = vmatpush3.bf16.msra.mxu1 %v2347_v63 }
 0x17f   : > { %2148 = vmatprep.subr.bf16.mxu0 %v2659_v55  ;;  %2164 = vmatprep.subr.bf16.mxu1 %v2659_v55 }
 0x182   : > { %2149 = vmatpush3.bf16.msra.mxu0 %v2362_v61  ;;  %2165 = vmatpush3.bf16.msra.mxu1 %v2348_v1 }
 0x183   : > { %2150 = vmatprep.subr.bf16.mxu0 %v2659_v55  ;;  %2070 = vmatprep.subr.bf16.mxu1 %v2354_v3 }
 0x185   : > { %2167 = vmatmul.mubr.msk.bf16.vlgmr.msra.gmra.mxu1 %vm968_vm5, %v2349_v4 }
 0x186   : > { %2170 = vmatprep.mubr.msk.bf16.mxu1 %vm2660_vm3, %v2659_v55  ;;  %2071 = vmatpush3.bf16.msra.mxu1 %v2355_v5 }
 0x187   : > { %2072 = vmatprep.subr.bf16.mxu1 %v2357_v6  ;;  %2151 = vmatpush3.bf16.msra.mxu0 %v2365_v14 }
 0x188   : > { %2152 = vmatprep.subr.bf16.mxu0 %v2659_v55 }
 0x18a   : > { %2073 = vmatpush3.bf16.msra.mxu1 %v2358_v7 }
 0x18b   : > { %2074 = vmatprep.subr.bf16.mxu1 %v2360_v8  ;;  %2153 = vmatpush3.bf16.msra.mxu0 %v2368_v17 }
 0x18c   : > { %2154 = vmatprep.subr.bf16.mxu0 %v2659_v55 }
 0x18d   : > { %2171 = vmatmul.mubr.msk.bf16.gmra.mxu1 %vm968_vm5, %v2350_v9 }
 0x18e   : > { %2174 = vmatprep.mubr.msk.bf16.mxu1 %vm2660_vm3, %v2659_v55  ;;  %2075 = vmatpush3.bf16.msra.mxu1 %v2361_v10 }
 0x18f   : > { %2076 = vmatprep.subr.bf16.mxu1 %v2363_v11  ;;  %2155 = vmatpush3.bf16.msra.mxu0 %v2371_v20 }
 0x192   : > { %2077 = vmatpush3.bf16.msra.mxu1 %v2364_v12  ;;  %2157 = vmatmul.mubr.bf16.vlgmr.msra.gmra.mxu0 %v817_v25 }
 0x193   : > { %2078 = vmatprep.subr.bf16.mxu1 %v2366_v15 }
 0x195   : > { %2175 = vmatmul.mubr.msk.bf16.gmra.mxu1 %vm968_vm5, %v2351_v13 }
 0x196   : > { %2079 = vmatpush3.bf16.msra.mxu1 %v2367_v16 }
 0x197   : > { %2080 = vmatprep.subr.bf16.mxu1 %v2369_v18 }
 0x19a   : > { %2081 = vmatpush3.bf16.msra.mxu1 %v2370_v19 }
 0x19b   : > { %2082 = vmatprep.subr.bf16.mxu1 %v2372_v22 }
 0x19e   : > { %2083 = vmatpush3.bf16.msra.mxu1 %v2373_v24 }
 0x19f   : > { %2084 = vmatprep.subr.bf16.mxu1 %v2374_v26 }
 0x1a2   : > { %2085 = vmatpush3.bf16.msra.mxu1 %v2375_v27 }
 0x245   : > { %v1016_v28 = vpop.f32.mrf.mxu1 }
 0x246   : > { %v2038_v29 = vpack.c.bf16 %v1016_v28, %v1016_v28 }
 0x247   : > { %v2168_v30 = vpop.f32.mrf.mxu1 }
 0x248   : > { %1064 = vst [vmem:[%s2965_s21 + $0x4] sm:$0xf] %v2038_v29 }
 0x249   : > { %v1019_v31 = vpop.f32.mrf.mxu1 }
 0x24a   : > { %v2039_v32 = vpack.c.bf16 %v1019_v31, %v1019_v31 }
 0x24b   : > { %v2169_v33 = vpop.f32.mrf.mxu1 }
 0x24c   : > { %1065 = vst [vmem:[%s2965_s21 + $0xc] sm:$0xf] %v2039_v32 }
 0x24d   : > { %v1024_v34 = vpop.f32.mrf.mxu1 }
 0x24e   : > { %v2040_v35 = vpack.c.bf16 %v1024_v34, %v1024_v34 }
 0x24f   : > { %v2172_v36 = vpop.f32.mrf.mxu1 }
 0x250   : > { %1066 = vst [vmem:[%s2965_s21 + $0x14] sm:$0xf] %v2040_v35 }
 0x251   : > { %v1027_v37 = vpop.f32.mrf.mxu1 }
 0x252   : > { %v2041_v38 = vpack.c.bf16 %v1027_v37, %v1027_v37  ;;  %v917_v53 = vpop.f32.mrf.mxu0 }
 0x253   : > { %v2173_v39 = vpop.f32.mrf.mxu1  ;;  %v2378_v41 = vld [vmem:[%s2965_s21 + $0x4] ss:$8 sps:$4 sm:$0xff]   ;;  %v918_v54 = vadd.f32 %v917_v53, %v834_v52 }
 0x254   : > { %1067 = vst [vmem:[%s2965_s21 + $0x1c] sm:$0xf] %v2041_v38  ;;  %1268 = vmatprep.mubr.bf16.mxu1 %v2378_v41  ;;  %v2158_v55 = vpop.f32.mrf.mxu0 }
 0x255   : > { %v1032_v42 = vpop.f32.mrf.mxu1  ;;  %1269 = vmatmul.mubr.bf16.vlgmr.msra.gmra.mxu1 %v2376_v40  ;;  %923 = vst [vmem:[#allocation4] sm:$0x1] %v918_v54 }
 0x256   : > { %v2042_v43 = vpack.c.bf16 %v1032_v42, %v1032_v42  ;;  %v920_v56 = vpop.f32.mrf.mxu0 }
 0x257   : > { %v2176_v44 = vpop.f32.mrf.mxu1 }
 0x258   : > { %1068 = vst [vmem:[%s2965_s21 + $0x24] sm:$0xf] %v2042_v43  ;;  %v2159_v57 = vpop.f32.mrf.mxu0  ;;  %v1343_v44 = vld [vmem:[#allocation3] sm:$0x1] }
 0x259   : > { %v1035_v45 = vpop.f32.mrf.mxu1 }
 0x25b   : > { %v2177_v46 = vpop.f32.mrf.mxu1  ;;  %v2379_v47 = vld [vmem:[%s2965_s21 + $0x14] ss:$8 sps:$4 sm:$0xff]  }
 0x25c   : > { %1276 = vmatprep.mubr.bf16.mxu1 %v2379_v47  ;;  %v1968_v59 = vld [vmem:[#allocation4] ss:$0 sm:$0xff] }
 0x25d   : > { %1277 = vmatmul.mubr.bf16.gmra.mxu1 %v2381_v48 }
 0x25f   : > { %v1073_v49 = vld [vmem:[%s2965_s21 + $0x20] sm:$0xff] }
 0x260   : > { %v1974_v50 = vcombine.high %v1073_v49, %v1073_v49  ;;  %v1973_v51 = vcombine.low %v1073_v49, %v1073_v49 }
 0x262   : > { %1284 = vmatprep.mubr.bf16.mxu1 %v1974_v50 }
 0x265   : > { %1285 = vmatmul.mubr.bf16.gmra.mxu1 %v1973_v51 }
 0x315   : > { %v2086_v58 = vpop.f32.mrf.mxu1 }
 0x317   : > { %v2087_v60 = vpop.f32.mrf.mxu1 }
 0x318   : > { %v2088_v61 = vadd.f32 %v2087_v60, %v2086_v58 }
 0x319   : > { %v2089_v62 = vpop.f32.mrf.mxu1 }
 0x31a   : > { %v1271_v63 = vadd.f32 %v2088_v61, %v1968_v59 }
 0x31b   : > { %v2090_v1 = vpop.f32.mrf.mxu1 }
 0x31c   : > { %vm1292_vm6 = vcmp.gt.f32.partialorder %v1271_v63, 0.0  ;;  %v1297_v3 = vmul.f32 0.1, %v1271_v63  ;;  %v2091_v4 = vadd.f32 %v2090_v1, %v2089_v62 }
 0x31d   : > { %v2092_v5 = vpop.f32.mrf.mxu1 }
 0x31e   : > { %v1302_v6 = vsel %vm1292_vm6, %v1271_v63, %v1297_v3  ;;  %v1274_v7 = vadd.f32 %v2091_v4, %v1968_v59 }
 0x31f   : > { %v2044_v8 = vpack.c.bf16 %v1302_v6, %v1302_v6  ;;  %v2093_v9 = vpop.f32.mrf.mxu1 }
 0x320   : > { %vm1293_vm7 = vcmp.gt.f32.partialorder %v1274_v7, 0.0  ;;  %v1298_v10 = vmul.f32 0.1, %v1274_v7  ;;  %v2094_v11 = vadd.f32 %v2093_v9, %v2092_v5 }
 0x321   : > { %1338 = vst [vmem:[%s3020_s14] sm:$0xf] %v2044_v8  ;;  %v2095_v12 = vpop.f32.mrf.mxu1 }
 0x322   : > { %v1303_v13 = vsel %vm1293_vm7, %v1274_v7, %v1298_v10  ;;  %v1279_v14 = vadd.f32 %v2094_v11, %v1968_v59 }
 0x323   : > { %v2045_v15 = vpack.c.bf16 %v1303_v13, %v1303_v13  ;;  %v2096_v16 = vpop.f32.mrf.mxu1  ;;  %v1344_v27 = vadd.f32 %v1303_v13, %v1302_v6 }
 0x324   : > { %vm1294_vm8 = vcmp.gt.f32.partialorder %v1279_v14, 0.0  ;;  %v1299_v17 = vmul.f32 0.1, %v1279_v14  ;;  %v2097_v18 = vadd.f32 %v2096_v16, %v2095_v12 }
 0x325   : > { %1339 = vst [vmem:[%s3020_s14 + $0x8] sm:$0xf] %v2045_v15  ;;  %v2098_v19 = vpop.f32.mrf.mxu1 }
 0x326   : > { %v1304_v20 = vsel %vm1294_vm8, %v1279_v14, %v1299_v17  ;;  %v1282_v21 = vadd.f32 %v2097_v18, %v1968_v59 }
 0x327   : > { %v2046_v22 = vpack.c.bf16 %v1304_v20, %v1304_v20  ;;  %v2099_v23 = vpop.f32.mrf.mxu1  ;;  %v1345_v32 = vadd.f32 %v1344_v27, %v1304_v20 }
 0x328   : > { %vm1295_vm9 = vcmp.gt.f32.partialorder %v1282_v21, 0.0  ;;  %v1300_v24 = vmul.f32 0.1, %v1282_v21  ;;  %v2100_v25 = vadd.f32 %v2099_v23, %v2098_v19 }
 0x329   : > { %1340 = vst [vmem:[%s3020_s14 + $0x10] sm:$0xf] %v2046_v22  ;;  %v2101_v26 = vpop.f32.mrf.mxu1 }
 0x32a   : > { %v1305_v28 = vsel %vm1295_vm9, %v1282_v21, %v1300_v24  ;;  %v1287_v29 = vadd.f32 %v2100_v25, %v1968_v59 }
 0x32b   : > { %v2047_v30 = vpack.c.bf16 %v1305_v28, %v1305_v28  ;;  %v2102_v31 = vpop.f32.mrf.mxu1  ;;  %v1346_v34 = vadd.f32 %v1345_v32, %v1305_v28 }
 0x32c   : > { %vm1296_vm10 = vcmp.gt.f32.partialorder %v1287_v29, 0.0  ;;  %v1301_v33 = vmul.f32 0.1, %v1287_v29 }
 0x32d   : > { %1341 = vst [vmem:[%s3020_s14 + $0x18] sm:$0xf] %v2047_v30 }
 0x32e   : > { %v1306_v35 = vsel %vm1296_vm10, %v1287_v29, %v1301_v33 }
 0x32f   : > { %v1311_v36 = vsel %vm639_vm0, %v1306_v35, 0.0 }
 0x330   : > { %v2048_v37 = vpack.c.bf16 %v1311_v36, %v1311_v36  ;;  %v1347_v38 = vadd.f32 %v1346_v34, %v1311_v36 }
 0x332   : > { %1342 = vst [vmem:[%s3020_s14 + $0x20] sm:$0xf] %v2048_v37  ;;  %v1348_v39 = vrot.slane %v1347_v38, 4 }
 0x334   : > { %v1349_v40 = vadd.f32 %v1348_v39, %v1347_v38 }
 0x336   : > { %v1350_v41 = vrot.slane %v1349_v40, 2 }
 0x338   : > { %v1351_v42 = vadd.f32 %v1350_v41, %v1349_v40 }
 0x33a   : > { %v1352_v43 = vrot.slane %v1351_v42, 1 }
 0x33c   : > { %v1353_v45 = vadd.f32 %v1352_v43, %v1351_v42 }
 0x33e   : > { %v1354_v46 = vadd.f32 %v1353_v45, %v1343_v44 }
 0x340   : > { %1355 = vst [vmem:[#allocation3] sm:$0x1] %v1354_v46 }
 0x341 PF: > { %p1998_p7 = scmp.ne.s32.totalorder %s2639_s20, 2 }
 0x342   : > { %s1360_s22 = sshra.s32 (!%p1998_p7), %s2922_s13, 3  ;;  %s3201_s15 = sld [smem:[#allocation25_spill]] (!%p1998_p7) }
 0x343   : > { %1359 = sbr.rel (%p1998_p7) target bundleno = 1605 (0x645), region = 104  ;;  %s2050_s25 = sshll.u32 (!%p1998_p7), %s1360_s22, 3 }
 0x344   : > { %s1364_s16 = scalar_lea.vmem (!%p1998_p7), [#allocation2], %s2050_s25  ;;  %s3202_s12 = sld [smem:[#allocation26_spill]] (!%p1998_p7) }
 0x348   : > { %v2384_v2 = vld [vmem:[%s3160_s7 + $0x38] sm:$0xff]   ;;  %v2661_v47 = vmov 0.0   ;;  %v2385_v48 = vld [vmem:[%s3160_s7 + $0x30] sm:$0xff]   ;;  %vm2662_vm11 = vmmov 0   ;;  %v2386_v49 = vld [vmem:[%s3160_s7 + $0x28] sm:$0xff]   ;;  %v3087_v45 = vand.u32 127, %v623_v0 }
 0x349   : > { %2178 = vmatprep.subr.bf16.mxu0 %v2661_v47  ;;  %2206 = vmatprep.subr.bf16.mxu1 %v2661_v47  ;;  %v2387_v50 = vld [vmem:[%s3160_s7 + $0x20] sm:$0xff]   ;;  %v2388_v53 = vld [vmem:[%s3160_s7 + $0x18] sm:$0xff]   ;;  %v2389_v55 = vld [vmem:[%s3160_s7 + $0x10] sm:$0xff]  }
 0x34a   : > { %2179 = vmatpush3.bf16.msra.mxu0 %v2384_v2  ;;  %2194 = vmatprep.mubr.msk.bf16.mxu0 %vm2662_vm11, %v2661_v47  ;;  %v2395_v51 = vld [vmem:[#allocation12 + $0x38] sm:$0xff]   ;;  %v2396_v52 = vld [vmem:[#allocation12 + $0x30] sm:$0xff]   ;;  %v2397_v54 = vld [vmem:[#allocation12 + $0x28] sm:$0xff]   ;;  %vm1660_vm12 = vcmp.lt.s32.totalorder %v3087_v45, 8 }
 0x34b   : > { %2180 = vmatprep.subr.bf16.mxu0 %v2661_v47  ;;  %2222 = vmatprep.mubr.msk.bf16.mxu1 %vm2662_vm11, %v2661_v47  ;;  %v2398_v56 = vld [vmem:[#allocation12 + $0x20] sm:$0xff]   ;;  %v2399_v58 = vld [vmem:[#allocation12 + $0x18] sm:$0xff]   ;;  %v1365_v60 = vld [vmem:[%s1364_s16] sm:$0xf] }
 0x34c   : > { %2207 = vmatpush3.bf16.msra.mxu1 %v2395_v51  ;;  %v2390_v57 = vld [vmem:[%s3160_s7 + $0x8] sm:$0xff]   ;;  %v2391_v59 = vld [vmem:[%s3160_s7] sm:$0xff]   ;;  %v1367_v63 = vld [vmem:[%s1364_s16 + $0x10] sm:$0xf]  ;;  %v1370_v14 = vunpack.c.l.bf16 %v1365_v60 }
 0x34d   : > { %2208 = vmatprep.subr.bf16.mxu1 %v2661_v47  ;;  %v1366_v61 = vld [vmem:[%s1364_s16 + $0x8] sm:$0xf]  ;;  %v1368_v1 = vld [vmem:[%s1364_s16 + $0x18] sm:$0xf]  ;;  %v1369_v4 = vld [vmem:[%s1364_s16 + $0x20] sm:$0xf]  ;;  %v1372_v27 = vunpack.c.l.bf16 %v1367_v63 }
 0x34e   : > { %2181 = vmatpush3.bf16.msra.mxu0 %v2385_v48  ;;  %v2002_v62 = vcombine.low %v1365_v60, %v1366_v61  ;;  %v2003_v3 = vcombine.low %v1367_v63, %v1368_v1  ;;  %v2004_v5 = vcombine.low %v1369_v4, %v1369_v4  ;;  %v2400_v6 = vld [vmem:[#allocation12 + $0x10] sm:$0xff]   ;;  %v2401_v7 = vld [vmem:[#allocation12 + $0x8] sm:$0xff]   ;;  %v2402_v8 = vld [vmem:[#allocation12] sm:$0xff]   ;;  %v1371_v16 = vunpack.c.l.bf16 %v1366_v61 }
 0x34f   : > { %2182 = vmatprep.subr.bf16.mxu0 %v2661_v47  ;;  %v2001_v9 = vld [vmem:[%s3201_s15] ss:$0 sm:$0xff]  ;;  %v1373_v29 = vunpack.c.l.bf16 %v1368_v1  ;;  %v1374_v36 = vunpack.c.l.bf16 %v1369_v4 }
 0x350   : > { %2209 = vmatpush3.bf16.msra.mxu1 %v2396_v52  ;;  %v2013_v46 = vld [vmem:[%s3202_s12] ss:$0 sm:$0xff] }
 0x351   : > { %2210 = vmatprep.subr.bf16.mxu1 %v2661_v47 }
 0x352   : > { %2183 = vmatpush3.bf16.msra.mxu0 %v2386_v49 }
 0x353   : > { %2184 = vmatprep.subr.bf16.mxu0 %v2661_v47 }
 0x354   : > { %2211 = vmatpush3.bf16.msra.mxu1 %v2397_v54 }
 0x355   : > { %2212 = vmatprep.subr.bf16.mxu1 %v2661_v47 }
 0x356   : > { %2185 = vmatpush3.bf16.msra.mxu0 %v2387_v50 }
 0x357   : > { %2186 = vmatprep.subr.bf16.mxu0 %v2661_v47 }
 0x358   : > { %2213 = vmatpush3.bf16.msra.mxu1 %v2398_v56 }
 0x359   : > { %2214 = vmatprep.subr.bf16.mxu1 %v2661_v47 }
 0x35a   : > { %2187 = vmatpush3.bf16.msra.mxu0 %v2388_v53 }
 0x35b   : > { %2188 = vmatprep.subr.bf16.mxu0 %v2661_v47 }
 0x35c   : > { %2215 = vmatpush3.bf16.msra.mxu1 %v2399_v58 }
 0x35d   : > { %2216 = vmatprep.subr.bf16.mxu1 %v2661_v47 }
 0x35e   : > { %2189 = vmatpush3.bf16.msra.mxu0 %v2389_v55 }
 0x35f   : > { %2190 = vmatprep.subr.bf16.mxu0 %v2661_v47 }
 0x360   : > { %2217 = vmatpush3.bf16.msra.mxu1 %v2400_v6 }
 0x361   : > { %2218 = vmatprep.subr.bf16.mxu1 %v2661_v47 }
 0x362   : > { %2191 = vmatpush3.bf16.msra.mxu0 %v2390_v57 }
 0x363   : > { %2192 = vmatprep.subr.bf16.mxu0 %v2661_v47 }
 0x364   : > { %2219 = vmatpush3.bf16.msra.mxu1 %v2401_v7 }
 0x365   : > { %2220 = vmatprep.subr.bf16.mxu1 %v2661_v47 }
 0x366   : > { %2193 = vmatpush3.bf16.msra.mxu0 %v2391_v59 }
 0x368   : > { %2221 = vmatpush3.bf16.msra.mxu1 %v2402_v8 }
 0x369   : > { %2195 = vmatmul.mubr.bf16.vlgmr.msra.gmra.mxu0 %v2002_v62 }
 0x36a   : > { %2198 = vmatprep.mubr.msk.bf16.mxu0 %vm2662_vm11, %v2661_v47 }
 0x371   : > { %2199 = vmatmul.mubr.bf16.gmra.mxu0 %v2003_v3 }
 0x372   : > { %2202 = vmatprep.mubr.msk.bf16.mxu0 %vm2662_vm11, %v2661_v47 }
 0x379   : > { %2203 = vmatmul.mubr.bf16.gmra.mxu0 %v2004_v5 }
 0x429   : > { %v1496_v10 = vpop.f32.mrf.mxu0 }
 0x42a   : > { %v1497_v11 = vadd.f32 %v2001_v9, %v1496_v10 }
 0x42b   : > { %v2196_v12 = vpop.f32.mrf.mxu0 }
 0x42c   : > { %v1518_v15 = vmax.f32 %v1497_v11, 0.0 }
 0x42d   : > { %v1499_v13 = vpop.f32.mrf.mxu0 }
 0x42e   : > { %v1500_v17 = vadd.f32 %v2001_v9, %v1499_v13  ;;  %v1523_v21 = vadd.f32 %v1518_v15, %v1370_v14 }
 0x42f   : > { %v2197_v18 = vpop.f32.mrf.mxu0 }
 0x430   : > { %v1519_v19 = vmax.f32 %v1500_v17, 0.0 }
 0x431   : > { %v1504_v20 = vpop.f32.mrf.mxu0 }
 0x432   : > { %v1524_v22 = vadd.f32 %v1519_v19, %v1371_v16  ;;  %v1505_v23 = vadd.f32 %v2001_v9, %v1504_v20 }
 0x433   : > { %v2200_v24 = vpop.f32.mrf.mxu0 }
 0x434   : > { %v1528_v25 = vpack.c.bf16 %v1524_v22, %v1523_v21  ;;  %v1520_v28 = vmax.f32 %v1505_v23, 0.0 }
 0x435   : > { %v1507_v26 = vpop.f32.mrf.mxu0 }
 0x436   : > { %v1508_v30 = vadd.f32 %v2001_v9, %v1507_v26  ;;  %2223 = vmatmul.mubr.bf16.vlgmr.msra.gmra.mxu1 %v1528_v25  ;;  %v1525_v34 = vadd.f32 %v1520_v28, %v1372_v27 }
 0x437   : > { %v2201_v31 = vpop.f32.mrf.mxu0  ;;  %2226 = vmatprep.mubr.msk.bf16.mxu1 %vm2662_vm11, %v2661_v47 }
 0x438   : > { %v1521_v32 = vmax.f32 %v1508_v30, 0.0 }
 0x439   : > { %v1512_v33 = vpop.f32.mrf.mxu0 }
 0x43a   : > { %v1526_v35 = vadd.f32 %v1521_v32, %v1373_v29  ;;  %v1513_v37 = vadd.f32 %v2001_v9, %v1512_v33 }
 0x43b   : > { %v2204_v38 = vpop.f32.mrf.mxu0 }
 0x43c   : > { %v1522_v39 = vmax.f32 %v1513_v37, 0.0  ;;  %v1529_v40 = vpack.c.bf16 %v1526_v35, %v1525_v34 }
 0x43d   : > { %v1515_v41 = vpop.f32.mrf.mxu0 }
 0x43e   : > { %v1527_v42 = vadd.f32 %v1522_v39, %v1374_v36  ;;  %2227 = vmatmul.mubr.bf16.gmra.mxu1 %v1529_v40 }
 0x43f   : > { %v2205_v43 = vpop.f32.mrf.mxu0  ;;  %2230 = vmatprep.mubr.msk.bf16.mxu1 %vm2662_vm11, %v2661_v47 }
 0x440   : > { %v1530_v44 = vpack.c.bf16 %v1527_v42, %v1527_v42 }
 0x446   : > { %2231 = vmatmul.mubr.bf16.gmra.mxu1 %v1530_v44 }
 0x4f6   : > { %v1636_v2 = vpop.f32.mrf.mxu1 }
 0x4f7   : > { %v1637_v48 = vadd.f32 %v2013_v46, %v1636_v2 }
 0x4f8   : > { %v2224_v49 = vpop.f32.mrf.mxu1 }
 0x4f9   : > { %v1661_v50 = vsel %vm1660_vm12, %v1637_v48, -inf }
 0x4fa   : > { %1666 = vmax.xlane.f32.xlu0 %v1661_v50  ;;  %v1639_v51 = vpop.f32.mrf.mxu1 }
 0x4fb   : > { %v1640_v47 = vadd.f32 %v2013_v46, %v1639_v51 }
 0x4fc   : > { %v2225_v52 = vpop.f32.mrf.mxu1 }
 0x4fd   : > { %v1662_v0 = vsel %vm1660_vm12, %v1640_v47, -inf }
 0x4fe   : > { %1668 = vmax.xlane.f32.xlu0 %v1662_v0  ;;  %v1644_v53 = vpop.f32.mrf.mxu1 }
 0x4ff   : > { %v1645_v54 = vadd.f32 %v2013_v46, %v1644_v53 }
 0x500   : > { %v2228_v55 = vpop.f32.mrf.mxu1 }
 0x501   : > { %v1663_v56 = vsel %vm1660_vm12, %v1645_v54, -inf }
 0x502   : > { %1670 = vmax.xlane.f32.xlu1 %v1663_v56  ;;  %v1647_v57 = vpop.f32.mrf.mxu1 }
 0x503   : > { %v1648_v58 = vadd.f32 %v2013_v46, %v1647_v57 }
 0x504   : > { %v2229_v59 = vpop.f32.mrf.mxu1 }
 0x505   : > { %v1664_v60 = vsel %vm1660_vm12, %v1648_v58, -inf }
 0x506   : > { %1672 = vmax.xlane.f32.xlu1 %v1664_v60  ;;  %v1652_v61 = vpop.f32.mrf.mxu1 }
 0x507   : > { %v1653_v62 = vadd.f32 %v2013_v46, %v1652_v61 }
 0x508   : > { %v2232_v63 = vpop.f32.mrf.mxu1 }
 0x509   : > { %v1665_v1 = vsel %vm1660_vm12, %v1653_v62, -inf }
 0x50a   : > { %1674 = vmax.xlane.f32.xlu0 %v1665_v1  ;;  %v1655_v3 = vpop.f32.mrf.mxu1 }
 0x50c   : > { %v2233_v4 = vpop.f32.mrf.mxu1 }
 0x583   : > { %v1667_v5 = vpop.xlane.xlu0 %1666 }
 0x584   : > { %v1676_v6 = vsub.f32 %v1661_v50, %v1667_v5 }
 0x586   : > { %v1681_v7 = vmul.f32 1.442695, %v1676_v6 }
 0x587   : > { %v1669_v8 = vpop.xlane.xlu0 %1668 }
 0x588   : > { %2403 = vpow2.f32 %v1681_v7  ;;  %v1677_v9 = vsub.f32 %v1662_v0, %v1669_v8 }
 0x58a   : > { %v1683_v10 = vmul.f32 1.442695, %v1677_v9 }
 0x58b   : > { %v1671_v11 = vpop.xlane.xlu1 %1670 }
 0x58c   : > { %2405 = vpow2.f32 %v1683_v10  ;;  %v1678_v12 = vsub.f32 %v1663_v56, %v1671_v11 }
 0x58e   : > { %v1685_v13 = vmul.f32 1.442695, %v1678_v12 }
 0x58f   : > { %v1673_v14 = vpop.xlane.xlu1 %1672 }
 0x590   : > { %2407 = vpow2.f32 %v1685_v13  ;;  %v1679_v15 = vsub.f32 %v1664_v60, %v1673_v14 }
 0x592   : > { %v1687_v16 = vmul.f32 1.442695, %v1679_v15 }
 0x593   : > { %v1675_v17 = vpop.xlane.xlu0 %1674 }
 0x594   : > { %2409 = vpow2.f32 %v1687_v16  ;;  %v1680_v18 = vsub.f32 %v1665_v1, %v1675_v17 }
 0x595   : > { %v2404_v19 = vpop.eup %2403 }
 0x596   : > { %v1689_v20 = vmul.f32 1.442695, %v1680_v18  ;;  %v1691_v21 = vsel %vm1660_vm12, %v2404_v19, 0.0 }
 0x597   : > { %1696 = vadd.xlane.f32.xlu1 %v1691_v21 }
 0x598   : > { %2411 = vpow2.f32 %v1689_v20 }
 0x599   : > { %v2406_v22 = vpop.eup %2405 }
 0x59a   : > { %v1692_v23 = vsel %vm1660_vm12, %v2406_v22, 0.0 }
 0x59b   : > { %1698 = vadd.xlane.f32.xlu0 %v1692_v23 }
 0x59d   : > { %v2408_v24 = vpop.eup %2407 }
 0x59e   : > { %v1693_v25 = vsel %vm1660_vm12, %v2408_v24, 0.0 }
 0x59f   : > { %1700 = vadd.xlane.f32.xlu1 %v1693_v25 }
 0x5a1   : > { %v2410_v26 = vpop.eup %2409 }
 0x5a2   : > { %v1694_v27 = vsel %vm1660_vm12, %v2410_v26, 0.0 }
 0x5a3   : > { %1702 = vadd.xlane.f32.xlu0 %v1694_v27 }
 0x5a5   : > { %v2412_v28 = vpop.eup %2411 }
 0x5a6   : > { %v1695_v29 = vsel %vm1660_vm12, %v2412_v28, 0.0 }
 0x5a7   : > { %1704 = vadd.xlane.f32.xlu1 %v1695_v29 }
 0x620   : > { %v1697_v30 = vpop.xlane.xlu1 %1696 }
 0x621   : > { %2413 = vlog2.f32 %v1697_v30 }
 0x624   : > { %v1699_v31 = vpop.xlane.xlu0 %1698 }
 0x625   : > { %2415 = vlog2.f32 %v1699_v31 }
 0x628   : > { %v1701_v32 = vpop.xlane.xlu1 %1700 }
 0x629   : > { %2417 = vlog2.f32 %v1701_v32 }
 0x62c   : > { %v1703_v33 = vpop.xlane.xlu0 %1702 }
 0x62d   : > { %2419 = vlog2.f32 %v1703_v33 }
 0x62e   : > { %v2414_v34 = vpop.eup %2413 }
 0x62f   : > { %v1707_v35 = vmul.f32 0.6931472, %v2414_v34 }
 0x630   : > { %v1705_v36 = vpop.xlane.xlu1 %1704 }
 0x631   : > { %v1716_v37 = vsub.f32 %v1676_v6, %v1707_v35  ;;  %2421 = vlog2.f32 %v1705_v36 }
 0x632   : > { %v2416_v38 = vpop.eup %2415 }
 0x633   : > { %v1721_v39 = vsel %vm1660_vm12, %v1716_v37, 0.0  ;;  %v1709_v40 = vmul.f32 0.6931472, %v2416_v38 }
 0x634   : > { %1726 = vst [vmem:[#allocation13] sm:$0xff] %v1721_v39 }
 0x635   : > { %v1717_v41 = vsub.f32 %v1677_v9, %v1709_v40 }
 0x636   : > { %v2418_v42 = vpop.eup %2417 }
 0x637   : > { %v1722_v43 = vsel %vm1660_vm12, %v1717_v41, 0.0  ;;  %v1711_v44 = vmul.f32 0.6931472, %v2418_v42 }
 0x638   : > { %1727 = vst [vmem:[#allocation13 + $0x8] sm:$0xff] %v1722_v43 }
 0x639   : > { %v1718_v46 = vsub.f32 %v1678_v12, %v1711_v44 }
 0x63a   : > { %v2420_v2 = vpop.eup %2419 }
 0x63b   : > { %v1723_v48 = vsel %vm1660_vm12, %v1718_v46, 0.0  ;;  %v1713_v49 = vmul.f32 0.6931472, %v2420_v2 }
 0x63c   : > { %1728 = vst [vmem:[#allocation13 + $0x10] sm:$0xff] %v1723_v48 }
 0x63d   : > { %v1719_v50 = vsub.f32 %v1679_v15, %v1713_v49 }
 0x63e   : > { %v2422_v51 = vpop.eup %2421 }
 0x63f   : > { %v1724_v47 = vsel %vm1660_vm12, %v1719_v50, 0.0  ;;  %v1715_v52 = vmul.f32 0.6931472, %v2422_v51 }
 0x640   : > { %1729 = vst [vmem:[#allocation13 + $0x18] sm:$0xff] %v1724_v47 }
 0x641   : > { %v1720_v0 = vsub.f32 %v1680_v18, %v1715_v52 }
 0x643   : > { %v1725_v53 = vsel %vm1660_vm12, %v1720_v0, 0.0 }
 0x644   : > { %1730 = vst [vmem:[#allocation13 + $0x20] sm:$0xff] %v1725_v53 }
 0x645 PF: > { %p2280_p9 = scmp.eq.s32.totalorder %s2755_s23, 2  ;;  %s2663_s20 = smov [#allocation13]  }
 0x646   : > { %s1742_s29 = sshll.u32 %s2663_s20, 4  ;;  %s1743_s29 = int_to_ptr.vmem [resolvable:$true] %s1742_s29 }
 0x647   : > { %s2557_s11 = scalar_lea.vmem %s1743_s29, 640  ;;  %p2564_p6 = scmp.lt.s32.totalorder %s1743_s29, %s1743_s29 }
 0x648   : > { %p2558_p4 = scmp.ne.s32.totalorder %s1743_s29, %s2557_s11  ;;  %p2565_p13 = scmp.lt.s32.totalorder %s2557_s11, %s2557_s11 }
 0x64a   : > { %p2559_p8 = pnand %p2558_p4, %p2280_p9  ;;  %p2566_p10 = por %p2565_p13, %p2564_p6 }
 0x64c   : > { %p2560_p12 = pneg %p2559_p8 }
 0x64e   : > { %p2567_p1 = pnand %p2566_p10, %p2560_p12 }
 0x650   : > { %2570 = shalt.err (!%p2567_p1)
}
 0x651   : > { %s2664_s4 = smov 128   ;;  %s2665_s8 = smov 8  }
 0x652   : > { %s3203_s26 = sld [smem:[#allocation27_spill]] }
 0x658   : > { %2253 = dma.vmem_to_hbm [thread:$0]  (%p2280_p9), %s1743_s29, 640, %s3203_s26, [#allocation7], %s2664_s4, %s2664_s4, %s2665_s8  }
 0x659   : > { %2622 = dma.done.wait (%p2280_p9), [#allocation7], 640  }
 0x65a   : > { %2624 = vsyncadd (%p2280_p9), [#allocation7], 4294966656 }
 0x65b PF: > { %s3204_s27 = sld [smem:[#allocation20_spill]]  ;;  %s3207_s17 = smov %s2631_s18 }
 0x65c   : > { %s3205_s20 = sld [smem:[#allocation19_spill]]  ;;  %s3208_s18 = smov %s2635_s19 }
 0x65d   : > { %s3206_s21 = sld [smem:[#allocation21_spill]]  ;;  %s3209_s19 = smov %s2850_s24 }
 0x661   : > { %s24_s22 = sadd.s32 1, %s3204_s27  }
 0x662   : > { %p21_p3 = scmp.ge.s32.totalorder %s24_s22, 5  }
 0x664   :  { %23 = sbr.rel (!%p21_p3) target bundleno = 12 (0xc), region = 156 }
 0x669   :  { %1758 = vsyncpa [#allocation6], 1 }
 0x66a   :  { %1760 = vsyncpa [#allocation6 + $0x1], 1 }
 0x66b   :  { %1761 = vsyncpa [#allocation9], 1 }
 0x66c   :  { %1762 = vsyncpa [#allocation7], 1 }
 0x66d   :  { %1764 = vsyncpa [#allocation7 + $0x1], 1 }

// kernel: tpu_custom_call.1
= control target key start
LH: loop header
LB: loop body
LE: loop exit
PB: predicated region body
PF: predicated region fallthrough
CT: control target
= control target key end

     0   :  { %s3229_s0 = inlined_call_operand.vmem [shape: f32[40,16], index: 0, kind: input, shape index: {}]   ;;  %s3230_s1 = inlined_call_operand.hbm [shape: bf16[40,40], index: 1, kind: input, shape index: {}]   ;;  %s3231_s2 = inlined_call_operand.hbm [shape: bf16[16,128], index: 2, kind: input, shape index: {}]   ;;  %s3232_s3 = inlined_call_operand.vmem [shape: f32[1,128], index: 3, kind: input, shape index: {}]   ;;  %s3233_s4 = inlined_call_operand.hbm [shape: bf16[2,256,128], index: 4, kind: input, shape index: {}]   ;;  %s3234_s5 = inlined_call_operand.hbm [shape: bf16[2,128,128], index: 5, kind: input, shape index: {}]   ;;  %s3235_s6 = inlined_call_operand.vmem [shape: f32[2,1,128], index: 6, kind: input, shape index: {}]   ;;  %s3236_s7 = inlined_call_operand.vmem [shape: bf16[128,128], index: 7, kind: input, shape index: {}]   ;;  %s3237_s8 = inlined_call_operand.vmem [shape: f32[1,128], index: 8, kind: input, shape index: {}]   ;;  %s3238_s9 = inlined_call_operand.hbm [shape: bf16[128,128], index: 9, kind: input, shape index: {}]   ;;  %s3239_s10 = inlined_call_operand.vmem [shape: f32[1,128], index: 10, kind: input, shape index: {}]   ;;  %s3240_s11 = inlined_call_operand.hbm [shape: f32[40,128], index: 11, kind: output, shape index: {}]  }
   0x1   :  { %3251 = sst [smem:[#allocation23_spill]] %s3230_s1 }
   0x2   :  { %3252 = sst [smem:[#allocation24_spill]] %s3231_s2 }
   0x3   :  { %3253 = sst [smem:[#allocation25_spill]] %s3233_s4 }
   0x4   :  { %3254 = sst [smem:[#allocation26_spill]] %s3239_s10 }
   0x5   :  { %3255 = sst [smem:[#allocation27_spill]] %s3240_s11 }
   0x6   :  { %16 = vsyncpa [#allocation6], 0 }
   0x7   :  { %18 = vsyncpa [#allocation6 + $0x1], 0 }
   0x8   :  { %19 = vsyncpa [#allocation9], 0 }
   0x9   :  { %20 = vsyncpa [#allocation7], 0 }
   0xa   :  { %22 = vsyncpa [#allocation7 + $0x1], 0  ;;  %s2787_s17 = smov 0   ;;  %s2789_s18 = smov 0  }
   0xb   :  { %s2791_s19 = smov 0   ;;  %s2793_s20 = smov 0  }
   0xc   :  { %s2795_s21 = smov 0   ;;  %s2797_s22 = smov 0  }
   0xd LB: > { %3256 = sst [smem:[#allocation19_spill]] %s2704_s21  ;;  %p163_p0 = scmp.eq.s32.totalorder %s2708_s22, 0  ;;  %s2708_s22 = sphi %s2797_s22, %s28_s22   ;;  %s2704_s21 = sphi %s2795_s21, %s3285_s21   ;;  %s2700_s20 = sphi %s2793_s20, %s3284_s20   ;;  %s2696_s19 = sphi %s2791_s19, %s3288_s19   ;;  %s2692_s18 = sphi %s2789_s18, %s3287_s18   ;;  %s2688_s17 = sphi %s2787_s17, %s3286_s17  }
   0xe   : > { %3257 = sst [smem:[#allocation20_spill]] %s2708_s22  ;;  %p2335_p1 = scmp.lt.s32.totalorder %s2708_s22, 3 }
   0xf   : > { %s421_s24 = sand.u32 1, %s2708_s22   ;;  %s2710_s25 = smov [#allocation5]  }
  0x10   : > { %s434_s26 = sshll.u32 %s2710_s25, 4  ;;  %p2825_p2 = pnand %p2335_p1, %p163_p0  ;;  %s435_s26 = int_to_ptr.vmem [resolvable:$true] %s434_s26 }
  0x11   : > { %s2829_s28 = scalar_lea.sflag [#allocation6], %s421_s24  ;;  %s2495_s29 = scalar_lea.vmem %s435_s26, 320 }
  0x12   : > { %p2486_p3 = pneg %p2825_p2  ;;  %p2496_p4 = scmp.ne.s32.totalorder %s435_s26, %s2495_s29 }
  0x13   : > { %s2502_s30 = scalar_lea.vmem %s435_s26, 640  ;;  %p2503_p7 = scmp.lt.s32.totalorder %s435_s26, %s435_s26 }
  0x14   : > { %p2498_p5 = pnand %p2496_p4, %p2486_p3  ;;  %p2504_p8 = scmp.lt.s32.totalorder %s2502_s30, %s2495_s29 }
  0x16   : > { %p2499_p6 = pneg %p2498_p5  ;;  %p2505_p9 = por %p2504_p8, %p2503_p7 }
  0x18   : > { %p2506_p10 = pnand %p2505_p9, %p2499_p6 }
  0x1a   : > { %2509 = shalt.err (!%p2506_p10)
}
  0x1b   : > { %s3244_s12 = smov 64   ;;  %s3246_s13 = smov 4  }
  0x1c   : > { %s3259_s1 = sld [smem:[#allocation23_spill]]  ;;  %s2843_s16 = sadd.s32 4294967295, %s2708_s22  }
  0x1d   : > { %p162_p11 = scmp.ne.s32.totalorder %s2696_s19, %s2692_s18  ;;  %p168_p12 = scmp.ne.s32.totalorder %s2692_s18, %s2688_s17 }
  0x1e   : > { %p3250_p13 = scmp.eq.s32.totalorder %s2843_s16, 0  ;;  %p1950_p3 = scmp.ge.s32.totalorder %s2708_s22, 1 }
  0x1f   : > { %p164_p4 = por %p163_p0, %p162_p11  ;;  %p357_p5 = scmp.lt.s32.totalorder %s2708_s22, 4 }
  0x20   : > { %p2857_p6 = por %p3250_p13, %p168_p12  ;;  %s2713_s27 = smov [#allocation8]  }
  0x21   : > { %s369_s29 = sshll.u32 %s2713_s27, 4  ;;  %p2867_p7 = pnand %p2335_p1, %p164_p4  ;;  %s370_s29 = int_to_ptr.vmem [resolvable:$true] %s369_s29 }
  0x22   : > { %2322 = dma.hbm_to_vmem [thread:$0]  (!%p2825_p2), %s3259_s1, 320, %s435_s26, %s2829_s28, %s3244_s12, %s3244_s12, %s3246_s13  }
  0x23   : > { %p2861_p2 = pnand %p1950_p3, %p357_p5  ;;  %s40_s14 = sadd.s32 1, %s2704_s21 }
  0x24   : > { %s1944_s15 = sadd.s32 4294967295, %s2704_s21  ;;  %p42_p9 = scmp.ge.s32.totalorder %s40_s14, 3 }
  0x25   : > { %p2312_p0 = pneg %p2861_p2  ;;  %s2521_s27 = scalar_lea.vmem %s370_s29, 128 }
  0x26   : > { %p2522_p1 = scmp.ne.s32.totalorder %s370_s29, %s2521_s27  ;;  %p2529_p3 = scmp.lt.s32.totalorder %s370_s29, %s370_s29 }
  0x27   : > { %p2875_p8 = pnand %p2312_p0, %p3250_p13  ;;  %p2530_p4 = scmp.lt.s32.totalorder %s2521_s27, %s2521_s27 }
  0x29   : > { %p2512_p10 = pneg %p2875_p8  ;;  %p2531_p5 = por %p2530_p4, %p2529_p3 }
  0x2b   : > { %p2524_p11 = pnand %p2522_p1, %p2512_p10 }
  0x2d   : > { %p2525_p12 = pneg %p2524_p11 }
  0x2f   : > { %p2532_p0 = pnand %p2531_p5, %p2525_p12 }
  0x31   : > { %2535 = shalt.err (!%p2532_p0)
}
  0x32   : > { %s3264_s2 = sld [smem:[#allocation24_spill]]  ;;  %s3290_s14 = smov (%p42_p9, %s40_s14), 0 }
  0x33   : > { %3265 = sst [smem:[#allocation21_spill]] %s3290_s14  ;;  %p147_p1 = scmp.gt.s32.totalorder %s1944_s15, 0 }
  0x34   : > { %s3249_s27 = sand.u32 1, %s2696_s19   ;;  %s1945_s1 = sadd.s32 4294967295, %s3290_s14 }
  0x35   : > { %s1956_s21 = sshll.u32 %s3249_s27, 7  ;;  %s3292_s15 = smov (!%p147_p1, %s1944_s15), 0 }
  0x36   : > { %p150_p11 = scmp.gt.s32.totalorder %s1945_s1, 0  ;;  %s2082_s22 = sshll.u32 %s3292_s15, 11 }
  0x37   : > { %s448_s23 = scalar_lea.vmem [#allocation10], %s1956_s21  ;;  %s3266_s4 = sld [smem:[#allocation25_spill]] }
  0x38   : > { %2315 = dma.hbm_to_vmem [thread:$0]  (!%p2875_p8), %s3264_s2, 128, %s370_s29, [#allocation9], %s3244_s12, %s3244_s12, %s3246_s13  }
  0x39   : > { %s458_s24 = sshll.u32 %s448_s23, 4  ;;  %s3294_s1 = smov (!%p150_p11, %s1945_s1), 0  ;;  %s459_s24 = int_to_ptr.vmem [resolvable:$true] %s458_s24 }
  0x3a   : > { %s152_s2 = ssub.s32 %s3292_s15, %s3294_s1  ;;  %s2714_s27 = smov [#allocation12]  }
  0x3b   : > { %p2907_p9 = scmp.eq.s32.totalorder %s152_s2, 0  ;;  %s391_s11 = sshll.u32 %s2714_s27, 4  ;;  %s392_s11 = int_to_ptr.vmem [resolvable:$true] %s391_s11 }
  0x3c   : > { %p2538_p12 = pneg %p2867_p7  ;;  %s2549_s10 = scalar_lea.vmem %s459_s24, 2048 }
  0x3d   : > { %s457_s13 = scalar_lea.hbm %s3266_s4, %s2082_s22  ;;  %p2550_p3 = scmp.ne.s32.totalorder %s459_s24, %s2549_s10 }
  0x3e   : > { %s2715_s21 = smov [#allocation10]  }
  0x3f   : > { %p2552_p4 = pnand %p2550_p3, %p2538_p12  ;;  %s2554_s23 = sshll.u32 %s2715_s21, 4  ;;  %s2555_s23 = int_to_ptr.vmem [resolvable:$false] %s2554_s23 }
  0x40   : > { %s2556_s22 = scalar_lea.vmem %s2555_s23, 4096  ;;  %p2557_p0 = scmp.lt.s32.totalorder %s459_s24, %s2555_s23 }
  0x41   : > { %p2553_p5 = pneg %p2552_p4  ;;  %p2558_p1 = scmp.lt.s32.totalorder %s2556_s22, %s2549_s10 }
  0x43   : > { %p2559_p11 = por %p2558_p1, %p2557_p0 }
  0x45   : > { %p2560_p13 = pnand %p2559_p11, %p2553_p5 }
  0x47   : > { %2563 = shalt.err (!%p2560_p13)
}
  0x48   : > { %s3268_s1 = smov 4   ;;  %s3269_s2 = smov 64  }
  0x49   : > { %2325 = dma.hbm_to_vmem [thread:$0]  (!%p2867_p7), %s457_s13, 2048, %s459_s24, %s2829_s28, %s3269_s2, %s3269_s2, %s3268_s1  }
  0x4a   : > { %s3270_s12 = sadd.s32 1, %s2696_s19  ;;  %s3272_s10 = sand.u32 1, %s2696_s19  }
  0x4b   : > { %s2927_s27 = scalar_select %p2907_p9, %s2696_s19, %s3270_s12  }
  0x4c   : > { %s1960_s29 = sshll.u32 %s3272_s10, 6  ;;  %s2575_s21 = scalar_lea.vmem %s392_s11, 1024 }
  0x4d   : > { %3271 = sst [smem:[#allocation22_spill]] %s2927_s27  ;;  %p2576_p13 = scmp.ne.s32.totalorder %s392_s11, %s2575_s21 }
  0x4e   : > { %p2583_p5 = scmp.lt.s32.totalorder %s392_s11, %s392_s11  ;;  %p2584_p0 = scmp.lt.s32.totalorder %s2575_s21, %s2575_s21 }
  0x4f   : > { %p2578_p3 = pnand %p2576_p13, %p2512_p10 }
  0x50   : > { %p2585_p1 = por %p2584_p0, %p2583_p5 }
  0x51   : > { %p2579_p4 = pneg %p2578_p3 }
  0x53   : > { %p2586_p11 = pnand %p2585_p1, %p2579_p4 }
  0x55   : > { %2589 = shalt.err (!%p2586_p11)
}
  0x56   : > { %2318 = dma.hbm_to_vmem [thread:$0]  (!%p2875_p8), %s3238_s9, 1024, %s392_s11, [#allocation9], %s3269_s2, %s3269_s2, %s3268_s1  }
  0x57   : > { %s2083_s24 = sshll.u32 %s3292_s15, 10  ;;  %s472_s10 = scalar_lea.vmem [#allocation11], %s1960_s29 }
  0x58   : > { %s481_s12 = scalar_lea.hbm %s3234_s5, %s2083_s24  ;;  %s482_s21 = sshll.u32 %s472_s10, 4  ;;  %s483_s21 = int_to_ptr.vmem [resolvable:$true] %s482_s21 }
  0x59   : > { %s2603_s4 = scalar_lea.vmem %s483_s21, 1024  ;;  %s2716_s30 = smov [#allocation11]  }
  0x5a   : > { %p2604_p10 = scmp.ne.s32.totalorder %s483_s21, %s2603_s4  ;;  %s2608_s27 = sshll.u32 %s2716_s30, 4  ;;  %s2609_s27 = int_to_ptr.vmem [resolvable:$false] %s2608_s27 }
  0x5b   : > { %s2610_s13 = scalar_lea.vmem %s2609_s27, 2048  ;;  %p2611_p3 = scmp.lt.s32.totalorder %s483_s21, %s2609_s27 }
  0x5c   : > { %p2606_p9 = pnand %p2604_p10, %p2538_p12  ;;  %p2612_p8 = scmp.lt.s32.totalorder %s2610_s13, %s2603_s4 }
  0x5e   : > { %p2607_p13 = pneg %p2606_p9  ;;  %p2613_p4 = por %p2612_p8, %p2611_p3 }
  0x60   : > { %p2614_p5 = pnand %p2613_p4, %p2607_p13 }
  0x62   : > { %2617 = shalt.err (!%p2614_p5)
}
  0x63   : > { %2328 = dma.hbm_to_vmem [thread:$0]  (!%p2867_p7), %s481_s12, 1024, %s483_s21, %s2829_s28, %s3269_s2, %s3269_s2, %s3268_s1  }
  0x64   : > { %506 = sbr.rel (%p2861_p2) target bundleno = 1630 (0x65e), region = 64  ;;  %s508_s11 = sand.u32 (!%p2861_p2), 1, %s2843_s16  }
  0x65   : > { %s509_s15 = scalar_lea.sflag (!%p2861_p2), [#allocation6], %s508_s11  ;;  %p3273_p12 = scmp.eq.s32.totalorder (!%p2861_p2), %s2843_s16, 0 }
  0x69   : > { %2667 = dma.done.wait (%p3273_p12), %s509_s15, 320   ;;  %p3274_p0 = pmov %p3273_p12 }
  0x6b   : > { %2669 = vsyncadd (%p3274_p0), %s509_s15, 4294966976  ;;  %p3275_p1 = pmov %p3274_p0 }
  0x6c   : > { %p3276_p11 = pmov %p3274_p0 }
  0x6d   : > { %2671 = dma.done.wait (%p3275_p1), [#allocation9], 128  }
  0x6e   : > { %2673 = vsyncadd (%p3276_p11), [#allocation9], 4294967168  ;;  %s523_s4 = sand.u32 1, %s2692_s18  }
  0x6f   : > { %s1967_s28 = sshll.u32 %s523_s4, 7 }
  0x70   : > { %s2967_s26 = scalar_lea.vmem [#allocation10], %s1967_s28 }
  0x71   : > { %2675 = dma.done.wait (%p2857_p6), %s509_s15, 3072  }
  0x72   : > { %2677 = vsyncadd (%p2857_p6), %s509_s15, 4294964224  ;;  %s1968_s17 = sshll.u32 %s523_s4, 6  ;;  %p3277_p2 = pmov %p3274_p0 }
  0x73   : > { %s2973_s1 = scalar_lea.vmem [#allocation11], %s1968_s17 }
  0x74   : > { %2679 = dma.done.wait (%p3277_p2), [#allocation9], 1024   ;;  %p3278_p7 = pmov %p3274_p0 }
  0x75   : > { %s2980_s2 = sadd.s32 4294967295, %s2700_s20  ;;  %v647_v0 = vlaneseq  ;;  %s634_s25 = ssub.s32 0, %s2700_s20 }
  0x76   : > { %2681 = vsyncadd (%p3278_p7), [#allocation9], 4294966272  ;;  %p620_p6 = scmp.gt.s32.totalorder %s2980_s2, 0  ;;  %p1971_p10 = scmp.lt.s32.totalorder %s2980_s2, 1 }
  0x77   : > { %v648_v1 = vshrl.u32 %v647_v0, 7  ;;  %p664_p9 = scmp.eq.s32.totalorder %s2700_s20, 0  ;;  %p633_p13 = scmp.lt.s32.totalorder %s2700_s20, 0 }
  0x78   : > { %s621_s27 = scalar_select %p620_p6, %s2980_s2, 0  ;;  %v2717_v3 = vmov (%p664_p9), 0.0  }
  0x79   : > { %s1976_s29 = smin.u32 %s2700_s20, %s634_s25  ;;  %v2990_v2 = vadd.s32 32, %v648_v1  ;;  %670 = vst [vmem:[#allocation3] sm:$0x1] (%p664_p9), %v2717_v3 }
  0x7a   : > { %s3296_s27 = smov (!%p1971_p10, %s621_s27), 1  ;;  %s636_s14 = sand.u32 1, %s1976_s29  }
  0x7b   : > { %vm663_vm0 = vcmp.lt.s32.totalorder %v2990_v2, 37  ;;  %s624_s22 = scalar_lea.vmem %s3235_s6, %s3296_s27  ;;  %s637_s12 = ssub.s32 0, %s636_s14 }
  0x7c   : > { %s3298_s12 = smov (!%p633_p13, %s637_s12), %s636_s14  ;;  %669 = sbr.rel (!%p664_p9) target bundleno = 129 (0x81), region = 88 }
  0x7d   : > { %p1978_p3 = scmp.lt.s32.totalorder %s3298_s12, 0  ;;  %s643_s10 = sadd.s32 2, %s3298_s12 }
  0x7f   : > { %s3300_s10 = smov (!%p1978_p3, %s643_s10), %s3298_s12 }
  0x80   : > { %s2999_s21 = smul.u32 40, %s3300_s10 }
  0x81 PF: > { %p1980_p8 = scmp.ne.s32.totalorder %s2700_s20, 0 }
  0x82   : > { %s794_s12 = sshra.s32 (!%p1980_p8), %s2999_s21, 3 }
  0x83   : > { %673 = sbr.rel (%p1980_p8) target bundleno = 365 (0x16d), region = 92  ;;  %s2092_s10 = sshll.u32 (!%p1980_p8), %s794_s12, 3 }
  0x84   : > { %s798_s30 = scalar_lea.vmem (!%p1980_p8), [#allocation2], %s2092_s10 }
  0x88   : > { %v2406_v4 = vld [vmem:[#allocation8] sm:$0xff]   ;;  %v2718_v5 = vmov 0.0   ;;  %v675_v7 = vld [vmem:[%s3229_s0 + $0x8] sm:$0xff]  ;;  %v676_v8 = vld [vmem:[%s3229_s0 + $0x10] sm:$0xff]  ;;  %vm697_vm1 = vcmask 130048   ;;  %vm2719_vm2 = vmmov 0  }
  0x89   : > { %2182 = vmatprep.subr.bf16.mxu0 %v2718_v5  ;;  %2290 = vmatprep.subr.bf16.mxu1 %v2718_v5  ;;  %v674_v6 = vld [vmem:[%s3229_s0] sm:$0xff]  ;;  %v677_v10 = vld [vmem:[%s3229_s0 + $0x18] sm:$0xff]  ;;  %v804_v52 = vld [vmem:[#allocation3] sm:$0x1] }
  0x8a   : > { %2183 = vmatpush3.bf16.msra.mxu0 %v2406_v4  ;;  %2291 = vmatpush3.bf16.msra.mxu1 %v2406_v4  ;;  %v679_v9 = vpack.c.bf16 %v675_v7, %v674_v6  ;;  %v680_v11 = vpack.c.bf16 %v677_v10, %v676_v8  ;;  %v678_v12 = vld [vmem:[%s3229_s0 + $0x20] sm:$0xff] }
  0x8b   : > { %2184 = vmatprep.mubr.msk.bf16.mxu0 %vm2719_vm2, %v2718_v5  ;;  %2188 = vmatprep.mubr.msk.bf16.mxu1 %vm2719_vm2, %v2718_v5  ;;  %v681_v13 = vpack.c.bf16 %v678_v12, %v678_v12  ;;  %v1981_v14 = vld [vmem:[%s3232_s3] ss:$0 sm:$0xff] }
  0x8d   : > { %2185 = vmatmul.mubr.msk.bf16.vlgmr.msra.gmra.mxu0 %vm697_vm1, %v679_v9  ;;  %2189 = vmatmul.mubr.msk.bf16.vlgmr.msra.gmra.mxu1 %vm697_vm1, %v680_v11 }
  0x8e   : > { %2192 = vmatprep.mubr.msk.bf16.mxu1 %vm2719_vm2, %v2718_v5 }
  0x95   : > { %2193 = vmatmul.mubr.msk.bf16.gmra.mxu1 %vm697_vm1, %v681_v13 }
 0x14d   : > { %v741_v15 = vpop.f32.mrf.mxu0  ;;  %v749_v16 = vpop.f32.mrf.mxu1 }
 0x14e   : > { %v742_v17 = vadd.f32 %v1981_v14, %v741_v15  ;;  %v750_v18 = vadd.f32 %v1981_v14, %v749_v16 }
 0x14f   : > { %v2186_v19 = vpop.f32.mrf.mxu0  ;;  %v2190_v20 = vpop.f32.mrf.mxu1 }
 0x150   : > { %v763_v21 = vmax.f32 %v742_v17, 0.0  ;;  %v765_v22 = vmax.f32 %v750_v18, 0.0 }
 0x151   : > { %v744_v23 = vpop.f32.mrf.mxu0  ;;  %v752_v24 = vpop.f32.mrf.mxu1 }
 0x152   : > { %v2087_v25 = vpack.c.bf16 %v763_v21, %v763_v21  ;;  %v2089_v26 = vpack.c.bf16 %v765_v22, %v765_v22  ;;  %v745_v27 = vadd.f32 %v1981_v14, %v744_v23  ;;  %v753_v28 = vadd.f32 %v1981_v14, %v752_v24 }
 0x153   : > { %v2187_v29 = vpop.f32.mrf.mxu0  ;;  %v2191_v30 = vpop.f32.mrf.mxu1 }
 0x154   : > { %799 = vst [vmem:[%s798_s30] sm:$0xf] %v2087_v25  ;;  %801 = vst [vmem:[%s798_s30 + $0x10] sm:$0xf] %v2089_v26  ;;  %v764_v31 = vmax.f32 %v745_v27, 0.0  ;;  %v766_v32 = vmax.f32 %v753_v28, 0.0 }
 0x155   : > { %v757_v33 = vpop.f32.mrf.mxu1 }
 0x156   : > { %v2088_v34 = vpack.c.bf16 %v764_v31, %v764_v31  ;;  %v805_v35 = vadd.f32 %v764_v31, %v763_v21  ;;  %v2090_v36 = vpack.c.bf16 %v766_v32, %v766_v32  ;;  %v758_v37 = vadd.f32 %v1981_v14, %v757_v33 }
 0x157   : > { %v2194_v38 = vpop.f32.mrf.mxu1 }
 0x158   : > { %800 = vst [vmem:[%s798_s30 + $0x8] sm:$0xf] %v2088_v34  ;;  %802 = vst [vmem:[%s798_s30 + $0x18] sm:$0xf] %v2090_v36  ;;  %v806_v39 = vadd.f32 %v805_v35, %v765_v22  ;;  %v767_v40 = vmax.f32 %v758_v37, 0.0 }
 0x159   : > { %v760_v41 = vpop.f32.mrf.mxu1 }
 0x15a   : > { %v807_v42 = vadd.f32 %v806_v39, %v766_v32  ;;  %v772_v43 = vsel %vm663_vm0, %v767_v40, 0.0 }
 0x15b   : > { %v2091_v44 = vpack.c.bf16 %v772_v43, %v772_v43  ;;  %v2195_v45 = vpop.f32.mrf.mxu1 }
 0x15c   : > { %v808_v46 = vadd.f32 %v807_v42, %v772_v43 }
 0x15d   : > { %803 = vst [vmem:[%s798_s30 + $0x20] sm:$0xf] %v2091_v44 }
 0x15e   : > { %v809_v47 = vrot.slane %v808_v46, 4 }
 0x160   : > { %v810_v48 = vadd.f32 %v809_v47, %v808_v46 }
 0x162   : > { %v811_v49 = vrot.slane %v810_v48, 2 }
 0x164   : > { %v812_v50 = vadd.f32 %v811_v49, %v810_v48 }
 0x166   : > { %v813_v51 = vrot.slane %v812_v50, 1 }
 0x168   : > { %v814_v53 = vadd.f32 %v813_v51, %v812_v50 }
 0x16a   : > { %v815_v54 = vadd.f32 %v814_v53, %v804_v52 }
 0x16c   : > { %816 = vst [vmem:[#allocation3] sm:$0x1] %v815_v54 }
 0x16d PF: > { %p1993_p4 = scmp.le.s32.totalorder %s2700_s20, 0 }
 0x16e   : > { %p822_p5 = scmp.lt.s32.totalorder (!%p1993_p4), %s2980_s2, 0  ;;  %s823_s13 = ssub.s32 (!%p1993_p4), 0, %s2980_s2 }
 0x16f   : > { %820 = sbr.rel (%p1993_p4) target bundleno = 838 (0x346), region = 96  ;;  %s1995_s11 = smin.u32 (!%p1993_p4), %s2980_s2, %s823_s13 }
 0x170   : > { %s825_s15 = sand.u32 (!%p1993_p4), 1, %s1995_s11   ;;  %s1357_s14 = sshra.s32 (!%p1993_p4), %s2999_s21, 3 }
 0x171   : > { %s826_s4 = ssub.s32 (!%p1993_p4), 0, %s825_s15  ;;  %s2105_s24 = sshll.u32 (!%p1993_p4), %s1357_s14, 3 }
 0x172   : > { %s3097_s27 = scalar_lea.vmem (!%p1993_p4), [#allocation2], %s2105_s24 }
 0x174   : > { %v2720_v55 = vmov 0.0   ;;  %vm2721_vm3 = vmmov 0   ;;  %v2413_v56 = vld [vmem:[%s2973_s1 + $0x38] sm:$0xff]   ;;  %v2414_v57 = vld [vmem:[%s2973_s1 + $0x30] sm:$0xff]   ;;  %s3302_s4 = smov (!%p822_p5, %s826_s4), %s825_s15  ;;  %v2417_v58 = vld [vmem:[%s2973_s1 + $0x28] sm:$0xff]   ;;  %vm1002_vm4 = vcmask 1043456  }
 0x175   : > { %2216 = vmatprep.subr.bf16.mxu1 %v2720_v55  ;;  %2222 = vmatprep.mubr.msk.bf16.mxu1 %vm2721_vm3, %v2720_v55  ;;  %p1997_p12 = scmp.lt.s32.totalorder %s3302_s4, 0  ;;  %s832_s2 = sadd.s32 2, %s3302_s4  ;;  %v2420_v59 = vld [vmem:[%s2973_s1 + $0x20] sm:$0xff]   ;;  %v2423_v61 = vld [vmem:[%s2973_s1 + $0x18] sm:$0xff]   ;;  %v2410_v4 = vld [vmem:[#allocation5] sm:$0xff]   ;;  %vm992_vm5 = vcmask 326656  }
 0x176   : > { %2196 = vmatprep.subr.bf16.mxu0 %v2720_v55  ;;  %2212 = vmatprep.mubr.msk.bf16.mxu0 %vm2721_vm3, %v2720_v55  ;;  %v2415_v3 = vld [vmem:[%s2967_s26 + $0x78] sm:$0xff]   ;;  %v2418_v6 = vld [vmem:[%s2967_s26 + $0x70] sm:$0xff]   ;;  %v2421_v8 = vld [vmem:[%s2967_s26 + $0x68] sm:$0xff]  }
 0x177   : > { %2197 = vmatpush3.bf16.msra.mxu0 %v2413_v56  ;;  %s3304_s2 = smov (!%p1997_p12, %s832_s2), %s3302_s4  ;;  %v2416_v5 = vld [vmem:[%s2967_s26 + $0x38] sm:$0xff]   ;;  %v2419_v7 = vld [vmem:[%s2967_s26 + $0x30] sm:$0xff]   ;;  %v2422_v10 = vld [vmem:[%s2967_s26 + $0x28] sm:$0xff]  }
 0x178   : > { %2198 = vmatprep.subr.bf16.mxu0 %v2720_v55  ;;  %s834_s28 = smul.u32 40, %s3304_s2  ;;  %v2411_v9 = vld [vmem:[#allocation5 + $0x8] sm:$0xff]   ;;  %v2424_v11 = vld [vmem:[%s2967_s26 + $0x60] sm:$0xff]   ;;  %v2426_v14 = vld [vmem:[%s2973_s1 + $0x10] sm:$0xff]  }
 0x179   : > { %v2425_v12 = vld [vmem:[%s2967_s26 + $0x20] sm:$0xff]   ;;  %v2427_v15 = vld [vmem:[%s2967_s26 + $0x58] sm:$0xff]   ;;  %v2429_v17 = vld [vmem:[%s2973_s1 + $0x8] sm:$0xff]  }
 0x17a   : > { %s949_s17 = sshra.s32 %s834_s28, 3  ;;  %v2412_v13 = vld [vmem:[#allocation5 + $0x10] ss:$0 sps:$4 sm:$0xff]   ;;  %v2428_v16 = vld [vmem:[%s2967_s26 + $0x18] sm:$0xff]   ;;  %v2430_v18 = vld [vmem:[%s2967_s26 + $0x50] sm:$0xff]  }
 0x17b   : > { %2199 = vmatpush3.bf16.msra.mxu0 %v2414_v57  ;;  %s2093_s25 = sshll.u32 %s949_s17, 3  ;;  %v2431_v19 = vld [vmem:[%s2967_s26 + $0x10] sm:$0xff]   ;;  %v2432_v20 = vld [vmem:[%s2973_s1] sm:$0xff]   ;;  %v839_v21 = vld [vmem:[#allocation3] sm:$0x1] }
 0x17c   : > { %2200 = vmatprep.subr.bf16.mxu0 %v2720_v55  ;;  %s3042_s29 = scalar_lea.vmem [#allocation2], %s2093_s25  ;;  %v2433_v22 = vld [vmem:[%s2967_s26 + $0x48] sm:$0xff]   ;;  %v840_v23 = vmul.f32 0.027027028, %v839_v21  ;;  %948 = vst [vmem:[#allocation3] sm:$0x1] %v2720_v55 }
 0x17d   : > { %v2407_v60 = vld [vmem:[%s3042_s29 + $0x20] ss:$0 sps:$4 sm:$0xff]   ;;  %v2408_v63 = vld [vmem:[%s3042_s29 + $0x10] ss:$8 sps:$4 sm:$0xff]   ;;  %v2435_v26 = vld [vmem:[%s2967_s26 + $0x40] sm:$0xff]  }
 0x17e   : > { %v1004_v62 = vsel %vm1002_vm4, %v2407_v60, 0  ;;  %v2409_v1 = vld [vmem:[%s3042_s29] ss:$8 sps:$4 sm:$0xff]   ;;  %v841_v25 = vpack.c.bf16 %v840_v23, %v840_v23  ;;  %v2442_v48 = vld [vmem:[%s3042_s29 + $0x10] ss:$8 sps:$4 sm:$0xff]  }
 0x17f   : > { %2201 = vmatpush3.bf16.msra.mxu0 %v2417_v58  ;;  %2217 = vmatpush3.bf16.msra.mxu1 %v1004_v62  ;;  %v2434_v24 = vld [vmem:[%s2967_s26 + $0x8] sm:$0xff]   ;;  %v2436_v27 = vld [vmem:[%s2967_s26] sm:$0xff]   ;;  %v858_v52 = vld [vmem:[%s624_s22] sm:$0x1] }
 0x180   : > { %2202 = vmatprep.subr.bf16.mxu0 %v2720_v55  ;;  %2218 = vmatprep.subr.bf16.mxu1 %v2720_v55  ;;  %v2437_v40 = vld [vmem:[%s3042_s29] ss:$8 sps:$4 sm:$0xff]  }
 0x183   : > { %2203 = vmatpush3.bf16.msra.mxu0 %v2420_v59  ;;  %2219 = vmatpush3.bf16.msra.mxu1 %v2408_v63 }
 0x184   : > { %2204 = vmatprep.subr.bf16.mxu0 %v2720_v55  ;;  %2220 = vmatprep.subr.bf16.mxu1 %v2720_v55 }
 0x187   : > { %2205 = vmatpush3.bf16.msra.mxu0 %v2423_v61  ;;  %2221 = vmatpush3.bf16.msra.mxu1 %v2409_v1 }
 0x188   : > { %2206 = vmatprep.subr.bf16.mxu0 %v2720_v55  ;;  %2126 = vmatprep.subr.bf16.mxu1 %v2415_v3 }
 0x18a   : > { %2223 = vmatmul.mubr.msk.bf16.vlgmr.msra.gmra.mxu1 %vm992_vm5, %v2410_v4 }
 0x18b   : > { %2226 = vmatprep.mubr.msk.bf16.mxu1 %vm2721_vm3, %v2720_v55  ;;  %2127 = vmatpush3.bf16.msra.mxu1 %v2416_v5 }
 0x18c   : > { %2128 = vmatprep.subr.bf16.mxu1 %v2418_v6  ;;  %2207 = vmatpush3.bf16.msra.mxu0 %v2426_v14 }
 0x18d   : > { %2208 = vmatprep.subr.bf16.mxu0 %v2720_v55 }
 0x18f   : > { %2129 = vmatpush3.bf16.msra.mxu1 %v2419_v7 }
 0x190   : > { %2130 = vmatprep.subr.bf16.mxu1 %v2421_v8  ;;  %2209 = vmatpush3.bf16.msra.mxu0 %v2429_v17 }
 0x191   : > { %2210 = vmatprep.subr.bf16.mxu0 %v2720_v55 }
 0x192   : > { %2227 = vmatmul.mubr.msk.bf16.gmra.mxu1 %vm992_vm5, %v2411_v9 }
 0x193   : > { %2230 = vmatprep.mubr.msk.bf16.mxu1 %vm2721_vm3, %v2720_v55  ;;  %2131 = vmatpush3.bf16.msra.mxu1 %v2422_v10 }
 0x194   : > { %2132 = vmatprep.subr.bf16.mxu1 %v2424_v11  ;;  %2211 = vmatpush3.bf16.msra.mxu0 %v2432_v20 }
 0x197   : > { %2133 = vmatpush3.bf16.msra.mxu1 %v2425_v12  ;;  %2213 = vmatmul.mubr.bf16.vlgmr.msra.gmra.mxu0 %v841_v25 }
 0x198   : > { %2134 = vmatprep.subr.bf16.mxu1 %v2427_v15 }
 0x19a   : > { %2231 = vmatmul.mubr.msk.bf16.gmra.mxu1 %vm992_vm5, %v2412_v13 }
 0x19b   : > { %2135 = vmatpush3.bf16.msra.mxu1 %v2428_v16 }
 0x19c   : > { %2136 = vmatprep.subr.bf16.mxu1 %v2430_v18 }
 0x19f   : > { %2137 = vmatpush3.bf16.msra.mxu1 %v2431_v19 }
 0x1a0   : > { %2138 = vmatprep.subr.bf16.mxu1 %v2433_v22 }
 0x1a3   : > { %2139 = vmatpush3.bf16.msra.mxu1 %v2434_v24 }
 0x1a4   : > { %2140 = vmatprep.subr.bf16.mxu1 %v2435_v26 }
 0x1a7   : > { %2141 = vmatpush3.bf16.msra.mxu1 %v2436_v27 }
 0x24a   : > { %v1040_v28 = vpop.f32.mrf.mxu1 }
 0x24b   : > { %v2094_v29 = vpack.c.bf16 %v1040_v28, %v1040_v28 }
 0x24c   : > { %v2224_v30 = vpop.f32.mrf.mxu1 }
 0x24d   : > { %1088 = vst [vmem:[%s3042_s29 + $0x4] sm:$0xf] %v2094_v29 }
 0x24e   : > { %v1043_v31 = vpop.f32.mrf.mxu1 }
 0x24f   : > { %v2095_v32 = vpack.c.bf16 %v1043_v31, %v1043_v31 }
 0x250   : > { %v2225_v33 = vpop.f32.mrf.mxu1 }
 0x251   : > { %1089 = vst [vmem:[%s3042_s29 + $0xc] sm:$0xf] %v2095_v32 }
 0x252   : > { %v1048_v34 = vpop.f32.mrf.mxu1 }
 0x253   : > { %v2096_v35 = vpack.c.bf16 %v1048_v34, %v1048_v34 }
 0x254   : > { %v2228_v36 = vpop.f32.mrf.mxu1 }
 0x255   : > { %1090 = vst [vmem:[%s3042_s29 + $0x14] sm:$0xf] %v2096_v35 }
 0x256   : > { %v1051_v37 = vpop.f32.mrf.mxu1 }
 0x257   : > { %v2097_v38 = vpack.c.bf16 %v1051_v37, %v1051_v37  ;;  %v941_v53 = vpop.f32.mrf.mxu0 }
 0x258   : > { %v2229_v39 = vpop.f32.mrf.mxu1  ;;  %v2439_v41 = vld [vmem:[%s3042_s29 + $0x4] ss:$8 sps:$4 sm:$0xff]   ;;  %v942_v54 = vadd.f32 %v941_v53, %v858_v52 }
 0x259   : > { %1091 = vst [vmem:[%s3042_s29 + $0x1c] sm:$0xf] %v2097_v38  ;;  %1292 = vmatprep.mubr.bf16.mxu1 %v2439_v41  ;;  %v2214_v55 = vpop.f32.mrf.mxu0 }
 0x25a   : > { %v1056_v42 = vpop.f32.mrf.mxu1  ;;  %1293 = vmatmul.mubr.bf16.vlgmr.msra.gmra.mxu1 %v2437_v40  ;;  %947 = vst [vmem:[#allocation4] sm:$0x1] %v942_v54 }
 0x25b   : > { %v2098_v43 = vpack.c.bf16 %v1056_v42, %v1056_v42  ;;  %v944_v56 = vpop.f32.mrf.mxu0 }
 0x25c   : > { %v2232_v44 = vpop.f32.mrf.mxu1 }
 0x25d   : > { %1092 = vst [vmem:[%s3042_s29 + $0x24] sm:$0xf] %v2098_v43  ;;  %v2215_v57 = vpop.f32.mrf.mxu0  ;;  %v1367_v44 = vld [vmem:[#allocation3] sm:$0x1] }
 0x25e   : > { %v1059_v45 = vpop.f32.mrf.mxu1 }
 0x260   : > { %v2233_v46 = vpop.f32.mrf.mxu1  ;;  %v2440_v47 = vld [vmem:[%s3042_s29 + $0x14] ss:$8 sps:$4 sm:$0xff]  }
 0x261   : > { %1300 = vmatprep.mubr.bf16.mxu1 %v2440_v47  ;;  %v2024_v59 = vld [vmem:[#allocation4] ss:$0 sm:$0xff] }
 0x262   : > { %1301 = vmatmul.mubr.bf16.gmra.mxu1 %v2442_v48 }
 0x264   : > { %v1097_v49 = vld [vmem:[%s3042_s29 + $0x20] sm:$0xff] }
 0x265   : > { %v2030_v50 = vcombine.high %v1097_v49, %v1097_v49  ;;  %v2029_v51 = vcombine.low %v1097_v49, %v1097_v49 }
 0x267   : > { %1308 = vmatprep.mubr.bf16.mxu1 %v2030_v50 }
 0x26a   : > { %1309 = vmatmul.mubr.bf16.gmra.mxu1 %v2029_v51 }
 0x31a   : > { %v2142_v58 = vpop.f32.mrf.mxu1 }
 0x31c   : > { %v2143_v60 = vpop.f32.mrf.mxu1 }
 0x31d   : > { %v2144_v61 = vadd.f32 %v2143_v60, %v2142_v58 }
 0x31e   : > { %v2145_v62 = vpop.f32.mrf.mxu1 }
 0x31f   : > { %v1295_v63 = vadd.f32 %v2144_v61, %v2024_v59 }
 0x320   : > { %v2146_v1 = vpop.f32.mrf.mxu1 }
 0x321   : > { %vm1316_vm6 = vcmp.gt.f32.partialorder %v1295_v63, 0.0  ;;  %v1321_v3 = vmul.f32 0.1, %v1295_v63  ;;  %v2147_v4 = vadd.f32 %v2146_v1, %v2145_v62 }
 0x322   : > { %v2148_v5 = vpop.f32.mrf.mxu1 }
 0x323   : > { %v1326_v6 = vsel %vm1316_vm6, %v1295_v63, %v1321_v3  ;;  %v1298_v7 = vadd.f32 %v2147_v4, %v2024_v59 }
 0x324   : > { %v2100_v8 = vpack.c.bf16 %v1326_v6, %v1326_v6  ;;  %v2149_v9 = vpop.f32.mrf.mxu1 }
 0x325   : > { %vm1317_vm7 = vcmp.gt.f32.partialorder %v1298_v7, 0.0  ;;  %v1322_v10 = vmul.f32 0.1, %v1298_v7  ;;  %v2150_v11 = vadd.f32 %v2149_v9, %v2148_v5 }
 0x326   : > { %1362 = vst [vmem:[%s3097_s27] sm:$0xf] %v2100_v8  ;;  %v2151_v12 = vpop.f32.mrf.mxu1 }
 0x327   : > { %v1327_v13 = vsel %vm1317_vm7, %v1298_v7, %v1322_v10  ;;  %v1303_v14 = vadd.f32 %v2150_v11, %v2024_v59 }
 0x328   : > { %v2101_v15 = vpack.c.bf16 %v1327_v13, %v1327_v13  ;;  %v2152_v16 = vpop.f32.mrf.mxu1  ;;  %v1368_v27 = vadd.f32 %v1327_v13, %v1326_v6 }
 0x329   : > { %vm1318_vm8 = vcmp.gt.f32.partialorder %v1303_v14, 0.0  ;;  %v1323_v17 = vmul.f32 0.1, %v1303_v14  ;;  %v2153_v18 = vadd.f32 %v2152_v16, %v2151_v12 }
 0x32a   : > { %1363 = vst [vmem:[%s3097_s27 + $0x8] sm:$0xf] %v2101_v15  ;;  %v2154_v19 = vpop.f32.mrf.mxu1 }
 0x32b   : > { %v1328_v20 = vsel %vm1318_vm8, %v1303_v14, %v1323_v17  ;;  %v1306_v21 = vadd.f32 %v2153_v18, %v2024_v59 }
 0x32c   : > { %v2102_v22 = vpack.c.bf16 %v1328_v20, %v1328_v20  ;;  %v2155_v23 = vpop.f32.mrf.mxu1  ;;  %v1369_v32 = vadd.f32 %v1368_v27, %v1328_v20 }
 0x32d   : > { %vm1319_vm9 = vcmp.gt.f32.partialorder %v1306_v21, 0.0  ;;  %v1324_v24 = vmul.f32 0.1, %v1306_v21  ;;  %v2156_v25 = vadd.f32 %v2155_v23, %v2154_v19 }
 0x32e   : > { %1364 = vst [vmem:[%s3097_s27 + $0x10] sm:$0xf] %v2102_v22  ;;  %v2157_v26 = vpop.f32.mrf.mxu1 }
 0x32f   : > { %v1329_v28 = vsel %vm1319_vm9, %v1306_v21, %v1324_v24  ;;  %v1311_v29 = vadd.f32 %v2156_v25, %v2024_v59 }
 0x330   : > { %v2103_v30 = vpack.c.bf16 %v1329_v28, %v1329_v28  ;;  %v2158_v31 = vpop.f32.mrf.mxu1  ;;  %v1370_v34 = vadd.f32 %v1369_v32, %v1329_v28 }
 0x331   : > { %vm1320_vm10 = vcmp.gt.f32.partialorder %v1311_v29, 0.0  ;;  %v1325_v33 = vmul.f32 0.1, %v1311_v29 }
 0x332   : > { %1365 = vst [vmem:[%s3097_s27 + $0x18] sm:$0xf] %v2103_v30 }
 0x333   : > { %v1330_v35 = vsel %vm1320_vm10, %v1311_v29, %v1325_v33 }
 0x334   : > { %v1335_v36 = vsel %vm663_vm0, %v1330_v35, 0.0 }
 0x335   : > { %v2104_v37 = vpack.c.bf16 %v1335_v36, %v1335_v36  ;;  %v1371_v38 = vadd.f32 %v1370_v34, %v1335_v36 }
 0x337   : > { %1366 = vst [vmem:[%s3097_s27 + $0x20] sm:$0xf] %v2104_v37  ;;  %v1372_v39 = vrot.slane %v1371_v38, 4 }
 0x339   : > { %v1373_v40 = vadd.f32 %v1372_v39, %v1371_v38 }
 0x33b   : > { %v1374_v41 = vrot.slane %v1373_v40, 2 }
 0x33d   : > { %v1375_v42 = vadd.f32 %v1374_v41, %v1373_v40 }
 0x33f   : > { %v1376_v43 = vrot.slane %v1375_v42, 1 }
 0x341   : > { %v1377_v45 = vadd.f32 %v1376_v43, %v1375_v42 }
 0x343   : > { %v1378_v46 = vadd.f32 %v1377_v45, %v1367_v44 }
 0x345   : > { %1379 = vst [vmem:[#allocation3] sm:$0x1] %v1378_v46 }
 0x346 PF: > { %p2054_p0 = scmp.ne.s32.totalorder %s2700_s20, 2 }
 0x347   : > { %s1384_s2 = sshra.s32 (!%p2054_p0), %s2999_s21, 3  ;;  %s3279_s12 = sld [smem:[#allocation26_spill]] (!%p2054_p0) }
 0x348   : > { %1383 = sbr.rel (%p2054_p0) target bundleno = 1610 (0x64a), region = 104  ;;  %s2106_s25 = sshll.u32 (!%p2054_p0), %s1384_s2, 3 }
 0x349   : > { %s1388_s14 = scalar_lea.vmem (!%p2054_p0), [#allocation2], %s2106_s25 }
 0x34d   : > { %v2445_v2 = vld [vmem:[%s3236_s7 + $0x38] sm:$0xff]   ;;  %v2722_v47 = vmov 0.0   ;;  %v2446_v48 = vld [vmem:[%s3236_s7 + $0x30] sm:$0xff]   ;;  %vm2723_vm11 = vmmov 0   ;;  %v2447_v49 = vld [vmem:[%s3236_s7 + $0x28] sm:$0xff]   ;;  %v3164_v45 = vand.u32 127, %v647_v0 }
 0x34e   : > { %2234 = vmatprep.subr.bf16.mxu0 %v2722_v47  ;;  %2262 = vmatprep.subr.bf16.mxu1 %v2722_v47  ;;  %v2448_v50 = vld [vmem:[%s3236_s7 + $0x20] sm:$0xff]   ;;  %v2457_v52 = vld [vmem:[#allocation12 + $0x30] sm:$0xff]   ;;  %v2458_v54 = vld [vmem:[#allocation12 + $0x28] sm:$0xff]  }
 0x34f   : > { %2235 = vmatpush3.bf16.msra.mxu0 %v2445_v2  ;;  %2250 = vmatprep.mubr.msk.bf16.mxu0 %vm2723_vm11, %v2722_v47  ;;  %v2456_v51 = vld [vmem:[#allocation12 + $0x38] sm:$0xff]   ;;  %v2450_v55 = vld [vmem:[%s3236_s7 + $0x10] sm:$0xff]   ;;  %v2459_v56 = vld [vmem:[#allocation12 + $0x20] sm:$0xff]   ;;  %vm1684_vm12 = vcmp.lt.s32.totalorder %v3164_v45, 8 }
 0x350   : > { %2236 = vmatprep.subr.bf16.mxu0 %v2722_v47  ;;  %2278 = vmatprep.mubr.msk.bf16.mxu1 %vm2723_vm11, %v2722_v47  ;;  %v2449_v53 = vld [vmem:[%s3236_s7 + $0x18] sm:$0xff]   ;;  %v2451_v57 = vld [vmem:[%s3236_s7 + $0x8] sm:$0xff]   ;;  %v2452_v59 = vld [vmem:[%s3236_s7] sm:$0xff]  }
 0x351   : > { %2263 = vmatpush3.bf16.msra.mxu1 %v2456_v51  ;;  %v2460_v58 = vld [vmem:[#allocation12 + $0x18] sm:$0xff]   ;;  %v1390_v61 = vld [vmem:[%s1388_s14 + $0x8] sm:$0xf]  ;;  %v1391_v63 = vld [vmem:[%s1388_s14 + $0x10] sm:$0xf] }
 0x352   : > { %2264 = vmatprep.subr.bf16.mxu1 %v2722_v47  ;;  %v1389_v60 = vld [vmem:[%s1388_s14] sm:$0xf]  ;;  %v1392_v1 = vld [vmem:[%s1388_s14 + $0x18] sm:$0xf]  ;;  %v2462_v7 = vld [vmem:[#allocation12 + $0x8] sm:$0xff]   ;;  %v1395_v16 = vunpack.c.l.bf16 %v1390_v61  ;;  %v1396_v27 = vunpack.c.l.bf16 %v1391_v63 }
 0x353   : > { %2237 = vmatpush3.bf16.msra.mxu0 %v2446_v48  ;;  %v2058_v62 = vcombine.low %v1389_v60, %v1390_v61  ;;  %v2059_v3 = vcombine.low %v1391_v63, %v1392_v1  ;;  %v1393_v4 = vld [vmem:[%s1388_s14 + $0x20] sm:$0xf]  ;;  %v2461_v6 = vld [vmem:[#allocation12 + $0x10] sm:$0xff]   ;;  %v1394_v14 = vunpack.c.l.bf16 %v1389_v60  ;;  %v1397_v29 = vunpack.c.l.bf16 %v1392_v1 }
 0x354   : > { %2238 = vmatprep.subr.bf16.mxu0 %v2722_v47  ;;  %v2060_v5 = vcombine.low %v1393_v4, %v1393_v4  ;;  %v2463_v8 = vld [vmem:[#allocation12] sm:$0xff]   ;;  %v2057_v9 = vld [vmem:[%s3237_s8] ss:$0 sm:$0xff]  ;;  %v1398_v36 = vunpack.c.l.bf16 %v1393_v4 }
 0x355   : > { %2265 = vmatpush3.bf16.msra.mxu1 %v2457_v52  ;;  %v2069_v46 = vld [vmem:[%s3279_s12] ss:$0 sm:$0xff] }
 0x356   : > { %2266 = vmatprep.subr.bf16.mxu1 %v2722_v47 }
 0x357   : > { %2239 = vmatpush3.bf16.msra.mxu0 %v2447_v49 }
 0x358   : > { %2240 = vmatprep.subr.bf16.mxu0 %v2722_v47 }
 0x359   : > { %2267 = vmatpush3.bf16.msra.mxu1 %v2458_v54 }
 0x35a   : > { %2268 = vmatprep.subr.bf16.mxu1 %v2722_v47 }
 0x35b   : > { %2241 = vmatpush3.bf16.msra.mxu0 %v2448_v50 }
 0x35c   : > { %2242 = vmatprep.subr.bf16.mxu0 %v2722_v47 }
 0x35d   : > { %2269 = vmatpush3.bf16.msra.mxu1 %v2459_v56 }
 0x35e   : > { %2270 = vmatprep.subr.bf16.mxu1 %v2722_v47 }
 0x35f   : > { %2243 = vmatpush3.bf16.msra.mxu0 %v2449_v53 }
 0x360   : > { %2244 = vmatprep.subr.bf16.mxu0 %v2722_v47 }
 0x361   : > { %2271 = vmatpush3.bf16.msra.mxu1 %v2460_v58 }
 0x362   : > { %2272 = vmatprep.subr.bf16.mxu1 %v2722_v47 }
 0x363   : > { %2245 = vmatpush3.bf16.msra.mxu0 %v2450_v55 }
 0x364   : > { %2246 = vmatprep.subr.bf16.mxu0 %v2722_v47 }
 0x365   : > { %2273 = vmatpush3.bf16.msra.mxu1 %v2461_v6 }
 0x366   : > { %2274 = vmatprep.subr.bf16.mxu1 %v2722_v47 }
 0x367   : > { %2247 = vmatpush3.bf16.msra.mxu0 %v2451_v57 }
 0x368   : > { %2248 = vmatprep.subr.bf16.mxu0 %v2722_v47 }
 0x369   : > { %2275 = vmatpush3.bf16.msra.mxu1 %v2462_v7 }
 0x36a   : > { %2276 = vmatprep.subr.bf16.mxu1 %v2722_v47 }
 0x36b   : > { %2249 = vmatpush3.bf16.msra.mxu0 %v2452_v59 }
 0x36d   : > { %2277 = vmatpush3.bf16.msra.mxu1 %v2463_v8 }
 0x36e   : > { %2251 = vmatmul.mubr.bf16.vlgmr.msra.gmra.mxu0 %v2058_v62 }
 0x36f   : > { %2254 = vmatprep.mubr.msk.bf16.mxu0 %vm2723_vm11, %v2722_v47 }
 0x376   : > { %2255 = vmatmul.mubr.bf16.gmra.mxu0 %v2059_v3 }
 0x377   : > { %2258 = vmatprep.mubr.msk.bf16.mxu0 %vm2723_vm11, %v2722_v47 }
 0x37e   : > { %2259 = vmatmul.mubr.bf16.gmra.mxu0 %v2060_v5 }
 0x42e   : > { %v1520_v10 = vpop.f32.mrf.mxu0 }
 0x42f   : > { %v1521_v11 = vadd.f32 %v2057_v9, %v1520_v10 }
 0x430   : > { %v2252_v12 = vpop.f32.mrf.mxu0 }
 0x431   : > { %v1542_v15 = vmax.f32 %v1521_v11, 0.0 }
 0x432   : > { %v1523_v13 = vpop.f32.mrf.mxu0 }
 0x433   : > { %v1524_v17 = vadd.f32 %v2057_v9, %v1523_v13  ;;  %v1547_v21 = vadd.f32 %v1542_v15, %v1394_v14 }
 0x434   : > { %v2253_v18 = vpop.f32.mrf.mxu0 }
 0x435   : > { %v1543_v19 = vmax.f32 %v1524_v17, 0.0 }
 0x436   : > { %v1528_v20 = vpop.f32.mrf.mxu0 }
 0x437   : > { %v1548_v22 = vadd.f32 %v1543_v19, %v1395_v16  ;;  %v1529_v23 = vadd.f32 %v2057_v9, %v1528_v20 }
 0x438   : > { %v2256_v24 = vpop.f32.mrf.mxu0 }
 0x439   : > { %v1552_v25 = vpack.c.bf16 %v1548_v22, %v1547_v21  ;;  %v1544_v28 = vmax.f32 %v1529_v23, 0.0 }
 0x43a   : > { %v1531_v26 = vpop.f32.mrf.mxu0 }
 0x43b   : > { %v1532_v30 = vadd.f32 %v2057_v9, %v1531_v26  ;;  %2279 = vmatmul.mubr.bf16.vlgmr.msra.gmra.mxu1 %v1552_v25  ;;  %v1549_v34 = vadd.f32 %v1544_v28, %v1396_v27 }
 0x43c   : > { %v2257_v31 = vpop.f32.mrf.mxu0  ;;  %2282 = vmatprep.mubr.msk.bf16.mxu1 %vm2723_vm11, %v2722_v47 }
 0x43d   : > { %v1545_v32 = vmax.f32 %v1532_v30, 0.0 }
 0x43e   : > { %v1536_v33 = vpop.f32.mrf.mxu0 }
 0x43f   : > { %v1550_v35 = vadd.f32 %v1545_v32, %v1397_v29  ;;  %v1537_v37 = vadd.f32 %v2057_v9, %v1536_v33 }
 0x440   : > { %v2260_v38 = vpop.f32.mrf.mxu0 }
 0x441   : > { %v1546_v39 = vmax.f32 %v1537_v37, 0.0  ;;  %v1553_v40 = vpack.c.bf16 %v1550_v35, %v1549_v34 }
 0x442   : > { %v1539_v41 = vpop.f32.mrf.mxu0 }
 0x443   : > { %v1551_v42 = vadd.f32 %v1546_v39, %v1398_v36  ;;  %2283 = vmatmul.mubr.bf16.gmra.mxu1 %v1553_v40 }
 0x444   : > { %v2261_v43 = vpop.f32.mrf.mxu0  ;;  %2286 = vmatprep.mubr.msk.bf16.mxu1 %vm2723_vm11, %v2722_v47 }
 0x445   : > { %v1554_v44 = vpack.c.bf16 %v1551_v42, %v1551_v42 }
 0x44b   : > { %2287 = vmatmul.mubr.bf16.gmra.mxu1 %v1554_v44 }
 0x4fb   : > { %v1660_v2 = vpop.f32.mrf.mxu1 }
 0x4fc   : > { %v1661_v48 = vadd.f32 %v2069_v46, %v1660_v2 }
 0x4fd   : > { %v2280_v49 = vpop.f32.mrf.mxu1 }
 0x4fe   : > { %v1685_v50 = vsel %vm1684_vm12, %v1661_v48, -inf }
 0x4ff   : > { %1690 = vmax.xlane.f32.xlu0 %v1685_v50  ;;  %v1663_v51 = vpop.f32.mrf.mxu1 }
 0x500   : > { %v1664_v47 = vadd.f32 %v2069_v46, %v1663_v51 }
 0x501   : > { %v2281_v52 = vpop.f32.mrf.mxu1 }
 0x502   : > { %v1686_v0 = vsel %vm1684_vm12, %v1664_v47, -inf }
 0x503   : > { %1692 = vmax.xlane.f32.xlu0 %v1686_v0  ;;  %v1668_v53 = vpop.f32.mrf.mxu1 }
 0x504   : > { %v1669_v54 = vadd.f32 %v2069_v46, %v1668_v53 }
 0x505   : > { %v2284_v55 = vpop.f32.mrf.mxu1 }
 0x506   : > { %v1687_v56 = vsel %vm1684_vm12, %v1669_v54, -inf }
 0x507   : > { %1694 = vmax.xlane.f32.xlu1 %v1687_v56  ;;  %v1671_v57 = vpop.f32.mrf.mxu1 }
 0x508   : > { %v1672_v58 = vadd.f32 %v2069_v46, %v1671_v57 }
 0x509   : > { %v2285_v59 = vpop.f32.mrf.mxu1 }
 0x50a   : > { %v1688_v60 = vsel %vm1684_vm12, %v1672_v58, -inf }
 0x50b   : > { %1696 = vmax.xlane.f32.xlu1 %v1688_v60  ;;  %v1676_v61 = vpop.f32.mrf.mxu1 }
 0x50c   : > { %v1677_v62 = vadd.f32 %v2069_v46, %v1676_v61 }
 0x50d   : > { %v2288_v63 = vpop.f32.mrf.mxu1 }
 0x50e   : > { %v1689_v1 = vsel %vm1684_vm12, %v1677_v62, -inf }
 0x50f   : > { %1698 = vmax.xlane.f32.xlu0 %v1689_v1  ;;  %v1679_v3 = vpop.f32.mrf.mxu1 }
 0x511   : > { %v2289_v4 = vpop.f32.mrf.mxu1 }
 0x588   : > { %v1691_v5 = vpop.xlane.xlu0 %1690 }
 0x589   : > { %v1700_v6 = vsub.f32 %v1685_v50, %v1691_v5 }
 0x58b   : > { %v1705_v7 = vmul.f32 1.442695, %v1700_v6 }
 0x58c   : > { %v1693_v8 = vpop.xlane.xlu0 %1692 }
 0x58d   : > { %2464 = vpow2.f32 %v1705_v7  ;;  %v1701_v9 = vsub.f32 %v1686_v0, %v1693_v8 }
 0x58f   : > { %v1707_v10 = vmul.f32 1.442695, %v1701_v9 }
 0x590   : > { %v1695_v11 = vpop.xlane.xlu1 %1694 }
 0x591   : > { %2466 = vpow2.f32 %v1707_v10  ;;  %v1702_v12 = vsub.f32 %v1687_v56, %v1695_v11 }
 0x593   : > { %v1709_v13 = vmul.f32 1.442695, %v1702_v12 }
 0x594   : > { %v1697_v14 = vpop.xlane.xlu1 %1696 }
 0x595   : > { %2468 = vpow2.f32 %v1709_v13  ;;  %v1703_v15 = vsub.f32 %v1688_v60, %v1697_v14 }
 0x597   : > { %v1711_v16 = vmul.f32 1.442695, %v1703_v15 }
 0x598   : > { %v1699_v17 = vpop.xlane.xlu0 %1698 }
 0x599   : > { %2470 = vpow2.f32 %v1711_v16  ;;  %v1704_v18 = vsub.f32 %v1689_v1, %v1699_v17 }
 0x59a   : > { %v2465_v19 = vpop.eup %2464 }
 0x59b   : > { %v1713_v20 = vmul.f32 1.442695, %v1704_v18  ;;  %v1715_v21 = vsel %vm1684_vm12, %v2465_v19, 0.0 }
 0x59c   : > { %1720 = vadd.xlane.f32.xlu1 %v1715_v21 }
 0x59d   : > { %2472 = vpow2.f32 %v1713_v20 }
 0x59e   : > { %v2467_v22 = vpop.eup %2466 }
 0x59f   : > { %v1716_v23 = vsel %vm1684_vm12, %v2467_v22, 0.0 }
 0x5a0   : > { %1722 = vadd.xlane.f32.xlu0 %v1716_v23 }
 0x5a2   : > { %v2469_v24 = vpop.eup %2468 }
 0x5a3   : > { %v1717_v25 = vsel %vm1684_vm12, %v2469_v24, 0.0 }
 0x5a4   : > { %1724 = vadd.xlane.f32.xlu1 %v1717_v25 }
 0x5a6   : > { %v2471_v26 = vpop.eup %2470 }
 0x5a7   : > { %v1718_v27 = vsel %vm1684_vm12, %v2471_v26, 0.0 }
 0x5a8   : > { %1726 = vadd.xlane.f32.xlu0 %v1718_v27 }
 0x5aa   : > { %v2473_v28 = vpop.eup %2472 }
 0x5ab   : > { %v1719_v29 = vsel %vm1684_vm12, %v2473_v28, 0.0 }
 0x5ac   : > { %1728 = vadd.xlane.f32.xlu1 %v1719_v29 }
 0x625   : > { %v1721_v30 = vpop.xlane.xlu1 %1720 }
 0x626   : > { %2474 = vlog2.f32 %v1721_v30 }
 0x629   : > { %v1723_v31 = vpop.xlane.xlu0 %1722 }
 0x62a   : > { %2476 = vlog2.f32 %v1723_v31 }
 0x62d   : > { %v1725_v32 = vpop.xlane.xlu1 %1724 }
 0x62e   : > { %2478 = vlog2.f32 %v1725_v32 }
 0x631   : > { %v1727_v33 = vpop.xlane.xlu0 %1726 }
 0x632   : > { %2480 = vlog2.f32 %v1727_v33 }
 0x633   : > { %v2475_v34 = vpop.eup %2474 }
 0x634   : > { %v1731_v35 = vmul.f32 0.6931472, %v2475_v34 }
 0x635   : > { %v1729_v36 = vpop.xlane.xlu1 %1728 }
 0x636   : > { %v1740_v37 = vsub.f32 %v1700_v6, %v1731_v35  ;;  %2482 = vlog2.f32 %v1729_v36 }
 0x637   : > { %v2477_v38 = vpop.eup %2476 }
 0x638   : > { %v1745_v39 = vsel %vm1684_vm12, %v1740_v37, 0.0  ;;  %v1733_v40 = vmul.f32 0.6931472, %v2477_v38 }
 0x639   : > { %1750 = vst [vmem:[#allocation13] sm:$0xff] %v1745_v39 }
 0x63a   : > { %v1741_v41 = vsub.f32 %v1701_v9, %v1733_v40 }
 0x63b   : > { %v2479_v42 = vpop.eup %2478 }
 0x63c   : > { %v1746_v43 = vsel %vm1684_vm12, %v1741_v41, 0.0  ;;  %v1735_v44 = vmul.f32 0.6931472, %v2479_v42 }
 0x63d   : > { %1751 = vst [vmem:[#allocation13 + $0x8] sm:$0xff] %v1746_v43 }
 0x63e   : > { %v1742_v46 = vsub.f32 %v1702_v12, %v1735_v44 }
 0x63f   : > { %v2481_v2 = vpop.eup %2480 }
 0x640   : > { %v1747_v48 = vsel %vm1684_vm12, %v1742_v46, 0.0  ;;  %v1737_v49 = vmul.f32 0.6931472, %v2481_v2 }
 0x641   : > { %1752 = vst [vmem:[#allocation13 + $0x10] sm:$0xff] %v1747_v48 }
 0x642   : > { %v1743_v50 = vsub.f32 %v1703_v15, %v1737_v49 }
 0x643   : > { %v2483_v51 = vpop.eup %2482 }
 0x644   : > { %v1748_v47 = vsel %vm1684_vm12, %v1743_v50, 0.0  ;;  %v1739_v52 = vmul.f32 0.6931472, %v2483_v51 }
 0x645   : > { %1753 = vst [vmem:[#allocation13 + $0x18] sm:$0xff] %v1748_v47 }
 0x646   : > { %v1744_v0 = vsub.f32 %v1704_v18, %v1739_v52 }
 0x648   : > { %v1749_v53 = vsel %vm1684_vm12, %v1744_v0, 0.0 }
 0x649   : > { %1754 = vst [vmem:[#allocation13 + $0x20] sm:$0xff] %v1749_v53 }
 0x64a PF: > { %p2340_p1 = scmp.eq.s32.totalorder %s2843_s16, 2  ;;  %s2724_s10 = smov [#allocation13]  }
 0x64b   : > { %s1771_s20 = sshll.u32 %s2724_s10, 4  ;;  %s1772_s20 = int_to_ptr.vmem [resolvable:$true] %s1771_s20 }
 0x64c   : > { %s2618_s30 = scalar_lea.vmem %s1772_s20, 640  ;;  %s2624_s13 = scalar_lea.vmem %s1772_s20, 1280 }
 0x64d   : > { %p2619_p11 = scmp.ne.s32.totalorder %s1772_s20, %s2618_s30  ;;  %p2625_p6 = scmp.lt.s32.totalorder %s1772_s20, %s1772_s20 }
 0x64e   : > { %p2626_p10 = scmp.lt.s32.totalorder %s2624_s13, %s2618_s30 }
 0x64f   : > { %p2620_p2 = pnand %p2619_p11, %p2340_p1 }
 0x650   : > { %p2627_p9 = por %p2626_p10, %p2625_p6 }
 0x651   : > { %p2621_p7 = pneg %p2620_p2 }
 0x653   : > { %p2628_p13 = pnand %p2627_p9, %p2621_p7 }
 0x655   : > { %2631 = shalt.err (!%p2628_p13)
}
 0x656   : > { %s2725_s11 = smov 128   ;;  %s2726_s15 = smov 8  }
 0x657   : > { %s3280_s28 = sld [smem:[#allocation27_spill]] }
 0x65d   : > { %2309 = dma.vmem_to_hbm [thread:$0]  (%p2340_p1), %s1772_s20, 640, %s3280_s28, [#allocation7], %s2725_s11, %s2725_s11, %s2726_s15  }
 0x65e PF: > { %s3281_s17 = sld [smem:[#allocation20_spill]] }
 0x664   : > { %p2341_p3 = scmp.ge.s32.totalorder %s3281_s17, 2  ;;  %s3282_s25 = sadd.s32 4294967294, %s3281_s17  }
 0x665   : > { %p2342_p8 = scmp.eq.s32.totalorder %s3282_s25, 2 }
 0x667   : > { %p2330_p4 = pnand %p2342_p8, %p2341_p3 }
 0x669   : > { %p2331_p5 = pneg %p2330_p4 }
 0x66b   : > { %2683 = dma.done.wait (%p2331_p5), [#allocation7], 640  }
 0x66c   : > { %2685 = vsyncadd (%p2331_p5), [#allocation7], 4294966656  ;;  %s28_s22 = sadd.s32 1, %s3281_s17   ;;  %s3283_s16 = sld [smem:[#allocation22_spill]] }
 0x66d   : > { %p25_p12 = scmp.ge.s32.totalorder %s28_s22, 5   ;;  %s3284_s20 = sld [smem:[#allocation19_spill]] }
 0x66e   : > { %s3285_s21 = sld [smem:[#allocation21_spill]]  ;;  %s3286_s17 = smov %s2692_s18 }
 0x66f   : > { %s3287_s18 = smov %s2696_s19  ;;  %27 = sbr.rel (!%p25_p12) target bundleno = 13 (0xd), region = 170 }
 0x672   : > { %s3288_s19 = smov %s3283_s16 }
 0x674   :  { %1792 = vsyncpa [#allocation6], 1 }
 0x675   :  { %1794 = vsyncpa [#allocation6 + $0x1], 1 }
 0x676   :  { %1795 = vsyncpa [#allocation9], 1 }
 0x677   :  { %1796 = vsyncpa [#allocation7], 1 }
 0x678   :  { %1798 = vsyncpa [#allocation7 + $0x1], 1 }

</bundles_post_ra>
